<compile_context>
chip_gen: v5e
topology: v5e:2x2
jax: 0.10.0
libtpu: 0.0.40
codegen_flags: <defaults>
</compile_context>

<pallas_src>
import functools

import jax
import jax.numpy as jnp
from jax.experimental import pallas as pl
from jax.experimental.pallas import tpu as pltpu

BN_EPS = 1e-5


def _vmem_limit_bytes():
    # ~48 MiB scoped on 128-MiB parts (v5e/v6e); ~32 MiB on 64-MiB parts (v7x).
    try:
        cap = pltpu.get_tpu_info().vmem_capacity_bytes
    except Exception:
        cap = 128 * 1024 * 1024
    return int(min(48 * 1024 * 1024, max(16 * 1024 * 1024, cap // 2)))


VMEM_LIMIT = _vmem_limit_bytes()


def _pick_th(ho, wo, cout):
    """Output-row tile height: divides Ho, keeps TH*Wo a multiple of 8 and the f32 register
    accumulator (TH*Wo x Cout) modest."""
    max_rows = max(8, min(2048, (256 * 1024) // (4 * max(cout, 1))))
    best = None
    for th in range(1, ho + 1):
        if ho % th:
            continue
        r = th * wo
        if r % 8 == 0 and r <= max_rows:
            best = th
    if best is None:                      # relax the size cap, keep the %8 constraint
        for th in range(1, ho + 1):
            if ho % th == 0 and (th * wo) % 8 == 0:
                best = th
                break
    return best if best is not None else ho


def _pick_tm(rows, cout, target_bytes=2 << 20):
    """BN-apply row tile: multiple of 128 (lane-dense NCHW writes), divides rows, ~target bytes."""
    cap_rows = max(128, target_bytes // (6 * max(cout, 1)))
    best = None
    tm = 128
    while tm <= rows:
        if rows % tm == 0 and tm <= cap_rows:
            best = tm
        tm += 128
    return best if best is not None else rows


# ---------------- Pallas kernels ----------------

def conv_bn_stats_kernel(x_ref, w_ref, y_ref, stats_ref, *, k, stride, dilation, th, wo):
    """Conv (K*K shifted-window matmuls, bf16 in / f32 register accumulation) + partial BN stats.

    x_ref    : (Hp, Wp, Cin)    whole padded NHWC image (batch dim squeezed); its block index only
                                depends on the batch grid axis, so it is fetched once per image.
    w_ref    : (K*K, Cin, Cout) resident weights, channels unpadded.
    y_ref    : (th*wo, Cout)    conv output rows for this (image, row-tile) block, bf16.
    stats_ref: (2, Cout)        row0 = tile mean, row1 = tile M2 (sum of squared deviations).
    """
    rows = th * wo
    t = pl.program_id(1)
    h_step = th * stride
    h_base = t * h_step
    if h_step % 8 == 0:
        h_base = pl.multiple_of(h_base, 8)

    acc = None
    for kh in range(k):
        for kw in range(k):
            h0 = h_base + kh * dilation
            w0 = kw * dilation
            if stride == 1:
                win = x_ref[pl.ds(h0, th), pl.ds(w0, wo), :]
            else:
                # TODO(synk): stride>1 strided sublane reads may force hidden relayouts; a
                # stride-phase-separated index_map would avoid them if this path becomes hot.
                win = x_ref[pl.ds(h0, th, stride), pl.ds(w0, wo, stride), :]
            win2d = win.reshape(rows, win.shape[-1])                       # (rows, Cin) bf16
            part = jnp.dot(win2d, w_ref[kh * k + kw],                      # MXU, f32 accumulate
                           preferred_element_type=jnp.float32)
            acc = part if acc is None else acc + part

    y_ref[...] = acc.astype(y_ref.dtype)                                   # bf16 intermediate

    # Partial BN statistics for this tile (combined exactly in the wrapper; all tiles equal-sized).
    inv_rows = 1.0 / rows
    tile_mean = jnp.sum(acc, axis=0, keepdims=True) * inv_rows             # (1, Cout)
    cent = acc - tile_mean
    tile_m2 = jnp.sum(cent * cent, axis=0, keepdims=True)                  # (1, Cout)
    stats_ref[0:1, :] = tile_mean
    stats_ref[1:2, :] = tile_m2


def bn_apply_nchw_kernel(y_ref, scale_ref, shift_ref, o_ref):
    """y_bn = y*scale + shift on a (TM, Cout) block, stored transposed as (Cout, TM) -> NCHW."""
    y = y_ref[...].astype(jnp.float32)
    bn = y * scale_ref[...] + shift_ref[...]
    o_ref[...] = jnp.transpose(bn, (1, 0)).astype(o_ref.dtype)


# ---------------- wrapper ----------------

@functools.partial(jax.jit, static_argnames=("k", "stride", "padding", "dilation"))
def conv2d_batchnorm(x_nchw, weight, bias, gamma, beta, *, k, stride, padding, dilation):
    """Forward of conv2DBatchNorm (is_batchnorm=True, BN in training mode: batch statistics)."""
    del bias  # bias before training-mode BatchNorm is algebraically cancelled by mean subtraction
    N, Cin, H, W = x_nchw.shape
    Cout = weight.shape[0]
    Ho = (H + 2 * padding - dilation * (k - 1) - 1) // stride + 1
    Wo = (W + 2 * padding - dilation * (k - 1) - 1) // stride + 1
    rows = Ho * Wo
    Mtot = N * rows
    Hp, Wp = H + 2 * padding, W + 2 * padding

    TH = _pick_th(Ho, Wo, Cout)
    rows_tile = TH * Wo
    n_tiles = Ho // TH
    n_steps = N * n_tiles
    assert rows_tile % 8 == 0, "demo assumes per-tile row count divisible by 8"
    # TODO(synk): fully ragged shapes need a padded grid with masked tail rows.

    # NCHW -> NHWC, pad spatial only (channels stay unpadded), bf16 for the MXU.
    x_nhwc = jnp.transpose(x_nchw, (0, 2, 3, 1))
    x_pad = jnp.pad(x_nhwc, ((0, 0), (padding, padding), (padding, padding),
                             (0, 0))).astype(jnp.bfloat16)

    # PyTorch weight [Cout, Cin, Kh, Kw] -> [K*K, Cin, Cout], bf16, unpadded channels.
    w = jnp.transpose(weight, (2, 3, 1, 0)).reshape(k * k, Cin, Cout).astype(jnp.bfloat16)

    kernel1 = functools.partial(conv_bn_stats_kernel,
                                k=k, stride=stride, dilation=dilation, th=TH, wo=Wo)

    k1_cost = pl.CostEstimate(
        flops=2 * Mtot * k * k * Cin * Cout,
        transcendentals=0,
        bytes_accessed=(N * Hp * Wp * Cin * 2 + k * k * Cin * Cout * 2
                        + Mtot * Cout * 2 + n_steps * 2 * Cout * 4))

    # --- kernel 1: conv + partial BN stats, fully parallel (image, row-tile) grid ---
    conv_y, stats = pl.pallas_call(
        kernel1,
        out_shape=(jax.ShapeDtypeStruct((Mtot, Cout), jnp.bfloat16),
                   jax.ShapeDtypeStruct((n_steps, 2, Cout), jnp.float32)),
        grid_spec=pltpu.PrefetchScalarGridSpec(
            num_scalar_prefetch=0,
            grid=(N, n_tiles),
            in_specs=[
                pl.BlockSpec((None, Hp, Wp, Cin), lambda n, t: (n, 0, 0, 0)),  # image, reused over t
                pl.BlockSpec((k * k, Cin, Cout), lambda n, t: (0, 0, 0)),      # resident weights
            ],
            out_specs=[
                pl.BlockSpec((rows_tile, Cout), lambda n, t: (n * n_tiles + t, 0)),
                pl.BlockSpec((None, 2, Cout), lambda n, t: (n * n_tiles + t, 0, 0)),
            ],
        ),
        compiler_params=pltpu.CompilerParams(
            dimension_semantics=("parallel", "parallel"),
            vmem_limit_bytes=VMEM_LIMIT,
        ),
        cost_estimate=k1_cost,
    )(x_pad, w)

    # --- exact Chan combine of equal-sized per-tile partial stats (tiny, done in XLA) ---
    tile_mean = stats[:, 0, :]                                  # (n_steps, Cout)
    tile_m2 = stats[:, 1, :]
    mean = jnp.mean(tile_mean, axis=0)
    m2 = jnp.sum(tile_m2, axis=0) + rows_tile * jnp.sum((tile_mean - mean) ** 2, axis=0)
    var = jnp.maximum(m2 / Mtot, 0.0)                           # biased variance (BN normalize)
    inv = gamma.astype(jnp.float32) * jax.lax.rsqrt(var + BN_EPS)
    scale = inv.reshape(1, Cout)
    shift = (beta.astype(jnp.float32) - mean * inv).reshape(1, Cout)

    # --- kernel 2: normalize + fused NHWC->NCHW store (no XLA slice/transpose pass) ---
    TM = _pick_tm(rows, Cout)
    tiles2 = rows // TM
    out_isize = jnp.dtype(x_nchw.dtype).itemsize

    k2_cost = pl.CostEstimate(
        flops=2 * Mtot * Cout,
        transcendentals=0,
        bytes_accessed=Mtot * Cout * 2 + Mtot * Cout * out_isize + 2 * Cout * 4)

    out_flat = pl.pallas_call(
        bn_apply_nchw_kernel,
        out_shape=jax.ShapeDtypeStruct((N, Cout, rows), x_nchw.dtype),
        grid_spec=pltpu.PrefetchScalarGridSpec(
            num_scalar_prefetch=0,
            grid=(N, tiles2),
            in_specs=[
                pl.BlockSpec((TM, Cout), lambda n, t: (n * tiles2 + t, 0)),
                pl.BlockSpec((1, Cout), lambda n, t: (0, 0)),
                pl.BlockSpec((1, Cout), lambda n, t: (0, 0)),
            ],
            out_specs=pl.BlockSpec((None, Cout, TM), lambda n, t: (n, 0, t)),
        ),
        compiler_params=pltpu.CompilerParams(
            dimension_semantics=("parallel", "parallel"),
            vmem_limit_bytes=VMEM_LIMIT,
        ),
        cost_estimate=k2_cost,
    )(conv_y, scale, shift)

    return out_flat.reshape(N, Cout, Ho, Wo)                    # free reshape, already NCHW


# ---------------- reference (plain JAX, f32 HIGHEST) ----------------

def _reference(x_nchw, weight, bias, gamma, beta, *, k, stride, padding, dilation):
    y = jax.lax.conv_general_dilated(
        x_nchw, weight, window_strides=(stride, stride),
        padding=((padding, padding), (padding, padding)),
        rhs_dilation=(dilation, dilation),
        dimension_numbers=("NCHW", "OIHW", "NCHW"),
        precision=jax.lax.Precision.HIGHEST)
    y = y + bias[None, :, None, None]
    mean = y.mean(axis=(0, 2, 3), keepdims=True)
    var = y.var(axis=(0, 2, 3), keepdims=True)
    return (y - mean) / jnp.sqrt(var + BN_EPS) * gamma[None, :, None, None] + beta[None, :, None, None]


if __name__ == "__main__":
    # conv2DBatchNorm(in_channels=4, n_filters=8, k_size=3, stride=1, padding=1,
    #                 bias=True, dilation=1, is_batchnorm=True)
    N, Cin, H, W = 2, 4, 16, 16
    Cout, K, STRIDE, PAD, DIL = 8, 3, 1, 1, 1

    key = jax.random.PRNGKey(0)
    kx, kw, kb, kg, kbeta = jax.random.split(key, 5)
    x = jax.random.normal(kx, (N, Cin, H, W), dtype=jnp.float32)
    weight = jax.random.normal(kw, (Cout, Cin, K, K), dtype=jnp.float32) * 0.1
    bias = jax.random.normal(kb, (Cout,), dtype=jnp.float32) * 0.1
    gamma = 1.0 + 0.1 * jax.random.normal(kg, (Cout,), dtype=jnp.float32)
    beta = 0.1 * jax.random.normal(kbeta, (Cout,), dtype=jnp.float32)

    out = conv2d_batchnorm(x, weight, bias, gamma, beta,
                           k=K, stride=STRIDE, padding=PAD, dilation=DIL)
    out = jax.block_until_ready(out)

    ref = _reference(x, weight, bias, gamma, beta,
                     k=K, stride=STRIDE, padding=PAD, dilation=DIL)
    assert out.shape == (N, Cout, H, W), out.shape
    # bf16 MXU inputs + bf16 conv intermediate vs f32-HIGHEST reference -> tolerance ~3e-2.
    max_err = float(jnp.max(jnp.abs(out - ref)))
    assert jnp.allclose(out, ref, atol=3e-2, rtol=3e-2), max_err
    print("KERNEL_OK")
</pallas_src>

<mosaic_0001>
module attributes {stable_mosaic.version = 11 : i64} {
  func.func @conv_bn_stats_kernel(%arg0: i32, %arg1: i32, %arg2: memref<1x18x18x4xbf16, #tpu.memory_space<vmem>>, %arg3: memref<9x4x8xbf16, #tpu.memory_space<vmem>>, %arg4: memref<256x8xbf16, #tpu.memory_space<vmem>>, %arg5: memref<1x2x8xf32, #tpu.memory_space<vmem>>) attributes {dimension_semantics = [#tpu.dimension_semantics<parallel>, #tpu.dimension_semantics<parallel>], iteration_bounds = array<i64: 2, 1>, scalar_prefetch = 0 : i64, scratch_operands = 0 : i64, tpu.core_type = #tpu.core_type<tc>, window_params = [{transform_indices = @transform_0, window_bounds = array<i64: 1, 18, 18, 4>}, {pipeline_mode = #tpu.pipeline_mode<synchronous>, transform_indices = @transform_1, window_bounds = array<i64: 9, 4, 8>}, {transform_indices = @transform_2, window_bounds = array<i64: 256, 8>}, {transform_indices = @transform_3, window_bounds = array<i64: 1, 2, 8>}]} {
    %c16_i32 = arith.constant 16 : i32
    %0 = arith.muli %arg1, %c16_i32 : i32
    %1 = tpu.assume_multiple %0, 8 : i32
    %c0_i32 = arith.constant 0 : i32
    %2 = arith.addi %1, %c0_i32 : i32
    %c0 = arith.constant 0 : index
    %3 = arith.index_cast %2 : i32 to index
    %c0_0 = arith.constant 0 : index
    %c0_1 = arith.constant 0 : index
    %4 = vector.load %arg2[%c0, %3, %c0_0, %c0_1] : memref<1x18x18x4xbf16, #tpu.memory_space<vmem>>, vector<1x16x16x4xbf16>
    %5 = vector.shape_cast %4 : vector<1x16x16x4xbf16> to vector<16x16x4xbf16>
    %6 = vector.shape_cast %5 : vector<16x16x4xbf16> to vector<256x4xbf16>
    %c0_2 = arith.constant 0 : index
    %c0_3 = arith.constant 0 : index
    %c0_4 = arith.constant 0 : index
    %7 = vector.load %arg3[%c0_2, %c0_3, %c0_4] : memref<9x4x8xbf16, #tpu.memory_space<vmem>>, vector<1x4x8xbf16>
    %8 = vector.shape_cast %7 : vector<1x4x8xbf16> to vector<4x8xbf16>
    %cst = arith.constant dense<0.000000e+00> : vector<256x8xf32>
    %9 = tpu.matmul %6, %8, %cst {dimension_numbers = #tpu.dot_dimension_numbers<[1], [0], [0], [1], [0, 0, 1, 1], [], []>} : vector<256x4xbf16>, vector<4x8xbf16>, vector<256x8xf32> -> vector<256x8xf32>
    %c0_i32_5 = arith.constant 0 : i32
    %10 = arith.addi %1, %c0_i32_5 : i32
    %c0_6 = arith.constant 0 : index
    %11 = arith.index_cast %10 : i32 to index
    %c1 = arith.constant 1 : index
    %c0_7 = arith.constant 0 : index
    %12 = vector.load %arg2[%c0_6, %11, %c1, %c0_7] : memref<1x18x18x4xbf16, #tpu.memory_space<vmem>>, vector<1x16x16x4xbf16>
    %13 = vector.shape_cast %12 : vector<1x16x16x4xbf16> to vector<16x16x4xbf16>
    %14 = vector.shape_cast %13 : vector<16x16x4xbf16> to vector<256x4xbf16>
    %c1_8 = arith.constant 1 : index
    %c0_9 = arith.constant 0 : index
    %c0_10 = arith.constant 0 : index
    %15 = vector.load %arg3[%c1_8, %c0_9, %c0_10] : memref<9x4x8xbf16, #tpu.memory_space<vmem>>, vector<1x4x8xbf16>
    %16 = vector.shape_cast %15 : vector<1x4x8xbf16> to vector<4x8xbf16>
    %cst_11 = arith.constant dense<0.000000e+00> : vector<256x8xf32>
    %17 = tpu.matmul %14, %16, %cst_11 {dimension_numbers = #tpu.dot_dimension_numbers<[1], [0], [0], [1], [0, 0, 1, 1], [], []>} : vector<256x4xbf16>, vector<4x8xbf16>, vector<256x8xf32> -> vector<256x8xf32>
    %18 = arith.addf %9, %17 : vector<256x8xf32>
    %c0_i32_12 = arith.constant 0 : i32
    %19 = arith.addi %1, %c0_i32_12 : i32
    %c0_13 = arith.constant 0 : index
    %20 = arith.index_cast %19 : i32 to index
    %c2 = arith.constant 2 : index
    %c0_14 = arith.constant 0 : index
    %21 = vector.load %arg2[%c0_13, %20, %c2, %c0_14] : memref<1x18x18x4xbf16, #tpu.memory_space<vmem>>, vector<1x16x16x4xbf16>
    %22 = vector.shape_cast %21 : vector<1x16x16x4xbf16> to vector<16x16x4xbf16>
    %23 = vector.shape_cast %22 : vector<16x16x4xbf16> to vector<256x4xbf16>
    %c2_15 = arith.constant 2 : index
    %c0_16 = arith.constant 0 : index
    %c0_17 = arith.constant 0 : index
    %24 = vector.load %arg3[%c2_15, %c0_16, %c0_17] : memref<9x4x8xbf16, #tpu.memory_space<vmem>>, vector<1x4x8xbf16>
    %25 = vector.shape_cast %24 : vector<1x4x8xbf16> to vector<4x8xbf16>
    %cst_18 = arith.constant dense<0.000000e+00> : vector<256x8xf32>
    %26 = tpu.matmul %23, %25, %cst_18 {dimension_numbers = #tpu.dot_dimension_numbers<[1], [0], [0], [1], [0, 0, 1, 1], [], []>} : vector<256x4xbf16>, vector<4x8xbf16>, vector<256x8xf32> -> vector<256x8xf32>
    %27 = arith.addf %18, %26 : vector<256x8xf32>
    %c1_i32 = arith.constant 1 : i32
    %28 = arith.addi %1, %c1_i32 : i32
    %c0_19 = arith.constant 0 : index
    %29 = arith.index_cast %28 : i32 to index
    %c0_20 = arith.constant 0 : index
    %c0_21 = arith.constant 0 : index
    %30 = vector.load %arg2[%c0_19, %29, %c0_20, %c0_21] : memref<1x18x18x4xbf16, #tpu.memory_space<vmem>>, vector<1x16x16x4xbf16>
    %31 = vector.shape_cast %30 : vector<1x16x16x4xbf16> to vector<16x16x4xbf16>
    %32 = vector.shape_cast %31 : vector<16x16x4xbf16> to vector<256x4xbf16>
    %c3 = arith.constant 3 : index
    %c0_22 = arith.constant 0 : index
    %c0_23 = arith.constant 0 : index
    %33 = vector.load %arg3[%c3, %c0_22, %c0_23] : memref<9x4x8xbf16, #tpu.memory_space<vmem>>, vector<1x4x8xbf16>
    %34 = vector.shape_cast %33 : vector<1x4x8xbf16> to vector<4x8xbf16>
    %cst_24 = arith.constant dense<0.000000e+00> : vector<256x8xf32>
    %35 = tpu.matmul %32, %34, %cst_24 {dimension_numbers = #tpu.dot_dimension_numbers<[1], [0], [0], [1], [0, 0, 1, 1], [], []>} : vector<256x4xbf16>, vector<4x8xbf16>, vector<256x8xf32> -> vector<256x8xf32>
    %36 = arith.addf %27, %35 : vector<256x8xf32>
    %c1_i32_25 = arith.constant 1 : i32
    %37 = arith.addi %1, %c1_i32_25 : i32
    %c0_26 = arith.constant 0 : index
    %38 = arith.index_cast %37 : i32 to index
    %c1_27 = arith.constant 1 : index
    %c0_28 = arith.constant 0 : index
    %39 = vector.load %arg2[%c0_26, %38, %c1_27, %c0_28] : memref<1x18x18x4xbf16, #tpu.memory_space<vmem>>, vector<1x16x16x4xbf16>
    %40 = vector.shape_cast %39 : vector<1x16x16x4xbf16> to vector<16x16x4xbf16>
    %41 = vector.shape_cast %40 : vector<16x16x4xbf16> to vector<256x4xbf16>
    %c4 = arith.constant 4 : index
    %c0_29 = arith.constant 0 : index
    %c0_30 = arith.constant 0 : index
    %42 = vector.load %arg3[%c4, %c0_29, %c0_30] : memref<9x4x8xbf16, #tpu.memory_space<vmem>>, vector<1x4x8xbf16>
    %43 = vector.shape_cast %42 : vector<1x4x8xbf16> to vector<4x8xbf16>
    %cst_31 = arith.constant dense<0.000000e+00> : vector<256x8xf32>
    %44 = tpu.matmul %41, %43, %cst_31 {dimension_numbers = #tpu.dot_dimension_numbers<[1], [0], [0], [1], [0, 0, 1, 1], [], []>} : vector<256x4xbf16>, vector<4x8xbf16>, vector<256x8xf32> -> vector<256x8xf32>
    %45 = arith.addf %36, %44 : vector<256x8xf32>
    %c1_i32_32 = arith.constant 1 : i32
    %46 = arith.addi %1, %c1_i32_32 : i32
    %c0_33 = arith.constant 0 : index
    %47 = arith.index_cast %46 : i32 to index
    %c2_34 = arith.constant 2 : index
    %c0_35 = arith.constant 0 : index
    %48 = vector.load %arg2[%c0_33, %47, %c2_34, %c0_35] : memref<1x18x18x4xbf16, #tpu.memory_space<vmem>>, vector<1x16x16x4xbf16>
    %49 = vector.shape_cast %48 : vector<1x16x16x4xbf16> to vector<16x16x4xbf16>
    %50 = vector.shape_cast %49 : vector<16x16x4xbf16> to vector<256x4xbf16>
    %c5 = arith.constant 5 : index
    %c0_36 = arith.constant 0 : index
    %c0_37 = arith.constant 0 : index
    %51 = vector.load %arg3[%c5, %c0_36, %c0_37] : memref<9x4x8xbf16, #tpu.memory_space<vmem>>, vector<1x4x8xbf16>
    %52 = vector.shape_cast %51 : vector<1x4x8xbf16> to vector<4x8xbf16>
    %cst_38 = arith.constant dense<0.000000e+00> : vector<256x8xf32>
    %53 = tpu.matmul %50, %52, %cst_38 {dimension_numbers = #tpu.dot_dimension_numbers<[1], [0], [0], [1], [0, 0, 1, 1], [], []>} : vector<256x4xbf16>, vector<4x8xbf16>, vector<256x8xf32> -> vector<256x8xf32>
    %54 = arith.addf %45, %53 : vector<256x8xf32>
    %c2_i32 = arith.constant 2 : i32
    %55 = arith.addi %1, %c2_i32 : i32
    %c0_39 = arith.constant 0 : index
    %56 = arith.index_cast %55 : i32 to index
    %c0_40 = arith.constant 0 : index
    %c0_41 = arith.constant 0 : index
    %57 = vector.load %arg2[%c0_39, %56, %c0_40, %c0_41] : memref<1x18x18x4xbf16, #tpu.memory_space<vmem>>, vector<1x16x16x4xbf16>
    %58 = vector.shape_cast %57 : vector<1x16x16x4xbf16> to vector<16x16x4xbf16>
    %59 = vector.shape_cast %58 : vector<16x16x4xbf16> to vector<256x4xbf16>
    %c6 = arith.constant 6 : index
    %c0_42 = arith.constant 0 : index
    %c0_43 = arith.constant 0 : index
    %60 = vector.load %arg3[%c6, %c0_42, %c0_43] : memref<9x4x8xbf16, #tpu.memory_space<vmem>>, vector<1x4x8xbf16>
    %61 = vector.shape_cast %60 : vector<1x4x8xbf16> to vector<4x8xbf16>
    %cst_44 = arith.constant dense<0.000000e+00> : vector<256x8xf32>
    %62 = tpu.matmul %59, %61, %cst_44 {dimension_numbers = #tpu.dot_dimension_numbers<[1], [0], [0], [1], [0, 0, 1, 1], [], []>} : vector<256x4xbf16>, vector<4x8xbf16>, vector<256x8xf32> -> vector<256x8xf32>
    %63 = arith.addf %54, %62 : vector<256x8xf32>
    %c2_i32_45 = arith.constant 2 : i32
    %64 = arith.addi %1, %c2_i32_45 : i32
    %c0_46 = arith.constant 0 : index
    %65 = arith.index_cast %64 : i32 to index
    %c1_47 = arith.constant 1 : index
    %c0_48 = arith.constant 0 : index
    %66 = vector.load %arg2[%c0_46, %65, %c1_47, %c0_48] : memref<1x18x18x4xbf16, #tpu.memory_space<vmem>>, vector<1x16x16x4xbf16>
    %67 = vector.shape_cast %66 : vector<1x16x16x4xbf16> to vector<16x16x4xbf16>
    %68 = vector.shape_cast %67 : vector<16x16x4xbf16> to vector<256x4xbf16>
    %c7 = arith.constant 7 : index
    %c0_49 = arith.constant 0 : index
    %c0_50 = arith.constant 0 : index
    %69 = vector.load %arg3[%c7, %c0_49, %c0_50] : memref<9x4x8xbf16, #tpu.memory_space<vmem>>, vector<1x4x8xbf16>
    %70 = vector.shape_cast %69 : vector<1x4x8xbf16> to vector<4x8xbf16>
    %cst_51 = arith.constant dense<0.000000e+00> : vector<256x8xf32>
    %71 = tpu.matmul %68, %70, %cst_51 {dimension_numbers = #tpu.dot_dimension_numbers<[1], [0], [0], [1], [0, 0, 1, 1], [], []>} : vector<256x4xbf16>, vector<4x8xbf16>, vector<256x8xf32> -> vector<256x8xf32>
    %72 = arith.addf %63, %71 : vector<256x8xf32>
    %c2_i32_52 = arith.constant 2 : i32
    %73 = arith.addi %1, %c2_i32_52 : i32
    %c0_53 = arith.constant 0 : index
    %74 = arith.index_cast %73 : i32 to index
    %c2_54 = arith.constant 2 : index
    %c0_55 = arith.constant 0 : index
    %75 = vector.load %arg2[%c0_53, %74, %c2_54, %c0_55] : memref<1x18x18x4xbf16, #tpu.memory_space<vmem>>, vector<1x16x16x4xbf16>
    %76 = vector.shape_cast %75 : vector<1x16x16x4xbf16> to vector<16x16x4xbf16>
    %77 = vector.shape_cast %76 : vector<16x16x4xbf16> to vector<256x4xbf16>
    %c8 = arith.constant 8 : index
    %c0_56 = arith.constant 0 : index
    %c0_57 = arith.constant 0 : index
    %78 = vector.load %arg3[%c8, %c0_56, %c0_57] : memref<9x4x8xbf16, #tpu.memory_space<vmem>>, vector<1x4x8xbf16>
    %79 = vector.shape_cast %78 : vector<1x4x8xbf16> to vector<4x8xbf16>
    %cst_58 = arith.constant dense<0.000000e+00> : vector<256x8xf32>
    %80 = tpu.matmul %77, %79, %cst_58 {dimension_numbers = #tpu.dot_dimension_numbers<[1], [0], [0], [1], [0, 0, 1, 1], [], []>} : vector<256x4xbf16>, vector<4x8xbf16>, vector<256x8xf32> -> vector<256x8xf32>
    %81 = arith.addf %72, %80 : vector<256x8xf32>
    %82 = arith.truncf %81 : vector<256x8xf32> to vector<256x8xbf16>
    %c0_59 = arith.constant 0 : index
    %c0_60 = arith.constant 0 : index
    %83 = vector.load %arg4[%c0_59, %c0_60] : memref<256x8xbf16, #tpu.memory_space<vmem>>, vector<256x8xbf16>
    tpu.vector_store %arg4[%c0_59, %c0_60], %82 {strides = array<i32>} : memref<256x8xbf16, #tpu.memory_space<vmem>>, vector<256x8xbf16>,
    %cst_61 = arith.constant dense<0.000000e+00> : vector<8xf32>
    %84 = vector.multi_reduction <add>, %81, %cst_61 [0] : vector<256x8xf32> to vector<8xf32>
    %85 = vector.shape_cast %84 : vector<8xf32> to vector<1x8xf32>
    %cst_62 = arith.constant 3.906250e-03 : f32
    %86 = vector.broadcast %cst_62 : f32 to vector<1x8xf32>
    %87 = arith.mulf %85, %86 : vector<1x8xf32>
    %88 = vector.broadcast %87 : vector<1x8xf32> to vector<256x8xf32>
    %89 = arith.subf %81, %88 : vector<256x8xf32>
    %90 = arith.mulf %89, %89 : vector<256x8xf32>
    %cst_63 = arith.constant dense<0.000000e+00> : vector<8xf32>
    %91 = vector.multi_reduction <add>, %90, %cst_63 [0] : vector<256x8xf32> to vector<8xf32>
    %92 = vector.shape_cast %91 : vector<8xf32> to vector<1x8xf32>
    %c0_64 = arith.constant 0 : index
    %c0_65 = arith.constant 0 : index
    %c0_66 = arith.constant 0 : index
    %93 = vector.load %arg5[%c0_64, %c0_65, %c0_66] : memref<1x2x8xf32, #tpu.memory_space<vmem>>, vector<1x1x8xf32>
    %94 = vector.shape_cast %93 : vector<1x1x8xf32> to vector<1x8xf32>
    %95 = vector.shape_cast %87 : vector<1x8xf32> to vector<1x1x8xf32>
    tpu.vector_store %arg5[%c0_64, %c0_65, %c0_66], %95 {strides = array<i32>} : memref<1x2x8xf32, #tpu.memory_space<vmem>>, vector<1x1x8xf32>,
    %c0_67 = arith.constant 0 : index
    %c1_68 = arith.constant 1 : index
    %c0_69 = arith.constant 0 : index
    %96 = vector.load %arg5[%c0_67, %c1_68, %c0_69] : memref<1x2x8xf32, #tpu.memory_space<vmem>>, vector<1x1x8xf32>
    %97 = vector.shape_cast %96 : vector<1x1x8xf32> to vector<1x8xf32>
    %98 = vector.shape_cast %92 : vector<1x8xf32> to vector<1x1x8xf32>
    tpu.vector_store %arg5[%c0_67, %c1_68, %c0_69], %98 {strides = array<i32>} : memref<1x2x8xf32, #tpu.memory_space<vmem>>, vector<1x1x8xf32>,
    return
  }
  func.func @transform_0(%arg0: i32, %arg1: i32) -> (i32, i32, i32, i32) {
    %c0_i32 = arith.constant 0 : i32
    %c0_i32_0 = arith.constant 0 : i32
    %c0_i32_1 = arith.constant 0 : i32
    %c0_i32_2 = arith.constant 0 : i32
    return %arg0, %c0_i32, %c0_i32_0, %c0_i32_1 : i32, i32, i32, i32
  }
  func.func @transform_1(%arg0: i32, %arg1: i32) -> (i32, i32, i32) {
    %c0_i32 = arith.constant 0 : i32
    %c0_i32_0 = arith.constant 0 : i32
    %c0_i32_1 = arith.constant 0 : i32
    %c0_i32_2 = arith.constant 0 : i32
    return %c0_i32, %c0_i32_0, %c0_i32_1 : i32, i32, i32
  }
  func.func @transform_2(%arg0: i32, %arg1: i32) -> (i32, i32) {
    %c1_i32 = arith.constant 1 : i32
    %0 = arith.muli %arg0, %c1_i32 : i32
    %1 = arith.addi %0, %arg1 : i32
    %c0_i32 = arith.constant 0 : i32
    %c0_i32_0 = arith.constant 0 : i32
    return %1, %c0_i32 : i32, i32
  }
  func.func @transform_3(%arg0: i32, %arg1: i32) -> (i32, i32, i32) {
    %c1_i32 = arith.constant 1 : i32
    %0 = arith.muli %arg0, %c1_i32 : i32
    %1 = arith.addi %0, %arg1 : i32
    %c0_i32 = arith.constant 0 : i32
    %c0_i32_0 = arith.constant 0 : i32
    %c0_i32_1 = arith.constant 0 : i32
    return %1, %c0_i32, %c0_i32_0 : i32, i32, i32
  }
}

module attributes {stable_mosaic.version = 11 : i64} {
  func.func @bn_apply_nchw_kernel(%arg0: i32, %arg1: i32, %arg2: memref<256x8xbf16, #tpu.memory_space<vmem>>, %arg3: memref<1x8xf32, #tpu.memory_space<vmem>>, %arg4: memref<1x8xf32, #tpu.memory_space<vmem>>, %arg5: memref<1x8x256xf32, #tpu.memory_space<vmem>>) attributes {dimension_semantics = [#tpu.dimension_semantics<parallel>, #tpu.dimension_semantics<parallel>], iteration_bounds = array<i64: 2, 1>, scalar_prefetch = 0 : i64, scratch_operands = 0 : i64, tpu.core_type = #tpu.core_type<tc>, window_params = [{transform_indices = @transform_0, window_bounds = array<i64: 256, 8>}, {pipeline_mode = #tpu.pipeline_mode<synchronous>, transform_indices = @transform_1, window_bounds = array<i64: 1, 8>}, {pipeline_mode = #tpu.pipeline_mode<synchronous>, transform_indices = @transform_2, window_bounds = array<i64: 1, 8>}, {transform_indices = @transform_3, window_bounds = array<i64: 1, 8, 256>}]} {
    %c0 = arith.constant 0 : index
    %c0_0 = arith.constant 0 : index
    %0 = vector.load %arg2[%c0, %c0_0] : memref<256x8xbf16, #tpu.memory_space<vmem>>, vector<256x8xbf16>
    %1 = arith.extf %0 : vector<256x8xbf16> to vector<256x8xf32>
    %c0_1 = arith.constant 0 : index
    %c0_2 = arith.constant 0 : index
    %2 = vector.load %arg3[%c0_1, %c0_2] : memref<1x8xf32, #tpu.memory_space<vmem>>, vector<1x8xf32>
    %3 = vector.broadcast %2 : vector<1x8xf32> to vector<256x8xf32>
    %4 = arith.mulf %1, %3 : vector<256x8xf32>
    %c0_3 = arith.constant 0 : index
    %c0_4 = arith.constant 0 : index
    %5 = vector.load %arg4[%c0_3, %c0_4] : memref<1x8xf32, #tpu.memory_space<vmem>>, vector<1x8xf32>
    %6 = vector.broadcast %5 : vector<1x8xf32> to vector<256x8xf32>
    %7 = arith.addf %4, %6 : vector<256x8xf32>
    %8 = tpu.transpose %7, [1, 0] : vector<256x8xf32> -> vector<8x256xf32>
    %c0_5 = arith.constant 0 : index
    %c0_6 = arith.constant 0 : index
    %c0_7 = arith.constant 0 : index
    %9 = vector.load %arg5[%c0_5, %c0_6, %c0_7] : memref<1x8x256xf32, #tpu.memory_space<vmem>>, vector<1x8x256xf32>
    %10 = vector.shape_cast %9 : vector<1x8x256xf32> to vector<8x256xf32>
    %11 = vector.shape_cast %8 : vector<8x256xf32> to vector<1x8x256xf32>
    tpu.vector_store %arg5[%c0_5, %c0_6, %c0_7], %11 {strides = array<i32>} : memref<1x8x256xf32, #tpu.memory_space<vmem>>, vector<1x8x256xf32>,
    return
  }
  func.func @transform_0(%arg0: i32, %arg1: i32) -> (i32, i32) {
    %c1_i32 = arith.constant 1 : i32
    %0 = arith.muli %arg0, %c1_i32 : i32
    %1 = arith.addi %0, %arg1 : i32
    %c0_i32 = arith.constant 0 : i32
    %c0_i32_0 = arith.constant 0 : i32
    return %1, %c0_i32 : i32, i32
  }
  func.func @transform_1(%arg0: i32, %arg1: i32) -> (i32, i32) {
    %c0_i32 = arith.constant 0 : i32
    %c0_i32_0 = arith.constant 0 : i32
    %c0_i32_1 = arith.constant 0 : i32
    return %c0_i32, %c0_i32_0 : i32, i32
  }
  func.func @transform_2(%arg0: i32, %arg1: i32) -> (i32, i32) {
    %c0_i32 = arith.constant 0 : i32
    %c0_i32_0 = arith.constant 0 : i32
    %c0_i32_1 = arith.constant 0 : i32
    return %c0_i32, %c0_i32_0 : i32, i32
  }
  func.func @transform_3(%arg0: i32, %arg1: i32) -> (i32, i32, i32) {
    %c0_i32 = arith.constant 0 : i32
    %c0_i32_0 = arith.constant 0 : i32
    return %arg0, %c0_i32, %arg1 : i32, i32, i32
  }
}

</mosaic_0001>

<bundles_post_ra>
// kernel: conv2d_batchnorm.3
= control target key start
LH: loop header
LB: loop body
LE: loop exit
PB: predicated region body
PF: predicated region fallthrough
CT: control target
= control target key end

     0   :  { %s647_s12 = smov 0   ;;  %s649_s13 = smov 0   ;;  %s777_s0 = inlined_call_operand.vmem [shape: bf16[512,8], index: 0, kind: input, shape index: {}]   ;;  %s778_s1 = inlined_call_operand.vmem [shape: f32[1,8], index: 1, kind: input, shape index: {}]   ;;  %s779_s2 = inlined_call_operand.vmem [shape: f32[1,8], index: 2, kind: input, shape index: {}]   ;;  %s780_s3 = inlined_call_operand.vmem [shape: f32[2,8,256], index: 3, kind: output, shape index: {}]  }
   0x1   :  { %s651_s14 = smov 0  }
   0x2 LB: > { %s25_s15 = sadd.s32 1, %s621_s13  ;;  %p490_p0 = scmp.ge.s32.totalorder %s625_s14, 1  ;;  %s625_s14 = sphi %s651_s14, %s13_s14   ;;  %s621_s13 = sphi %s649_s13, %s782_s13   ;;  %s617_s12 = sphi %s647_s12, %s781_s12  }
   0x3   : > { %p27_p1 = scmp.ge.s32.totalorder %s25_s15, 2  ;;  %p156_p2 = scmp.lt.s32.totalorder %s625_s14, 3 }
   0x5   : > { %s784_s15 = smov (%p27_p1, %s25_s15), 0  ;;  %p157_p3 = pnand %p490_p0, %p156_p2 }
   0x6   : > { %s491_s16 = sshll.u32 (!%p157_p3), %s617_s12, 5  ;;  %p194_p5 = scmp.lt.s32.totalorder (!%p157_p3), %s617_s12, 1 }
   0x7   : > { %160 = sbr.rel (%p157_p3) target bundleno = 189 (0xbd), region = 32  ;;  %p187_p4 = scmp.lt.s32.totalorder (!%p157_p3), %s491_s16, 63 }
   0xc   : > { %s786_s16 = smov (!%p187_p4, %s491_s16), 63  ;;  %v676_v0 = vld [vmem:[%s778_s1] ss:$0 sm:$0xff]  ;;  %s788_s12 = smov (!%p194_p5, %s617_s12), 1 }
   0xd   : > { %s492_s17 = sshll.u32 %s786_s16, 2  ;;  %v683_v4 = vld [vmem:[%s779_s2] ss:$0 sm:$0xff]  ;;  %s497_s25 = sshll.u32 %s788_s12, 4 }
   0xe   : > { %s671_s20 = scalar_lea.vmem %s777_s0, %s492_s17  ;;  %s201_s28 = scalar_lea.vmem %s780_s3, %s497_s25 }
   0xf   : > { %v569_v1 = vld [vmem:[%s671_s20 + $0x40] sm:$0xff]   ;;  %v570_v14 = vld [vmem:[%s671_s20 + $0x48] sm:$0xff]   ;;  %v571_v28 = vld [vmem:[%s671_s20 + $0x50] sm:$0xff]  }
  0x10   : > { %v499_v2 = vld [vmem:[%s671_s20] sm:$0xff]   ;;  %v532_v3 = vunpack.c.l.bf16 %v569_v1  ;;  %v533_v8 = vunpack.c.h.bf16 %v569_v1  ;;  %v562_v15 = vld [vmem:[%s671_s20 + $0x8] sm:$0xff]   ;;  %v536_v18 = vunpack.c.l.bf16 %v570_v14  ;;  %v537_v24 = vunpack.c.h.bf16 %v570_v14  ;;  %v563_v29 = vld [vmem:[%s671_s20 + $0x10] sm:$0xff]  }
  0x11   : > { %v500_v5 = vunpack.c.l.bf16 %v499_v2  ;;  %v501_v9 = vunpack.c.h.bf16 %v499_v2  ;;  %v504_v19 = vunpack.c.l.bf16 %v562_v15  ;;  %v505_v25 = vunpack.c.h.bf16 %v562_v15  ;;  %v572_v42 = vld [vmem:[%s671_s20 + $0x58] sm:$0xff]   ;;  %v573_v56 = vld [vmem:[%s671_s20 + $0x60] sm:$0xff]  }
  0x12   : > { %v287_v6 = vmul.f32 %v676_v0, %v532_v3  ;;  %v288_v12 = vmul.f32 %v676_v0, %v533_v8  ;;  %v289_v20 = vmul.f32 %v676_v0, %v536_v18  ;;  %v290_v26 = vmul.f32 %v676_v0, %v537_v24  ;;  %v564_v43 = vld [vmem:[%s671_s20 + $0x18] sm:$0xff]   ;;  %v565_v57 = vld [vmem:[%s671_s20 + $0x20] sm:$0xff]   ;;  %v574_v8 = vld [vmem:[%s671_s20 + $0x68] sm:$0xff]  }
  0x13   : > { %v271_v7 = vmul.f32 %v676_v0, %v500_v5  ;;  %v272_v13 = vmul.f32 %v676_v0, %v501_v9  ;;  %v273_v21 = vmul.f32 %v676_v0, %v504_v19  ;;  %v274_v27 = vmul.f32 %v676_v0, %v505_v25  ;;  %v566_v9 = vld [vmem:[%s671_s20 + $0x28] sm:$0xff]  }
  0x14   : > { %v323_v10 = vadd.f32 %v683_v4, %v287_v6  ;;  %v324_v16 = vadd.f32 %v683_v4, %v288_v12  ;;  %v325_v22 = vadd.f32 %v683_v4, %v289_v20  ;;  %v326_v30 = vadd.f32 %v683_v4, %v290_v26 }
  0x15   : > { %v307_v11 = vadd.f32 %v683_v4, %v271_v7  ;;  %v308_v17 = vadd.f32 %v683_v4, %v272_v13  ;;  %v309_v23 = vadd.f32 %v683_v4, %v273_v21  ;;  %v310_v31 = vadd.f32 %v683_v4, %v274_v27 }
  0x16   : > { %371 = vxpose.xlu1.b32.start [1/16] (narrow) %v323_v10, 8  ;;  %v540_v32 = vunpack.c.l.bf16 %v571_v28  ;;  %v508_v33 = vunpack.c.l.bf16 %v563_v29  ;;  %v541_v38 = vunpack.c.h.bf16 %v571_v28  ;;  %v509_v39 = vunpack.c.h.bf16 %v563_v29 }
  0x17   : > { %339 = vxpose.xlu0.b32.start [1/16] (narrow) %v307_v11, 8  ;;  %v544_v46 = vunpack.c.l.bf16 %v572_v42  ;;  %v512_v47 = vunpack.c.l.bf16 %v564_v43  ;;  %v545_v52 = vunpack.c.h.bf16 %v572_v42  ;;  %v513_v53 = vunpack.c.h.bf16 %v564_v43 }
  0x18   : > { %v291_v34 = vmul.f32 %v676_v0, %v540_v32  ;;  %v275_v35 = vmul.f32 %v676_v0, %v508_v33  ;;  %v292_v40 = vmul.f32 %v676_v0, %v541_v38  ;;  %v276_v41 = vmul.f32 %v676_v0, %v509_v39 }
  0x19   : > { %v293_v48 = vmul.f32 %v676_v0, %v544_v46  ;;  %v277_v49 = vmul.f32 %v676_v0, %v512_v47  ;;  %v294_v54 = vmul.f32 %v676_v0, %v545_v52  ;;  %v278_v55 = vmul.f32 %v676_v0, %v513_v53 }
  0x1a   : > { %v327_v36 = vadd.f32 %v683_v4, %v291_v34  ;;  %v311_v37 = vadd.f32 %v683_v4, %v275_v35  ;;  %v328_v44 = vadd.f32 %v683_v4, %v292_v40  ;;  %v312_v45 = vadd.f32 %v683_v4, %v276_v41 }
  0x1b   : > { %v329_v50 = vadd.f32 %v683_v4, %v293_v48  ;;  %v313_v51 = vadd.f32 %v683_v4, %v277_v49  ;;  %v330_v58 = vadd.f32 %v683_v4, %v294_v54  ;;  %v314_v59 = vadd.f32 %v683_v4, %v278_v55 }
  0x1c   : > { %v548_v60 = vunpack.c.l.bf16 %v573_v56  ;;  %v516_v61 = vunpack.c.l.bf16 %v565_v57  ;;  %v549_v3 = vunpack.c.h.bf16 %v573_v56  ;;  %v517_v5 = vunpack.c.h.bf16 %v565_v57 }
  0x1d   : > { %v552_v12 = vunpack.c.l.bf16 %v574_v8  ;;  %v520_v13 = vunpack.c.l.bf16 %v566_v9  ;;  %v553_v18 = vunpack.c.h.bf16 %v574_v8  ;;  %v521_v19 = vunpack.c.h.bf16 %v566_v9 }
  0x1e   : > { %372 = vxpose.xlu1.b32.cont [2/16] (narrow) %v324_v16, 8  ;;  %v295_v62 = vmul.f32 %v676_v0, %v548_v60  ;;  %v279_v63 = vmul.f32 %v676_v0, %v516_v61  ;;  %v296_v6 = vmul.f32 %v676_v0, %v549_v3  ;;  %v280_v7 = vmul.f32 %v676_v0, %v517_v5 }
  0x1f   : > { %340 = vxpose.xlu0.b32.cont [2/16] (narrow) %v308_v17, 8  ;;  %v297_v14 = vmul.f32 %v676_v0, %v552_v12  ;;  %v281_v15 = vmul.f32 %v676_v0, %v520_v13  ;;  %v298_v20 = vmul.f32 %v676_v0, %v553_v18  ;;  %v282_v21 = vmul.f32 %v676_v0, %v521_v19 }
  0x20   : > { %v331_v1 = vadd.f32 %v683_v4, %v295_v62  ;;  %v315_v2 = vadd.f32 %v683_v4, %v279_v63  ;;  %v332_v10 = vadd.f32 %v683_v4, %v296_v6  ;;  %v316_v11 = vadd.f32 %v683_v4, %v280_v7 }
  0x21   : > { %v333_v16 = vadd.f32 %v683_v4, %v297_v14  ;;  %v317_v17 = vadd.f32 %v683_v4, %v281_v15  ;;  %v334_v24 = vadd.f32 %v683_v4, %v298_v20  ;;  %v318_v25 = vadd.f32 %v683_v4, %v282_v21 }
  0x26   : > { %373 = vxpose.xlu1.b32.cont [3/16] (narrow) %v325_v22, 8  ;;  %v575_v22 = vld [vmem:[%s671_s20 + $0x70] sm:$0xff]  }
  0x27   : > { %341 = vxpose.xlu0.b32.cont [3/16] (narrow) %v309_v23, 8  ;;  %v567_v23 = vld [vmem:[%s671_s20 + $0x30] sm:$0xff]   ;;  %v556_v26 = vunpack.c.l.bf16 %v575_v22  ;;  %v557_v32 = vunpack.c.h.bf16 %v575_v22 }
  0x28   : > { %v524_v27 = vunpack.c.l.bf16 %v567_v23  ;;  %v525_v33 = vunpack.c.h.bf16 %v567_v23 }
  0x29   : > { %v299_v28 = vmul.f32 %v676_v0, %v556_v26  ;;  %v300_v34 = vmul.f32 %v676_v0, %v557_v32 }
  0x2a   : > { %v283_v29 = vmul.f32 %v676_v0, %v524_v27  ;;  %v284_v35 = vmul.f32 %v676_v0, %v525_v33 }
  0x2b   : > { %v336_v38 = vadd.f32 %v683_v4, %v300_v34 }
  0x2c   : > { %v320_v39 = vadd.f32 %v683_v4, %v284_v35 }
  0x2e   : > { %374 = vxpose.xlu1.b32.cont [4/16] (narrow) %v326_v30, 8  ;;  %v335_v30 = vadd.f32 %v683_v4, %v299_v28 }
  0x2f   : > { %342 = vxpose.xlu0.b32.cont [4/16] (narrow) %v310_v31, 8  ;;  %v319_v31 = vadd.f32 %v683_v4, %v283_v29 }
  0x36   : > { %375 = vxpose.xlu1.b32.cont [5/16] (narrow) %v327_v36, 8  ;;  %v576_v36 = vld [vmem:[%s671_s20 + $0x78] sm:$0xff]  }
  0x37   : > { %343 = vxpose.xlu0.b32.cont [5/16] (narrow) %v311_v37, 8  ;;  %v568_v37 = vld [vmem:[%s671_s20 + $0x38] sm:$0xff]   ;;  %v560_v40 = vunpack.c.l.bf16 %v576_v36  ;;  %v561_v46 = vunpack.c.h.bf16 %v576_v36 }
  0x38   : > { %v528_v41 = vunpack.c.l.bf16 %v568_v37  ;;  %v529_v47 = vunpack.c.h.bf16 %v568_v37 }
  0x39   : > { %v301_v42 = vmul.f32 %v676_v0, %v560_v40  ;;  %v302_v48 = vmul.f32 %v676_v0, %v561_v46 }
  0x3a   : > { %v285_v43 = vmul.f32 %v676_v0, %v528_v41  ;;  %v286_v49 = vmul.f32 %v676_v0, %v529_v47 }
  0x3e   : > { %376 = vxpose.xlu1.b32.cont [6/16] (narrow) %v328_v44, 8  ;;  %v337_v44 = vadd.f32 %v683_v4, %v301_v42 }
  0x3f   : > { %344 = vxpose.xlu0.b32.cont [6/16] (narrow) %v312_v45, 8  ;;  %v321_v45 = vadd.f32 %v683_v4, %v285_v43 }
  0x46   : > { %377 = vxpose.xlu1.b32.cont [7/16] (narrow) %v329_v50, 8  ;;  %v338_v50 = vadd.f32 %v683_v4, %v302_v48 }
  0x47   : > { %345 = vxpose.xlu0.b32.cont [7/16] (narrow) %v313_v51, 8  ;;  %v322_v51 = vadd.f32 %v683_v4, %v286_v49 }
  0x4e   : > { %378 = vxpose.xlu1.b32.cont [8/16] (narrow) %v330_v58, 8 }
  0x4f   : > { %346 = vxpose.xlu0.b32.cont [8/16] (narrow) %v314_v59, 8 }
  0x56   : > { %379 = vxpose.xlu1.b32.cont [9/16] (narrow) %v331_v1, 8 }
  0x57   : > { %347 = vxpose.xlu0.b32.cont [9/16] (narrow) %v315_v2, 8 }
  0x5e   : > { %380 = vxpose.xlu1.b32.cont [10/16] (narrow) %v332_v10, 8 }
  0x5f   : > { %348 = vxpose.xlu0.b32.cont [10/16] (narrow) %v316_v11, 8 }
  0x66   : > { %381 = vxpose.xlu1.b32.cont [11/16] (narrow) %v333_v16, 8 }
  0x67   : > { %349 = vxpose.xlu0.b32.cont [11/16] (narrow) %v317_v17, 8 }
  0x6e   : > { %382 = vxpose.xlu1.b32.cont [12/16] (narrow) %v334_v24, 8 }
  0x6f   : > { %350 = vxpose.xlu0.b32.cont [12/16] (narrow) %v318_v25, 8 }
  0x76   : > { %383 = vxpose.xlu1.b32.cont [13/16] (narrow) %v335_v30, 8 }
  0x77   : > { %351 = vxpose.xlu0.b32.cont [13/16] (narrow) %v319_v31, 8 }
  0x7e   : > { %384 = vxpose.xlu1.b32.cont [14/16] (narrow) %v336_v38, 8 }
  0x7f   : > { %352 = vxpose.xlu0.b32.cont [14/16] (narrow) %v320_v39, 8 }
  0x86   : > { %385 = vxpose.xlu1.b32.cont [15/16] (narrow) %v337_v44, 8 }
  0x87   : > { %353 = vxpose.xlu0.b32.cont [15/16] (narrow) %v321_v45, 8 }
  0x8e   : > { %386 = vxpose.xlu1.b32.end [16/16] (narrow) %v338_v50, 8 }
  0x8f   : > { %354 = vxpose.xlu0.b32.end [16/16] (narrow) %v322_v51, 8 }
  0xba   : > { %v387_v52 = vpop.trf.xlu1 }
  0xbb   : > { %v355_v53 = vpop.trf.xlu0  ;;  %404 = vst [vmem:[%s201_s28 + $0x8] sm:$0xff] %v387_v52 }
  0xbc   : > { %403 = vst [vmem:[%s201_s28] sm:$0xff] %v355_v53 }
  0xbd PF: > { %s13_s14 = sadd.s32 1, %s625_s14   ;;  %s781_s12 = smov %s621_s13 }
  0xbe   : > { %p10_p6 = scmp.ge.s32.totalorder %s13_s14, 4   ;;  %s782_s13 = smov %s784_s15 }
  0xc0   :  { %12 = sbr.rel (!%p10_p6) target bundleno = 2 (0x2), region = 62 }

// kernel: conv2d_batchnorm.2
= control target key start
LH: loop header
LB: loop body
LE: loop exit
PB: predicated region body
PF: predicated region fallthrough
CT: control target
= control target key end

     0   :  { %s5276_s12 = smov 0   ;;  %s5278_s13 = smov 0   ;;  %s6997_s0 = inlined_call_operand.vmem [shape: bf16[2,18,18,4], index: 0, kind: input, shape index: {}]   ;;  %s6998_s1 = inlined_call_operand.vmem [shape: bf16[9,4,8], index: 1, kind: input, shape index: {}]   ;;  %s6999_s2 = inlined_call_operand.vmem [shape: bf16[512,8], index: 2, kind: output, shape index: {0}]   ;;  %s7000_s3 = inlined_call_operand.vmem [shape: f32[2,2,8], index: 3, kind: output, shape index: {1}]  }
   0x1   :  { %s5280_s14 = smov 0  }
   0x2 LB: > { %s26_s15 = sadd.s32 1, %s5250_s13  ;;  %p4515_p0 = scmp.ge.s32.totalorder %s5254_s14, 1  ;;  %s5254_s14 = sphi %s5280_s14, %s14_s14   ;;  %s5250_s13 = sphi %s5278_s13, %s7013_s13   ;;  %s5246_s12 = sphi %s5276_s12, %s7012_s12  }
   0x3   : > { %p28_p1 = scmp.ge.s32.totalorder %s26_s15, 2  ;;  %p156_p2 = scmp.lt.s32.totalorder %s5254_s14, 3 }
   0x5   : > { %s7015_s15 = smov (%p28_p1, %s26_s15), 0  ;;  %p157_p3 = pnand %p4515_p0, %p156_p2 }
   0x7   : > { %160 = sbr.rel (%p157_p3) target bundleno = 853 (0x355), region = 28 }
   0xc   : > { %v4520_v0 = vld [vmem:[%s6998_s1 + $0x2] sm:$0x3]  ;;  %vm745_vm0 = vcmask 1041408   ;;  %p186_p4 = scmp.lt.s32.totalorder %s5246_s12, 1  ;;  %v4633_v2 = vld [vmem:[%s6998_s1 + $0x4] sm:$0x3] }
   0xd   : > { %v747_v1 = vsel %vm745_vm0, %v4520_v0, 0  ;;  %v1320_v3 = vsel %vm745_vm0, %v4633_v2, 0  ;;  %v4682_v4 = vld [vmem:[%s6998_s1 + $0x6] sm:$0x3]  ;;  %v242_v5 = vld [vmem:[%s6998_s1] sm:$0x3] }
   0xe   : > { %5154 = vmatpush.bf16.msra.mxu1 %v747_v1  ;;  %5155 = vmatpush.bf16.msra.mxu2 %v747_v1  ;;  %s5305_s20 = scalar_select %p186_p4, %s5246_s12, 1  ;;  %v4811_v6 = vld [vmem:[%s6998_s1 + $0x8] sm:$0x3]  ;;  %v1610_v7 = vsel %vm745_vm0, %v4682_v4, 0  ;;  %v967_v8 = vsel %vm745_vm0, %v242_v5, 0  ;;  %vm696_vm4 = vcmask 31744  }
   0xf   : > { %5156 = vmatpush.bf16.msra.mxu3 %v747_v1  ;;  %756 = vmatpush.bf16.msra.mxu0 %v747_v1  ;;  %v2264_v9 = vsel %vm745_vm0, %v4811_v6, 0  ;;  %vm259_vm1 = vsmask.f32 3328  ;;  %vm260_vm2 = vsmask.f32 7440  ;;  %vm1106_vm5 = vcmask 1042432  }
  0x10   : > { %s5157_s27 = smul.u32 216, %s5305_s20  ;;  %vm5336_vm3 = vmor %vm259_vm1, %vm260_vm2  ;;  %vm1107_vm6 = vcmask 1046532   ;;  %s4517_s16 = sshll.u32 %s5246_s12, 5  ;;  %vm4159_vm8 = vcmask 60416   ;;  %vm4192_vm9 = vcmask 64512   ;;  %vm4396_vm10 = vcmask 57344  }
  0x11   : > { %vm5510_vm7 = vmor %vm1106_vm5, %vm1107_vm6  ;;  %p6346_p5 = scmp.lt.s32.totalorder %s4517_s16, 63  ;;  %s4519_s22 = sshll.u32 %s5305_s20, 1 }
  0x12   : > { %1329 = vmatpush.bf16.msrb.mxu2 %v1320_v3  ;;  %976 = vmatpush.bf16.msrb.mxu1 %v967_v8  ;;  %s5324_s30 = scalar_lea.vmem %s6997_s0, %s5157_s27  ;;  %s6863_s25 = scalar_lea.vmem %s7000_s3, %s4519_s22 }
  0x13   : > { %1619 = vmatpush.bf16.msrb.mxu3 %v1610_v7  ;;  %2273 = vmatpush.bf16.msrb.mxu0 %v2264_v9  ;;  %v218_v10 = vld [vmem:[%s5324_s30 + $0x30] sm:$0xf]  ;;  %v219_v11 = vld [vmem:[%s5324_s30 + $0x34] sm:$0xf]  ;;  %v247_v12 = vld [vmem:[%s5324_s30 + $0x38] sm:$0x1] }
  0x14   : > { %v359_v13 = vshrl.u32 %v218_v10, 16  ;;  %v362_v14 = vshll.u32 %v218_v10, 16  ;;  %v368_v15 = vshll.u32 %v219_v11, 16  ;;  %v372_v16 = vshrl.u32 %v219_v11, 16  ;;  %v226_v17 = vld [vmem:[%s5324_s30 + $0x60] sm:$0xf] }
  0x15   : > { %v378_v18 = vshll.u32 %v247_v12, 16  ;;  %v227_v19 = vld [vmem:[%s5324_s30 + $0x64] sm:$0xf]  ;;  %v251_v20 = vld [vmem:[%s5324_s30 + $0x68] sm:$0x1]  ;;  %v455_v21 = vshrl.u32 %v226_v17, 16 }
  0x16   : > { %v361_v22 = vrot.slane %v359_v13, 4  ;;  %v364_v23 = vrot.slane %v362_v14, 5  ;;  %v370_v24 = vrot.slane %v368_v15, 5  ;;  %v374_v25 = vrot.slane %v372_v16, 4  ;;  %v234_v26 = vld [vmem:[%s5324_s30 + $0x90] sm:$0xf] }
  0x17   : > { %v380_v27 = vrot.slane %v378_v18, 5  ;;  %v457_v28 = vrot.slane %v455_v21, 4  ;;  %v458_v29 = vshll.u32 %v226_v17, 16  ;;  %v464_v30 = vshll.u32 %v227_v19, 16  ;;  %v235_v35 = vld [vmem:[%s5324_s30 + $0x94] sm:$0xf] }
  0x18   : > { %v365_v31 = vor.u32 %v364_v23, %v361_v22  ;;  %v375_v32 = vor.u32 %v374_v25, %v370_v24  ;;  %v468_v33 = vshrl.u32 %v227_v19, 16  ;;  %v474_v34 = vshll.u32 %v251_v20, 16  ;;  %v255_v45 = vld [vmem:[%s5324_s30 + $0x98] sm:$0x1]  ;;  %v210_v61 = vld [vmem:[%s5324_s30] sm:$0xf] }
  0x19   : > { %v460_v37 = vrot.slane %v458_v29, 5  ;;  %v466_v38 = vrot.slane %v464_v30, 5  ;;  %v551_v39 = vshrl.u32 %v234_v26, 16  ;;  %v554_v47 = vshll.u32 %v234_v26, 16  ;;  %v5349_v1 = vld [vmem:[%s5324_s30 + $0x4] sm:$0xf] }
  0x1a   : > { %v366_v40 = vrot.slane %v365_v31, 4  ;;  %v376_v41 = vrot.slane %v375_v32, 4  ;;  %v470_v42 = vrot.slane %v468_v33, 4  ;;  %v476_v43 = vrot.slane %v474_v34, 5  ;;  %v5352_v2 = vld [vmem:[%s5324_s30 + $0x8] sm:$0x1] }
  0x1b   : > { %v461_v44 = vor.u32 %v460_v37, %v457_v28  ;;  %v553_v46 = vrot.slane %v551_v39, 4  ;;  %v560_v48 = vshll.u32 %v235_v35, 16  ;;  %v564_v52 = vshrl.u32 %v235_v35, 16  ;;  %v220_v19 = vld [vmem:[%s5324_s30 + $0x3c] sm:$0xf]  ;;  %s7017_s16 = smov (!%p6346_p5, %s4517_s16), 63 }
  0x1c   : > { %v371_v49 = vsel %vm5336_vm3, %v366_v40, %v370_v24  ;;  %v381_v50 = vsel %vm5336_vm3, %v376_v41, %v380_v27  ;;  %v471_v51 = vor.u32 %v470_v42, %v466_v38  ;;  %v556_v56 = vrot.slane %v554_v47, 5  ;;  %v5364_v20 = vld [vmem:[%s5324_s30 + $0x40] sm:$0xf]  ;;  %v5369_v25 = vld [vmem:[%s5324_s30 + $0x44] sm:$0x1]  ;;  %s4518_s17 = sshll.u32 %s7017_s16, 2 }
  0x1d   : > { %v656_v53 = vunpack.c.l.b16 %v371_v49  ;;  %v657_v54 = vunpack.c.l.b16 %v381_v50  ;;  %v462_v55 = vrot.slane %v461_v44, 4  ;;  %v562_v58 = vrot.slane %v560_v48, 5  ;;  %v228_v33 = vld [vmem:[%s5324_s30 + $0x6c] sm:$0xf]  ;;  %v252_v47 = vld [vmem:[%s5324_s30 + $0x74] sm:$0x1]  ;;  %s6389_s21 = scalar_lea.vmem %s6999_s2, %s4518_s17 }
  0x1e   : > { %v472_v57 = vrot.slane %v471_v51, 4  ;;  %v566_v59 = vrot.slane %v564_v52, 4  ;;  %v570_v60 = vshll.u32 %v255_v45, 16  ;;  %v557_v0 = vor.u32 %v556_v56, %v553_v46 }
  0x1f   : > { %v684_v62 = vpack.c.b16 %v657_v54, %v656_v53  ;;  %v467_v63 = vsel %vm5336_vm3, %v462_v55, %v466_v38  ;;  %v263_v9 = vshrl.u32 %v210_v61, 16  ;;  %v266_v10 = vshll.u32 %v210_v61, 16  ;;  %v236_v61 = vld [vmem:[%s5324_s30 + $0x9c] sm:$0xf] }
  0x20   : > { %v477_v3 = vsel %vm5336_vm3, %v472_v57, %v476_v43  ;;  %v664_v4 = vunpack.c.l.b16 %v467_v63  ;;  %v567_v5 = vor.u32 %v566_v59, %v562_v58  ;;  %v572_v6 = vrot.slane %v570_v60, 5  ;;  %v229_v43 = vld [vmem:[%s5324_s30 + $0x70] sm:$0xf] }
  0x21   : > { %4525 = vmatmul.msk.bf16.vlgmr.msra.gmra.mxu1 %vm696_vm4, %v684_v62  ;;  %v665_v7 = vunpack.c.l.b16 %v477_v3  ;;  %v558_v8 = vrot.slane %v557_v0, 4  ;;  %v272_v12 = vshll.u32 %v5349_v1, 16  ;;  %v276_v13 = vshrl.u32 %v5349_v1, 16  ;;  %v237_v3 = vld [vmem:[%s5324_s30 + $0xa0] sm:$0xf] }
  0x22   : > { %v568_v11 = vrot.slane %v567_v5, 4  ;;  %v282_v14 = vshll.u32 %v5352_v2, 16  ;;  %v265_v17 = vrot.slane %v263_v9, 4  ;;  %v268_v18 = vrot.slane %v266_v10, 5 }
  0x23   : > { %v688_v15 = vpack.c.b16 %v665_v7, %v664_v4  ;;  %v563_v16 = vsel %vm5336_vm3, %v558_v8, %v562_v58  ;;  %v274_v23 = vrot.slane %v272_v12, 5  ;;  %v278_v24 = vrot.slane %v276_v13, 4  ;;  %v256_v8 = vld [vmem:[%s5324_s30 + $0xa4] sm:$0x1] }
  0x24   : > { %v573_v21 = vsel %vm5336_vm3, %v568_v11, %v572_v6  ;;  %v672_v22 = vunpack.c.l.b16 %v563_v16  ;;  %v269_v27 = vor.u32 %v268_v18, %v265_v17  ;;  %v284_v28 = vrot.slane %v282_v14, 5 }
  0x25   : > { %4529 = vmatmul.msk.bf16.vlgmr.msra.gmra.mxu2 %vm696_vm4, %v688_v15  ;;  %v673_v26 = vunpack.c.l.b16 %v573_v21  ;;  %v279_v29 = vor.u32 %v278_v24, %v274_v23  ;;  %v383_v30 = vshrl.u32 %v220_v19, 16  ;;  %v386_v31 = vshll.u32 %v220_v19, 16 }
  0x26   : > { %v392_v32 = vshll.u32 %v5364_v20, 16  ;;  %v270_v35 = vrot.slane %v269_v27, 4  ;;  %v396_v37 = vshrl.u32 %v5364_v20, 16  ;;  %v402_v38 = vshll.u32 %v5369_v25, 16 }
  0x27   : > { %v692_v34 = vpack.c.b16 %v673_v26, %v672_v22  ;;  %v280_v39 = vrot.slane %v279_v29, 4  ;;  %v385_v40 = vrot.slane %v383_v30, 4  ;;  %v388_v41 = vrot.slane %v386_v31, 5  ;;  %v212_v22 = vld [vmem:[%s5324_s30 + $0xc] sm:$0xf] }
  0x28   : > { %v394_v42 = vrot.slane %v392_v32, 5  ;;  %v275_v44 = vsel %vm5336_vm3, %v270_v35, %v274_v23  ;;  %v398_v45 = vrot.slane %v396_v37, 4  ;;  %v404_v46 = vrot.slane %v402_v38, 5  ;;  %v5398_v32 = vld [vmem:[%s5324_s30 + $0x14] sm:$0x1] }
  0x29   : > { %4533 = vmatmul.msk.bf16.vlgmr.msra.gmra.mxu3 %vm696_vm4, %v692_v34  ;;  %v479_v48 = vshrl.u32 %v228_v33, 16  ;;  %v285_v49 = vsel %vm5336_vm3, %v280_v39, %v284_v28  ;;  %v648_v50 = vunpack.c.l.b16 %v275_v44  ;;  %v389_v51 = vor.u32 %v388_v41, %v385_v40  ;;  %v5395_v28 = vld [vmem:[%s5324_s30 + $0x10] sm:$0xf] }
  0x2a   : > { %v482_v52 = vshll.u32 %v228_v33, 16  ;;  %v649_v53 = vunpack.c.l.b16 %v285_v49  ;;  %v399_v54 = vor.u32 %v398_v45, %v394_v42  ;;  %v488_v56 = vshll.u32 %v229_v43, 16 }
  0x2b   : > { %v481_v55 = vrot.slane %v479_v48, 4  ;;  %v390_v57 = vrot.slane %v389_v51, 4  ;;  %v492_v59 = vshrl.u32 %v229_v43, 16  ;;  %v498_v60 = vshll.u32 %v252_v47, 16  ;;  %v5408_v47 = vld [vmem:[%s5324_s30 + $0x4c] sm:$0xf] }
  0x2c   : > { %v484_v58 = vrot.slane %v482_v52, 5  ;;  %v680_v62 = vpack.c.b16 %v649_v53, %v648_v50  ;;  %v400_v63 = vrot.slane %v399_v54, 4  ;;  %v490_v0 = vrot.slane %v488_v56, 5  ;;  %v5413_v56 = vld [vmem:[%s5324_s30 + $0x50] sm:$0x1] }
  0x2d   : > { %v395_v4 = vsel %vm5336_vm3, %v390_v57, %v394_v42  ;;  %v494_v6 = vrot.slane %v492_v59, 4  ;;  %v500_v7 = vrot.slane %v498_v60, 5  ;;  %v575_v11 = vshrl.u32 %v236_v61, 16  ;;  %v222_v42 = vld [vmem:[%s5324_s30 + $0x48] sm:$0xf] }
  0x2e   : > { %v485_v5 = vor.u32 %v484_v58, %v481_v55  ;;  %4521 = vmatmul.msk.bf16.vlgmr.msra.gmra.mxu0 %vm696_vm4, %v680_v62  ;;  %v405_v9 = vsel %vm5336_vm3, %v400_v63, %v404_v46  ;;  %v658_v10 = vunpack.c.l.b16 %v395_v4  ;;  %v578_v12 = vshll.u32 %v236_v61, 16 }
  0x2f   : > { %v659_v13 = vunpack.c.l.b16 %v405_v9  ;;  %v495_v15 = vor.u32 %v494_v6, %v490_v0  ;;  %v584_v16 = vshll.u32 %v237_v3, 16  ;;  %v577_v17 = vrot.slane %v575_v11, 4 }
  0x30   : > { %v486_v14 = vrot.slane %v485_v5, 4  ;;  %v580_v18 = vrot.slane %v578_v12, 5  ;;  %v588_v19 = vshrl.u32 %v237_v3, 16  ;;  %v594_v21 = vshll.u32 %v256_v8, 16  ;;  %v230_v3 = vld [vmem:[%s5324_s30 + $0x78] sm:$0xf] }
  0x31   : > { %v685_v23 = vpack.c.b16 %v659_v13, %v658_v10  ;;  %v496_v26 = vrot.slane %v495_v15, 4  ;;  %v586_v27 = vrot.slane %v584_v16, 5  ;;  %v287_v35 = vshrl.u32 %v212_v22, 16  ;;  %v231_v8 = vld [vmem:[%s5324_s30 + $0x7c] sm:$0xf] }
  0x32   : > { %v491_v24 = vsel %vm5336_vm3, %v486_v14, %v490_v0  ;;  %v581_v30 = vor.u32 %v580_v18, %v577_v17  ;;  %v590_v31 = vrot.slane %v588_v19, 4  ;;  %v596_v34 = vrot.slane %v594_v21, 5  ;;  %v253_v16 = vld [vmem:[%s5324_s30 + $0x80] sm:$0x1] }
  0x33   : > { %v666_v29 = vunpack.c.l.b16 %v491_v24  ;;  %4526 = vmatmul.msk.bf16.gmra.mxu1 %vm696_vm4, %v685_v23  ;;  %v501_v33 = vsel %vm5336_vm3, %v496_v26, %v500_v7  ;;  %v290_v37 = vshll.u32 %v212_v22, 16  ;;  %v296_v41 = vshll.u32 %v5395_v28, 16 }
  0x34   : > { %v667_v38 = vunpack.c.l.b16 %v501_v33  ;;  %v582_v39 = vrot.slane %v581_v30, 4  ;;  %v591_v40 = vor.u32 %v590_v31, %v586_v27  ;;  %v289_v43 = vrot.slane %v287_v35, 4 }
  0x35   : > { %v292_v44 = vrot.slane %v290_v37, 5  ;;  %v300_v45 = vshrl.u32 %v5395_v28, 16  ;;  %v306_v46 = vshll.u32 %v5398_v32, 16  ;;  %v298_v51 = vrot.slane %v296_v41, 5 }
  0x36   : > { %v689_v48 = vpack.c.b16 %v667_v38, %v666_v29  ;;  %v587_v49 = vsel %vm5336_vm3, %v582_v39, %v586_v27  ;;  %v592_v50 = vrot.slane %v591_v40, 4  ;;  %v407_v58 = vshrl.u32 %v222_v42, 16  ;;  %v239_v39 = vld [vmem:[%s5324_s30 + $0xac] sm:$0xf]  ;;  %v257_v40 = vld [vmem:[%s5324_s30 + $0xb0] sm:$0x1] }
  0x37   : > { %v674_v52 = vunpack.c.l.b16 %v587_v49  ;;  %v293_v53 = vor.u32 %v292_v44, %v289_v43  ;;  %v302_v54 = vrot.slane %v300_v45, 4  ;;  %v308_v55 = vrot.slane %v306_v46, 5 }
  0x38   : > { %4530 = vmatmul.msk.bf16.gmra.mxu2 %vm696_vm4, %v689_v48  ;;  %v597_v57 = vsel %vm5336_vm3, %v592_v50, %v596_v34  ;;  %v410_v59 = vshll.u32 %v222_v42, 16  ;;  %v416_v60 = vshll.u32 %v5408_v47, 16  ;;  %v420_v0 = vshrl.u32 %v5408_v47, 16  ;;  %v238_v34 = vld [vmem:[%s5324_s30 + $0xa8] sm:$0xf] }
  0x39   : > { %v675_v61 = vunpack.c.l.b16 %v597_v57  ;;  %v294_v62 = vrot.slane %v293_v53, 4  ;;  %v303_v63 = vor.u32 %v302_v54, %v298_v51  ;;  %v409_v4 = vrot.slane %v407_v58, 4 }
  0x3a   : > { %v412_v5 = vrot.slane %v410_v59, 5  ;;  %v418_v6 = vrot.slane %v416_v60, 5  ;;  %v426_v7 = vshll.u32 %v5413_v56, 16  ;;  %v422_v12 = vrot.slane %v420_v0, 4  ;;  %v214_v59 = vld [vmem:[%s5324_s30 + $0x18] sm:$0xf] }
  0x3b   : > { %v693_v9 = vpack.c.b16 %v675_v61, %v674_v52  ;;  %v299_v10 = vsel %vm5336_vm3, %v294_v62, %v298_v51  ;;  %v304_v11 = vrot.slane %v303_v63, 4  ;;  %v503_v17 = vshrl.u32 %v230_v3, 16  ;;  %v5441_v63 = vld [vmem:[%s5324_s30 + $0x1c] sm:$0xf]  ;;  %v5444_v0 = vld [vmem:[%s5324_s30 + $0x20] sm:$0x1] }
  0x3c   : > { %v650_v13 = vunpack.c.l.b16 %v299_v10  ;;  %v413_v14 = vor.u32 %v412_v5, %v409_v4  ;;  %v428_v15 = vrot.slane %v426_v7, 5  ;;  %v423_v19 = vor.u32 %v422_v12, %v418_v6 }
  0x3d   : > { %4534 = vmatmul.msk.bf16.gmra.mxu3 %vm696_vm4, %v693_v9  ;;  %v309_v18 = vsel %vm5336_vm3, %v304_v11, %v308_v55  ;;  %v506_v21 = vshll.u32 %v230_v3, 16  ;;  %v512_v22 = vshll.u32 %v231_v8, 16  ;;  %v505_v26 = vrot.slane %v503_v17, 4 }
  0x3e   : > { %v651_v23 = vunpack.c.l.b16 %v309_v18  ;;  %v414_v24 = vrot.slane %v413_v14, 4  ;;  %v516_v27 = vshrl.u32 %v231_v8, 16  ;;  %v424_v29 = vrot.slane %v423_v19, 4 }
  0x3f   : > { %v508_v30 = vrot.slane %v506_v21, 5  ;;  %v514_v31 = vrot.slane %v512_v22, 5  ;;  %v522_v33 = vshll.u32 %v253_v16, 16  ;;  %v599_v48 = vshrl.u32 %v238_v34, 16  ;;  %v5454_v21 = vld [vmem:[%s5324_s30 + $0x58] sm:$0xf] }
  0x40   : > { %v681_v35 = vpack.c.b16 %v651_v23, %v650_v13  ;;  %v419_v37 = vsel %vm5336_vm3, %v414_v24, %v418_v6  ;;  %v518_v38 = vrot.slane %v516_v27, 4  ;;  %v429_v41 = vsel %vm5336_vm3, %v424_v29, %v428_v15  ;;  %v224_v15 = vld [vmem:[%s5324_s30 + $0x54] sm:$0xf]  ;;  %v5459_v27 = vld [vmem:[%s5324_s30 + $0x5c] sm:$0x1] }
  0x41   : > { %v660_v42 = vunpack.c.l.b16 %v419_v37  ;;  %v509_v43 = vor.u32 %v508_v30, %v505_v26  ;;  %v524_v44 = vrot.slane %v522_v33, 5  ;;  %v661_v45 = vunpack.c.l.b16 %v429_v41 }
  0x42   : > { %4522 = vmatmul.msk.bf16.gmra.mxu0 %vm696_vm4, %v681_v35  ;;  %v519_v46 = vor.u32 %v518_v38, %v514_v31  ;;  %v602_v49 = vshll.u32 %v238_v34, 16  ;;  %v608_v51 = vshll.u32 %v239_v39, 16  ;;  %v612_v52 = vshrl.u32 %v239_v39, 16  ;;  %v232_v39 = vld [vmem:[%s5324_s30 + $0x84] sm:$0xf] }
  0x43   : > { %v510_v50 = vrot.slane %v509_v43, 4  ;;  %v618_v53 = vshll.u32 %v257_v40, 16  ;;  %v686_v54 = vpack.c.b16 %v661_v45, %v660_v42  ;;  %v601_v57 = vrot.slane %v599_v48, 4 }
  0x44   : > { %v520_v55 = vrot.slane %v519_v46, 4  ;;  %v604_v58 = vrot.slane %v602_v49, 5  ;;  %v610_v61 = vrot.slane %v608_v51, 5  ;;  %v614_v62 = vrot.slane %v612_v52, 4  ;;  %v233_v49 = vld [vmem:[%s5324_s30 + $0x88] sm:$0xf] }
  0x45   : > { %v515_v60 = vsel %vm5336_vm3, %v510_v50, %v514_v31  ;;  %4527 = vmatmul.msk.bf16.gmra.mxu1 %vm696_vm4, %v686_v54  ;;  %v620_v6 = vrot.slane %v618_v53, 5  ;;  %v311_v9 = vshrl.u32 %v214_v59, 16  ;;  %v314_v10 = vshll.u32 %v214_v59, 16  ;;  %v254_v53 = vld [vmem:[%s5324_s30 + $0x8c] sm:$0x1] }
  0x46   : > { %v525_v3 = vsel %vm5336_vm3, %v520_v55, %v524_v44  ;;  %v668_v4 = vunpack.c.l.b16 %v515_v60  ;;  %v605_v5 = vor.u32 %v604_v58, %v601_v57  ;;  %v615_v8 = vor.u32 %v614_v62, %v610_v61 }
  0x47   : > { %v669_v7 = vunpack.c.l.b16 %v525_v3  ;;  %v320_v12 = vshll.u32 %v5441_v63, 16  ;;  %v324_v13 = vshrl.u32 %v5441_v63, 16  ;;  %v330_v14 = vshll.u32 %v5444_v0, 16 }
  0x48   : > { %v606_v11 = vrot.slane %v605_v5, 4  ;;  %v616_v17 = vrot.slane %v615_v8, 4  ;;  %v313_v18 = vrot.slane %v311_v9, 4  ;;  %v316_v19 = vrot.slane %v314_v10, 5  ;;  %v240_v8 = vld [vmem:[%s5324_s30 + $0xb4] sm:$0xf] }
  0x49   : > { %v690_v16 = vpack.c.b16 %v669_v7, %v668_v4  ;;  %v322_v23 = vrot.slane %v320_v12, 5  ;;  %v326_v24 = vrot.slane %v324_v13, 4  ;;  %v332_v26 = vrot.slane %v330_v14, 5  ;;  %v241_v12 = vld [vmem:[%s5324_s30 + $0xb8] sm:$0xf] }
  0x4a   : > { %v611_v22 = vsel %vm5336_vm3, %v606_v11, %v610_v61  ;;  %v621_v29 = vsel %vm5336_vm3, %v616_v17, %v620_v6  ;;  %v317_v31 = vor.u32 %v316_v19, %v313_v18  ;;  %v431_v33 = vshrl.u32 %v224_v15, 16  ;;  %v258_v17 = vld [vmem:[%s5324_s30 + $0xbc] sm:$0x1] }
  0x4b   : > { %4531 = vmatmul.msk.bf16.gmra.mxu2 %vm696_vm4, %v690_v16  ;;  %v676_v30 = vunpack.c.l.b16 %v611_v22  ;;  %v677_v34 = vunpack.c.l.b16 %v621_v29  ;;  %v327_v35 = vor.u32 %v326_v24, %v322_v23  ;;  %v434_v37 = vshll.u32 %v224_v15, 16 }
  0x4c   : > { %v440_v38 = vshll.u32 %v5454_v21, 16  ;;  %v318_v40 = vrot.slane %v317_v31, 4  ;;  %v433_v41 = vrot.slane %v431_v33, 4  ;;  %v444_v42 = vshrl.u32 %v5454_v21, 16 }
  0x4d   : > { %v450_v43 = vshll.u32 %v5459_v27, 16  ;;  %v694_v44 = vpack.c.b16 %v677_v34, %v676_v30  ;;  %v328_v45 = vrot.slane %v327_v35, 4  ;;  %v436_v46 = vrot.slane %v434_v37, 5  ;;  %v216_v37 = vld [vmem:[%s5324_s30 + $0x24] sm:$0xf] }
  0x4e   : > { %v442_v48 = vrot.slane %v440_v38, 5  ;;  %v323_v50 = vsel %vm5336_vm3, %v318_v40, %v322_v23  ;;  %v446_v51 = vrot.slane %v444_v42, 4  ;;  %v527_v54 = vshrl.u32 %v232_v39, 16  ;;  %v5487_v42 = vld [vmem:[%s5324_s30 + $0x28] sm:$0xf] }
  0x4f   : > { %v452_v52 = vrot.slane %v450_v43, 5  ;;  %4535 = vmatmul.msk.bf16.gmra.mxu3 %vm696_vm4, %v694_v44  ;;  %v333_v55 = vsel %vm5336_vm3, %v328_v45, %v332_v26  ;;  %v652_v57 = vunpack.c.l.b16 %v323_v50  ;;  %v437_v58 = vor.u32 %v436_v46, %v433_v41 }
  0x50   : > { %v530_v59 = vshll.u32 %v232_v39, 16  ;;  %v653_v60 = vunpack.c.l.b16 %v333_v55  ;;  %v447_v61 = vor.u32 %v446_v51, %v442_v48  ;;  %v529_v62 = vrot.slane %v527_v54, 4 }
  0x51   : > { %v536_v3 = vshll.u32 %v233_v49, 16  ;;  %v438_v4 = vrot.slane %v437_v58, 4  ;;  %v540_v6 = vshrl.u32 %v233_v49, 16  ;;  %v546_v7 = vshll.u32 %v254_v53, 16 }
  0x52   : > { %v532_v5 = vrot.slane %v530_v59, 5  ;;  %v682_v9 = vpack.c.b16 %v653_v60, %v652_v57  ;;  %v448_v10 = vrot.slane %v447_v61, 4  ;;  %v623_v22 = vshrl.u32 %v240_v8, 16  ;;  %v1058_v61 = vld [vmem:[%s5324_s30] sm:$0xe] }
  0x53   : > { %v538_v11 = vrot.slane %v536_v3, 5  ;;  %v443_v13 = vsel %vm5336_vm3, %v438_v4, %v442_v48  ;;  %v542_v15 = vrot.slane %v540_v6, 4  ;;  %v548_v16 = vrot.slane %v546_v7, 5  ;;  %v5491_v48 = vld [vmem:[%s5324_s30 + $0x2c] sm:$0x1] }
  0x54   : > { %v533_v14 = vor.u32 %v532_v5, %v529_v62  ;;  %4523 = vmatmul.msk.bf16.gmra.mxu0 %vm696_vm4, %v682_v9  ;;  %v453_v18 = vsel %vm5336_vm3, %v448_v10, %v452_v52  ;;  %v662_v19 = vunpack.c.l.b16 %v443_v13  ;;  %v626_v23 = vshll.u32 %v240_v8, 16  ;;  %v4763_v6 = vld [vmem:[%s5324_s30 + $0xc] sm:$0xf] }
  0x55   : > { %v663_v24 = vunpack.c.l.b16 %v453_v18  ;;  %v543_v29 = vor.u32 %v542_v15, %v538_v11  ;;  %v632_v30 = vshll.u32 %v241_v12, 16  ;;  %v625_v31 = vrot.slane %v623_v22, 4 }
  0x56   : > { %v534_v26 = vrot.slane %v533_v14, 4  ;;  %v628_v33 = vrot.slane %v626_v23, 5  ;;  %v636_v34 = vshrl.u32 %v241_v12, 16  ;;  %v642_v35 = vshll.u32 %v258_v17, 16  ;;  %v4764_v12 = vld [vmem:[%s5324_s30 + $0x10] sm:$0xf] }
  0x57   : > { %v687_v38 = vpack.c.b16 %v663_v24, %v662_v19  ;;  %v544_v40 = vrot.slane %v543_v29, 4  ;;  %v634_v41 = vrot.slane %v632_v30, 5  ;;  %v1114_v43 = vrot.slane %v5352_v2, 5 }
  0x58   : > { %v539_v39 = vsel %vm5336_vm3, %v534_v26, %v538_v11  ;;  %v629_v45 = vor.u32 %v628_v33, %v625_v31  ;;  %v638_v46 = vrot.slane %v636_v34, 4  ;;  %v644_v50 = vrot.slane %v642_v35, 5  ;;  %v4909_v11 = vld [vmem:[%s6998_s1 + $0xc] sm:$0x3] }
  0x59   : > { %v670_v44 = vunpack.c.l.b16 %v539_v39  ;;  %4528 = vmatmul.msk.bf16.gmra.mxu1 %vm696_vm4, %v687_v38  ;;  %v549_v49 = vsel %vm5336_vm3, %v544_v40, %v548_v16  ;;  %v335_v51 = vshrl.u32 %v216_v37, 16  ;;  %v338_v52 = vshll.u32 %v216_v37, 16  ;;  %v4765_v38 = vld [vmem:[%s5324_s30 + $0x14] sm:$0x1] }
  0x5a   : > { %v671_v53 = vunpack.c.l.b16 %v549_v49  ;;  %v630_v54 = vrot.slane %v629_v45, 4  ;;  %v639_v55 = vor.u32 %v638_v46, %v634_v41  ;;  %v344_v2 = vshll.u32 %v5487_v42, 16  ;;  %v5038_v45 = vld [vmem:[%s6998_s1 + $0xe] sm:$0x3] }
  0x5b   : > { %v337_v57 = vrot.slane %v335_v51, 4  ;;  %v340_v58 = vrot.slane %v338_v52, 5  ;;  %v348_v59 = vshrl.u32 %v5487_v42, 16  ;;  %v354_v60 = vshll.u32 %v5491_v48, 16  ;;  %v5106_v51 = vld [vmem:[%s5324_s30] sm:$0xff] }
  0x5c   : > { %v691_v62 = vpack.c.b16 %v671_v53, %v670_v44  ;;  %v635_v3 = vsel %vm5336_vm3, %v630_v54, %v634_v41  ;;  %v640_v4 = vrot.slane %v639_v55, 4  ;;  %v346_v5 = vrot.slane %v344_v2, 5  ;;  %v5087_v2 = vld [vmem:[%s6998_s1 + $0x10] sm:$0x3] }
  0x5d   : > { %v678_v7 = vunpack.c.l.b16 %v635_v3  ;;  %v341_v8 = vor.u32 %v340_v58, %v337_v57  ;;  %v350_v9 = vrot.slane %v348_v59, 4  ;;  %v356_v10 = vrot.slane %v354_v60, 5 }
  0x5e   : > { %4532 = vmatmul.msk.bf16.gmra.mxu2 %vm696_vm4, %v691_v62  ;;  %v645_v13 = vsel %vm5336_vm3, %v640_v4, %v644_v50  ;;  %v4617_v14 = vrot.slane %v1058_v61, 9  ;;  %v1111_v19 = vrot.slane %v5349_v1, 5  ;;  %v2952_v22 = vsel %vm745_vm0, %v4909_v11, 0  ;;  %v4860_v50 = vld [vmem:[%s6998_s1 + $0xa] sm:$0x3] }
  0x5f   : > { %v679_v15 = vunpack.c.l.b16 %v645_v13  ;;  %v342_v16 = vrot.slane %v341_v8, 4  ;;  %v351_v17 = vor.u32 %v350_v9, %v346_v5  ;;  %v1782_v23 = vshrl.u32 %v4763_v6, 16  ;;  %2961 = vmatpush.bf16.msra.mxu2 %v2952_v22  ;;  %v1059_v8 = vld [vmem:[%s5324_s30 + $0xc] sm:$0xe] }
  0x60   : > { %v1785_v24 = vshll.u32 %v4763_v6, 16  ;;  %v1791_v26 = vshll.u32 %v4764_v12, 16  ;;  %v1112_v33 = vsel %vm5510_vm7, %v4617_v14, %v1111_v19  ;;  %v1113_v35 = vrot.slane %v1111_v19, 4  ;;  %v4767_v6 = vld [vmem:[%s5324_s30 + $0x1c] sm:$0xf] }
  0x61   : > { %v695_v29 = vpack.c.b16 %v679_v15, %v678_v7  ;;  %v347_v30 = vsel %vm5336_vm3, %v342_v16, %v346_v5  ;;  %v352_v31 = vrot.slane %v351_v17, 4  ;;  %v1223_v37 = vunpack.c.l.b16 %v1112_v33  ;;  %v4766_v5 = vld [vmem:[%s5324_s30 + $0x18] sm:$0xf]  ;;  %v5122_v15 = vld [vmem:[%s5324_s30 + $0xc] sm:$0xff] }
  0x62   : > { %v654_v34 = vunpack.c.l.b16 %v347_v30  ;;  %v1784_v1 = vrot.slane %v1782_v23, 4  ;;  %v1787_v40 = vrot.slane %v1785_v24, 5  ;;  %v1793_v41 = vrot.slane %v1791_v26, 5  ;;  %v4768_v30 = vld [vmem:[%s5324_s30 + $0x20] sm:$0x1] }
  0x63   : > { %4536 = vmatmul.msk.bf16.gmra.mxu3 %vm696_vm4, %v695_v29  ;;  %v357_v39 = vsel %vm5336_vm3, %v352_v31, %v356_v10  ;;  %v1795_v44 = vshrl.u32 %v4764_v12, 16  ;;  %v1115_v49 = vsel %vm5510_vm7, %v1113_v35, %v1114_v43  ;;  %v1801_v55 = vshll.u32 %v4765_v38, 16  ;;  %v5107_v35 = vld [vmem:[%s5324_s30 + $0xc] sm:$0xff] }
  0x64   : > { %v655_v46 = vunpack.c.l.b16 %v357_v39  ;;  %v1224_v52 = vunpack.c.l.b16 %v1115_v49  ;;  %v1788_v53 = vor.u32 %v1787_v40, %v1784_v1  ;;  %v3606_v58 = vsel %vm745_vm0, %v5038_v45, 0 }
  0x65   : > { %v1797_v54 = vrot.slane %v1795_v44, 4  ;;  %3615 = vmatpush.bf16.msra.mxu3 %v3606_v58  ;;  %v2662_v60 = vsel %vm745_vm0, %v4860_v50, 0  ;;  %v4004_v61 = vsel %vm745_vm0, %v5087_v2, 0  ;;  %v1803_v4 = vrot.slane %v1801_v55, 5  ;;  %v1060_v50 = vld [vmem:[%s5324_s30 + $0x18] sm:$0xe] }
  0x66   : > { %v683_v57 = vpack.c.b16 %v655_v46, %v654_v34  ;;  %v1255_v43 = vpack.c.b16 %v1224_v52, %v1223_v37  ;;  %2671 = vmatpush.bf16.msra.mxu1 %v2662_v60  ;;  %v1789_v62 = vrot.slane %v1788_v53, 4  ;;  %4013 = vmatpush.bf16.msra.mxu0 %v4004_v61  ;;  %v1118_v7 = vrot.slane %v5395_v28, 5  ;;  %v4770_v46 = vld [vmem:[%s5324_s30 + $0x28] sm:$0xf] }
  0x67   : > { %v1798_v59 = vor.u32 %v1797_v54, %v1793_v41  ;;  %v1806_v9 = vshrl.u32 %v4766_v5, 16  ;;  %v1809_v10 = vshll.u32 %v4766_v5, 16  ;;  %v1815_v13 = vshll.u32 %v4767_v6, 16 }
  0x68   : > { %4524 = vmatmul.msk.bf16.gmra.mxu0 %vm696_vm4, %v683_v57  ;;  %v1794_v11 = vsel %vm5336_vm3, %v1789_v62, %v1793_v41  ;;  %v1819_v14 = vshrl.u32 %v4767_v6, 16  ;;  %v4618_v16 = vrot.slane %v1059_v8, 9  ;;  %v1120_v17 = vrot.slane %v1118_v7, 4  ;;  %v4769_v41 = vld [vmem:[%s5324_s30 + $0x24] sm:$0xf] }
  0x69   : > { %4601 = vmatmul.msk.bf16.vlgmr.msrb.gmra.mxu1 %vm696_vm4, %v5106_v51  ;;  %v1799_v3 = vrot.slane %v1798_v59, 4  ;;  %v1121_v28 = vrot.slane %v5398_v32, 5  ;;  %v2167_v19 = vunpack.c.l.b16 %v1794_v11  ;;  %v1808_v23 = vrot.slane %v1806_v9, 4  ;;  %v4771_v6 = vld [vmem:[%s5324_s30 + $0x2c] sm:$0x1] }
  0x6a   : > { %v1811_v24 = vrot.slane %v1809_v10, 5  ;;  %v1817_v26 = vrot.slane %v1815_v13, 5  ;;  %v1821_v29 = vrot.slane %v1819_v14, 4  ;;  %v1119_v31 = vsel %vm5510_vm7, %v4618_v16, %v1118_v7 }
  0x6b   : > { %v1804_v12 = vsel %vm5336_vm3, %v1799_v3, %v1803_v4  ;;  %v1122_v33 = vsel %vm5510_vm7, %v1120_v17, %v1121_v28  ;;  %v1825_v38 = vshll.u32 %v4768_v30, 16  ;;  %v1225_v1 = vunpack.c.l.b16 %v1119_v31 }
  0x6c   : > { %v2168_v22 = vunpack.c.l.b16 %v1804_v12  ;;  %v1812_v32 = vor.u32 %v1811_v24, %v1808_v23  ;;  %v1822_v37 = vor.u32 %v1821_v29, %v1817_v26  ;;  %v1226_v39 = vunpack.c.l.b16 %v1122_v33  ;;  %v5108_v12 = vld [vmem:[%s5324_s30 + $0x18] sm:$0xff]  ;;  %v1061_v29 = vld [vmem:[%s5324_s30 + $0x24] sm:$0xe] }
  0x6d   : > { %v1827_v45 = vrot.slane %v1825_v38, 5  ;;  %v1125_v51 = vrot.slane %v5441_v63, 5  ;;  %v1830_v52 = vshrl.u32 %v4769_v41, 16  ;;  %v1833_v54 = vshll.u32 %v4769_v41, 16 }
  0x6e   : > { %4634 = vmatmul.msk.bf16.vlgmr.msrb.gmra.mxu2 %vm696_vm4, %v1255_v43  ;;  %v2199_v34 = vpack.c.b16 %v2168_v22, %v2167_v19  ;;  %v1813_v40 = vrot.slane %v1812_v32, 4  ;;  %v1823_v44 = vrot.slane %v1822_v37, 4  ;;  %v1256_v49 = vpack.c.b16 %v1226_v39, %v1225_v1  ;;  %v5123_v43 = vld [vmem:[%s5324_s30 + $0x18] sm:$0xff]  ;;  %v4772_v19 = vld [vmem:[%s5324_s30 + $0x30] sm:$0xf]  ;;  %v5124_v32 = vld [vmem:[%s5324_s30 + $0x24] sm:$0xff] }
  0x6f   : > { %v1839_v55 = vshll.u32 %v4770_v46, 16  ;;  %v1843_v2 = vshrl.u32 %v4770_v46, 16  ;;  %v4619_v58 = vrot.slane %v1060_v50, 9  ;;  %v1127_v60 = vrot.slane %v1125_v51, 4  ;;  %v4773_v22 = vld [vmem:[%s5324_s30 + $0x34] sm:$0xf] }
  0x70   : > { %v1818_v53 = vsel %vm5336_vm3, %v1813_v40, %v1817_v26  ;;  %v1828_v57 = vsel %vm5336_vm3, %v1823_v44, %v1827_v45  ;;  %v1128_v63 = vrot.slane %v5444_v0, 5  ;;  %v1832_v61 = vrot.slane %v1830_v52, 4  ;;  %v4774_v45 = vld [vmem:[%s5324_s30 + $0x38] sm:$0x1] }
  0x71   : > { %v2169_v59 = vunpack.c.l.b16 %v1818_v53  ;;  %v2170_v62 = vunpack.c.l.b16 %v1828_v57  ;;  %v1835_v3 = vrot.slane %v1833_v54, 5  ;;  %v1841_v4 = vrot.slane %v1839_v55, 5  ;;  %v4776_v57 = vld [vmem:[%s5324_s30 + $0x40] sm:$0xf] }
  0x72   : > { %v1845_v5 = vrot.slane %v1843_v2, 4  ;;  %v1126_v7 = vsel %vm5510_vm7, %v4619_v58, %v1125_v51  ;;  %v1129_v8 = vsel %vm5510_vm7, %v1127_v60, %v1128_v63  ;;  %v1849_v0 = vshll.u32 %v4771_v6, 16  ;;  %v4775_v2 = vld [vmem:[%s5324_s30 + $0x3c] sm:$0xf]  ;;  %v5182_v63 = vld [vmem:[%s5324_s30 + $0x34] sm:$0xf] }
  0x73   : > { %4747 = vmatmul.msk.bf16.vlgmr.msrb.gmra.mxu3 %vm696_vm4, %v5122_v15  ;;  %v2200_v9 = vpack.c.b16 %v2170_v62, %v2169_v59  ;;  %v1836_v10 = vor.u32 %v1835_v3, %v1832_v61  ;;  %v1227_v13 = vunpack.c.l.b16 %v1126_v7  ;;  %v1228_v14 = vunpack.c.l.b16 %v1129_v8  ;;  %v1062_v62 = vld [vmem:[%s5324_s30 + $0x30] sm:$0xe] }
  0x74   : > { %v1846_v11 = vor.u32 %v1845_v5, %v1841_v4  ;;  %v1851_v17 = vrot.slane %v1849_v0, 5  ;;  %v1132_v23 = vrot.slane %v5487_v42, 5  ;;  %v1854_v30 = vshrl.u32 %v4772_v19, 16  ;;  %v5183_v0 = vld [vmem:[%s5324_s30 + $0x38] sm:$0x1] }
  0x75   : > { %v1837_v15 = vrot.slane %v1836_v10, 4  ;;  %v1257_v28 = vpack.c.b16 %v1228_v14, %v1227_v13  ;;  %v1857_v31 = vshll.u32 %v4772_v19, 16  ;;  %v1863_v33 = vshll.u32 %v4773_v22, 16  ;;  %v5125_v13 = vld [vmem:[%s5324_s30 + $0x30] sm:$0xff] }
  0x76   : > { %v1847_v16 = vrot.slane %v1846_v11, 4  ;;  %v1134_v37 = vrot.slane %v1132_v23, 4  ;;  %v1135_v42 = vrot.slane %v5491_v48, 5  ;;  %v1856_v39 = vrot.slane %v1854_v30, 4  ;;  %v5109_v48 = vld [vmem:[%s5324_s30 + $0x24] sm:$0xff] }
  0x77   : > { %v1842_v24 = vsel %vm5336_vm3, %v1837_v15, %v1841_v4  ;;  %v1859_v40 = vrot.slane %v1857_v31, 5  ;;  %v1865_v41 = vrot.slane %v1863_v33, 5  ;;  %v1873_v53 = vshll.u32 %v4774_v45, 16  ;;  %v5110_v33 = vld [vmem:[%s5324_s30 + $0x30] sm:$0xff] }
  0x78   : > { %4812 = vmatmul.msk.bf16.vlgmr.msrb.gmra.mxu0 %vm696_vm4, %v2199_v34  ;;  %v1852_v26 = vsel %vm5336_vm3, %v1847_v16, %v1851_v17  ;;  %v1867_v34 = vshrl.u32 %v4773_v22, 16  ;;  %v2171_v38 = vunpack.c.l.b16 %v1842_v24  ;;  %v1139_v61 = vrot.slane %v5182_v63, 5  ;;  %v4777_v22 = vld [vmem:[%s5324_s30 + $0x44] sm:$0x1] }
  0x79   : > { %4602 = vmatmul.msk.bf16.gmra.mxu1 %vm696_vm4, %v5107_v35  ;;  %v4620_v35 = vrot.slane %v1061_v29, 9  ;;  %v2172_v1 = vunpack.c.l.b16 %v1852_v26  ;;  %v1860_v51 = vor.u32 %v1859_v40, %v1856_v39  ;;  %v1875_v59 = vrot.slane %v1873_v53, 5  ;;  %v4778_v39 = vld [vmem:[%s5324_s30 + $0x48] sm:$0xf]  ;;  %v4779_v40 = vld [vmem:[%s5324_s30 + $0x4c] sm:$0xf] }
  0x7a   : > { %v1869_v44 = vrot.slane %v1867_v34, 4  ;;  %v1878_v3 = vshrl.u32 %v4775_v2, 16  ;;  %v1881_v4 = vshll.u32 %v4775_v2, 16  ;;  %v1887_v5 = vshll.u32 %v4776_v57, 16  ;;  %v5126_v2 = vld [vmem:[%s5324_s30 + $0x3c] sm:$0xff] }
  0x7b   : > { %v1133_v46 = vsel %vm5510_vm7, %v4620_v35, %v1132_v23  ;;  %v2201_v50 = vpack.c.b16 %v2172_v1, %v2171_v38  ;;  %v1861_v58 = vrot.slane %v1860_v51, 4  ;;  %v1891_v6 = vshrl.u32 %v4776_v57, 16 }
  0x7c   : > { %v1870_v52 = vor.u32 %v1869_v44, %v1865_v41  ;;  %v1229_v54 = vunpack.c.l.b16 %v1133_v46  ;;  %v4621_v10 = vrot.slane %v1062_v62, 9  ;;  %v1141_v11 = vrot.slane %v1139_v61, 4 }
  0x7d   : > { %v1866_v8 = vsel %vm5336_vm3, %v1861_v58, %v1865_v41  ;;  %v1880_v14 = vrot.slane %v1878_v3, 4  ;;  %v1883_v15 = vrot.slane %v1881_v4, 5  ;;  %v1889_v16 = vrot.slane %v1887_v5, 5  ;;  %v4780_v4 = vld [vmem:[%s5324_s30 + $0x50] sm:$0x1] }
  0x7e   : > { %4635 = vmatmul.msk.bf16.gmra.mxu2 %vm696_vm4, %v1256_v49  ;;  %v1136_v49 = vsel %vm5510_vm7, %v1134_v37, %v1135_v42  ;;  %v1893_v17 = vrot.slane %v1891_v6, 4  ;;  %v1140_v23 = vsel %vm5510_vm7, %v4621_v10, %v1139_v61  ;;  %v1897_v30 = vshll.u32 %v4777_v22, 16 }
  0x7f   : > { %v1230_v55 = vunpack.c.l.b16 %v1136_v49  ;;  %v1884_v26 = vor.u32 %v1883_v15, %v1880_v14  ;;  %v1902_v51 = vshrl.u32 %v4778_v39, 16  ;;  %v1911_v53 = vshll.u32 %v4779_v40, 16 }
  0x80   : > { %v1894_v29 = vor.u32 %v1893_v17, %v1889_v16  ;;  %v1899_v1 = vrot.slane %v1897_v30, 5 }
  0x81   : > { %v1258_v60 = vpack.c.b16 %v1230_v55, %v1229_v54  ;;  %v1885_v42 = vrot.slane %v1884_v26, 4  ;;  %v1915_v54 = vshrl.u32 %v4779_v40, 16  ;;  %v1913_v62 = vrot.slane %v1911_v53, 5 }
  0x82   : > { %v1895_v38 = vrot.slane %v1894_v29, 4  ;;  %v1153_v26 = vrot.slane %v5408_v47, 5 }
  0x83   : > { %4748 = vmatmul.msk.bf16.gmra.mxu3 %vm696_vm4, %v5123_v43  ;;  %v1871_v43 = vrot.slane %v1870_v52, 4  ;;  %v1890_v45 = vsel %vm5336_vm3, %v1885_v42, %v1889_v16  ;;  %v1905_v52 = vshll.u32 %v4778_v39, 16  ;;  %v1917_v3 = vrot.slane %v1915_v54, 4  ;;  %v4783_v54 = vld [vmem:[%s5324_s30 + $0x5c] sm:$0x1] }
  0x84   : > { %v1900_v46 = vsel %vm5336_vm3, %v1895_v38, %v1899_v1  ;;  %v2175_v55 = vunpack.c.l.b16 %v1890_v45  ;;  %v5127_v1 = vld [vmem:[%s5324_s30 + $0x48] sm:$0xff]  ;;  %v1155_v40 = vrot.slane %v1153_v26, 4 }
  0x85   : > { %v2176_v57 = vunpack.c.l.b16 %v1900_v46  ;;  %v1907_v61 = vrot.slane %v1905_v52, 5  ;;  %v1918_v10 = vor.u32 %v1917_v3, %v1913_v62 }
  0x87   : > { %v1919_v16 = vrot.slane %v1918_v10, 4 }
  0x88   : > { %4813 = vmatmul.msk.bf16.gmra.mxu0 %vm696_vm4, %v2200_v9  ;;  %v1876_v9 = vsel %vm5336_vm3, %v1871_v43, %v1875_v59 }
  0x89   : > { %4603 = vmatmul.msk.bf16.gmra.mxu1 %vm696_vm4, %v5108_v12  ;;  %v1142_v12 = vrot.slane %v5183_v0, 5  ;;  %v2174_v19 = vunpack.c.l.b16 %v1876_v9 }
  0x8b   : > { %v1143_v24 = vsel %vm5510_vm7, %v1141_v11, %v1142_v12  ;;  %v1921_v11 = vshll.u32 %v4780_v4, 16  ;;  %v5111_v12 = vld [vmem:[%s5324_s30 + $0x3c] sm:$0xff] }
  0x8c   : > { %v1232_v35 = vunpack.c.l.b16 %v1143_v24  ;;  %v4782_v24 = vld [vmem:[%s5324_s30 + $0x58] sm:$0xf]  ;;  %v4784_v4 = vld [vmem:[%s5324_s30 + $0x60] sm:$0xf] }
  0x8d   : > { %v1923_v17 = vrot.slane %v1921_v11, 5  ;;  %v1939_v42 = vshrl.u32 %v4782_v24, 16 }
  0x8e   : > { %4636 = vmatmul.msk.bf16.gmra.mxu2 %vm696_vm4, %v1257_v28  ;;  %v2173_v28 = vunpack.c.l.b16 %v1866_v8  ;;  %v2203_v8 = vpack.c.b16 %v2176_v57, %v2175_v55 }
  0x8f   : > { %v1924_v30 = vsel %vm5336_vm3, %v1919_v16, %v1923_v17  ;;  %v1941_v52 = vrot.slane %v1939_v42, 4 }
  0x90   : > { %v2202_v31 = vpack.c.b16 %v2174_v19, %v2173_v28  ;;  %v2178_v46 = vunpack.c.l.b16 %v1924_v30 }
  0x93   : > { %4749 = vmatmul.msk.bf16.gmra.mxu3 %vm696_vm4, %v5124_v32  ;;  %v1231_v32 = vunpack.c.l.b16 %v1140_v23  ;;  %v4781_v23 = vld [vmem:[%s5324_s30 + $0x54] sm:$0xf] }
  0x95   : > { %v1259_v44 = vpack.c.b16 %v1232_v35, %v1231_v32  ;;  %v1929_v32 = vshll.u32 %v4781_v23, 16  ;;  %v1935_v35 = vshll.u32 %v4782_v24, 16 }
  0x98   : > { %4814 = vmatmul.msk.bf16.gmra.mxu0 %vm696_vm4, %v2201_v50  ;;  %v1146_v50 = vrot.slane %v5364_v20, 5  ;;  %v1904_v20 = vrot.slane %v1902_v51, 4  ;;  %v1937_v51 = vrot.slane %v1935_v35, 5  ;;  %v1163_v35 = vrot.slane %v5459_v27, 5 }
  0x99   : > { %4604 = vmatmul.msk.bf16.gmra.mxu1 %vm696_vm4, %v5109_v48  ;;  %v1063_v48 = vld [vmem:[%s5324_s30 + $0x3c] sm:$0xe] }
  0x9a   : > { %v4622_v43 = vrot.slane %v1063_v48, 9  ;;  %v1148_v59 = vrot.slane %v1146_v50, 4  ;;  %v1931_v48 = vrot.slane %v1929_v32, 5 }
  0x9c   : > { %v1147_v5 = vsel %vm5510_vm7, %v4622_v43, %v1146_v50  ;;  %v5112_v43 = vld [vmem:[%s5324_s30 + $0x48] sm:$0xff] }
  0x9e   : > { %v5605_v7 = vpop.f32.mrf.mxu1  ;;  %4637 = vmatmul.msk.bf16.gmra.mxu2 %vm696_vm4, %v1258_v60  ;;  %v1149_v60 = vrot.slane %v5369_v25, 5  ;;  %v1908_v25 = vor.u32 %v1907_v61, %v1904_v20  ;;  %v1945_v20 = vshll.u32 %v4783_v54, 16  ;;  %v5113_v54 = vld [vmem:[%s5324_s30 + $0x54] sm:$0xff] }
  0xa0   : > { %v1150_v6 = vsel %vm5510_vm7, %v1148_v59, %v1149_v60  ;;  %v1909_v15 = vrot.slane %v1908_v25, 4  ;;  %v1942_v60 = vor.u32 %v1941_v52, %v1937_v51  ;;  %v1947_v10 = vrot.slane %v1945_v20, 5 }
  0xa1   : > { %v1234_v14 = vunpack.c.l.b16 %v1150_v6 }
  0xa2   : > { %v1914_v29 = vsel %vm5336_vm3, %v1909_v15, %v1913_v62  ;;  %v1943_v25 = vrot.slane %v1942_v60, 4  ;;  %v1160_v15 = vrot.slane %v5454_v21, 5 }
  0xa3   : > { %4750 = vmatmul.msk.bf16.gmra.mxu3 %vm696_vm4, %v5125_v13  ;;  %v1233_v13 = vunpack.c.l.b16 %v1147_v5  ;;  %v2177_v45 = vunpack.c.l.b16 %v1914_v29  ;;  %v4785_v5 = vld [vmem:[%s5324_s30 + $0x64] sm:$0xf] }
  0xa4   : > { %v1963_v16 = vshrl.u32 %v4785_v5, 16  ;;  %v1948_v24 = vsel %vm5336_vm3, %v1943_v25, %v1947_v10  ;;  %v1162_v32 = vrot.slane %v1160_v15, 4  ;;  %v5184_v10 = vld [vmem:[%s5324_s30 + $0x64] sm:$0xf] }
  0xa5   : > { %v1260_v19 = vpack.c.b16 %v1234_v14, %v1233_v13  ;;  %v2204_v57 = vpack.c.b16 %v2178_v46, %v2177_v45  ;;  %v1953_v13 = vshll.u32 %v4784_v4, 16  ;;  %v1959_v14 = vshll.u32 %v4785_v5, 16 }
  0xa6   : > { %v5621_v34 = vpop.f32.mrf.mxu1  ;;  %v1965_v42 = vrot.slane %v1963_v16, 4 }
  0xa7   : > { %v1955_v30 = vrot.slane %v1953_v13, 5  ;;  %v1066_v13 = vld [vmem:[%s5324_s30 + $0x60] sm:$0xe] }
  0xa8   : > { %v5623_v37 = vpop.f32.mrf.mxu2  ;;  %4815 = vmatmul.msk.bf16.gmra.mxu0 %vm696_vm4, %v2202_v31  ;;  %v1064_v31 = vld [vmem:[%s5324_s30 + $0x48] sm:$0xe] }
  0xa9   : > { %4605 = vmatmul.msk.bf16.gmra.mxu1 %vm696_vm4, %v5110_v33  ;;  %v1926_v33 = vshrl.u32 %v4781_v23, 16  ;;  %v4623_v47 = vrot.slane %v1064_v31, 9  ;;  %v1961_v31 = vrot.slane %v1959_v14, 5 }
  0xab   : > { %v5629_v41 = vpop.f32.mrf.mxu0  ;;  %v1928_v50 = vrot.slane %v1926_v33, 4  ;;  %v5128_v33 = vld [vmem:[%s5324_s30 + $0x54] sm:$0xff]  ;;  %v1966_v27 = vor.u32 %v1965_v42, %v1961_v31 }
  0xac   : > { %v5635_v49 = vpop.f32.mrf.mxu3 }
  0xad   : > { %v1932_v59 = vor.u32 %v1931_v48, %v1928_v50  ;;  %v1164_v48 = vsel %vm5510_vm7, %v1162_v32, %v1163_v35  ;;  %v1967_v60 = vrot.slane %v1966_v27, 4 }
  0xae   : > { %4638 = vmatmul.msk.bf16.gmra.mxu2 %vm696_vm4, %v1259_v44  ;;  %v1156_v44 = vrot.slane %v5413_v56, 5 }
  0xb0   : > { %v5641_v58 = vpop.f32.mrf.mxu1  ;;  %v5644_v63 = vpop.f32.mrf.mxu2  ;;  %v1157_v56 = vsel %vm5510_vm7, %v1155_v40, %v1156_v44  ;;  %v4786_v40 = vld [vmem:[%s5324_s30 + $0x68] sm:$0x1] }
  0xb1   : > { %v1236_v62 = vunpack.c.l.b16 %v1157_v56 }
  0xb3   : > { %4751 = vmatmul.msk.bf16.gmra.mxu3 %vm696_vm4, %v5126_v2  ;;  %v5652_v9 = vpop.f32.mrf.mxu0  ;;  %v1154_v2 = vsel %vm5510_vm7, %v4623_v47, %v1153_v26  ;;  %v2180_v47 = vunpack.c.l.b16 %v1948_v24 }
  0xb4   : > { %v5654_v0 = vpop.f32.mrf.mxu3  ;;  %v1235_v61 = vunpack.c.l.b16 %v1154_v2 }
  0xb6   : > { %v1261_v11 = vpack.c.b16 %v1236_v62, %v1235_v61  ;;  %v4787_v61 = vld [vmem:[%s5324_s30 + $0x6c] sm:$0xf]  ;;  %v4788_v62 = vld [vmem:[%s5324_s30 + $0x70] sm:$0xf] }
  0xb7   : > { %v1974_v14 = vshrl.u32 %v4787_v61, 16  ;;  %v1983_v16 = vshll.u32 %v4788_v62, 16 }
  0xb8   : > { %4816 = vmatmul.msk.bf16.gmra.mxu0 %vm696_vm4, %v2203_v8  ;;  %v5658_v28 = vpop.f32.mrf.mxu1  ;;  %v1933_v8 = vrot.slane %v1932_v59, 4 }
  0xb9   : > { %4606 = vmatmul.msk.bf16.gmra.mxu1 %vm696_vm4, %v5111_v12  ;;  %v1950_v12 = vshrl.u32 %v4784_v4, 16  ;;  %v1976_v35 = vrot.slane %v1974_v14, 4  ;;  %v4791_v14 = vld [vmem:[%s5324_s30 + $0x7c] sm:$0xf] }
  0xba   : > { %v1938_v23 = vsel %vm5336_vm3, %v1933_v8, %v1937_v51  ;;  %v1969_v51 = vshll.u32 %v4786_v40, 16 }
  0xbb   : > { %v5661_v22 = vpop.f32.mrf.mxu2  ;;  %v1952_v29 = vrot.slane %v1950_v12, 4 }
  0xbc   : > { %v1971_v20 = vrot.slane %v1969_v51, 5 }
  0xbd   : > { %v1956_v46 = vor.u32 %v1955_v30, %v1952_v29  ;;  %v5129_v30 = vld [vmem:[%s5324_s30 + $0x60] sm:$0xff] }
  0xbe   : > { %4639 = vmatmul.msk.bf16.gmra.mxu2 %vm696_vm4, %v1260_v19  ;;  %v1065_v19 = vld [vmem:[%s5324_s30 + $0x54] sm:$0xe]  ;;  %v1972_v25 = vsel %vm5336_vm3, %v1967_v60, %v1971_v20 }
  0xbf   : > { %v5671_v38 = vpop.f32.mrf.mxu0  ;;  %v4624_v21 = vrot.slane %v1065_v19, 9  ;;  %v1957_v59 = vrot.slane %v1956_v46, 4  ;;  %v1987_v19 = vshrl.u32 %v4788_v62, 16  ;;  %v4789_v46 = vld [vmem:[%s5324_s30 + $0x74] sm:$0x1] }
  0xc0   : > { %v5675_v39 = vpop.f32.mrf.mxu3 }
  0xc1   : > { %v1161_v50 = vsel %vm5510_vm7, %v4624_v21, %v1160_v15  ;;  %v1962_v8 = vsel %vm5336_vm3, %v1957_v59, %v1961_v31  ;;  %v1977_v15 = vshll.u32 %v4787_v61, 16  ;;  %v4625_v21 = vrot.slane %v1066_v13, 9  ;;  %v4790_v13 = vld [vmem:[%s5324_s30 + $0x78] sm:$0xf] }
  0xc2   : > { %v5678_v53 = vpop.f32.mrf.mxu1  ;;  %v1237_v56 = vunpack.c.l.b16 %v1161_v50  ;;  %v2181_v31 = vunpack.c.l.b16 %v1962_v8 }
  0xc3   : > { %4752 = vmatmul.msk.bf16.gmra.mxu3 %vm696_vm4, %v5127_v1  ;;  %v5682_v55 = vpop.f32.mrf.mxu2  ;;  %v2179_v1 = vunpack.c.l.b16 %v1938_v23  ;;  %v5185_v23 = vld [vmem:[%s5324_s30 + $0x68] sm:$0x1]  ;;  %v1979_v42 = vrot.slane %v1977_v15, 5  ;;  %v5186_v15 = vld [vmem:[%s5324_s30 + $0x70] sm:$0xf] }
  0xc4   : > { %v1170_v24 = vrot.slane %v5185_v23, 5  ;;  %v1067_v23 = vld [vmem:[%s5324_s30 + $0x6c] sm:$0xe] }
  0xc5   : > { %v2205_v52 = vpack.c.b16 %v2180_v47, %v2179_v1  ;;  %v1985_v1 = vrot.slane %v1983_v16, 5  ;;  %v1989_v47 = vrot.slane %v1987_v19, 4  ;;  %v1980_v51 = vor.u32 %v1979_v42, %v1976_v35  ;;  %v5187_v42 = vld [vmem:[%s5324_s30 + $0x74] sm:$0x1] }
  0xc6   : > { %v1174_v16 = vrot.slane %v5186_v15, 5 }
  0xc7   : > { %v5689_v3 = vpop.f32.mrf.mxu0 }
  0xc8   : > { %4817 = vmatmul.msk.bf16.gmra.mxu0 %vm696_vm4, %v2204_v57  ;;  %v5694_v6 = vpop.f32.mrf.mxu3  ;;  %v1238_v57 = vunpack.c.l.b16 %v1164_v48 }
  0xc9   : > { %4607 = vmatmul.msk.bf16.gmra.mxu1 %vm696_vm4, %v5112_v43 }
  0xca   : > { %v5698_v17 = vpop.f32.mrf.mxu1  ;;  %v1262_v4 = vpack.c.b16 %v1238_v57, %v1237_v56  ;;  %v5114_v57 = vld [vmem:[%s5324_s30 + $0x60] sm:$0xff] }
  0xce   : > { %v5705_v26 = vpop.f32.mrf.mxu2  ;;  %4640 = vmatmul.msk.bf16.gmra.mxu2 %vm696_vm4, %v1261_v11  ;;  %v1167_v11 = vrot.slane %v5184_v10, 5 }
  0xd0   : > { %v1169_v32 = vrot.slane %v1167_v11, 4  ;;  %v1168_v50 = vsel %vm5510_vm7, %v4625_v21, %v1167_v11  ;;  %v2011_v21 = vshrl.u32 %v4791_v14, 16 }
  0xd1   : > { %v5711_v44 = vpop.f32.mrf.mxu0  ;;  %v1239_v20 = vunpack.c.l.b16 %v1168_v50  ;;  %v4626_v50 = vrot.slane %v1067_v23, 9 }
  0xd2   : > { %v5713_v45 = vpop.f32.mrf.mxu3  ;;  %v1171_v48 = vsel %vm5510_vm7, %v1169_v32, %v1170_v24 }
  0xd3   : > { %4753 = vmatmul.msk.bf16.gmra.mxu3 %vm696_vm4, %v5128_v33  ;;  %v2182_v33 = vunpack.c.l.b16 %v1972_v25  ;;  %v1240_v61 = vunpack.c.l.b16 %v1171_v48  ;;  %v1176_v48 = vrot.slane %v1174_v16, 4 }
  0xd5   : > { %v2206_v27 = vpack.c.b16 %v2182_v33, %v2181_v31  ;;  %v1263_v11 = vpack.c.b16 %v1240_v61, %v1239_v20  ;;  %v2001_v31 = vshll.u32 %v4790_v13, 16  ;;  %v2007_v33 = vshll.u32 %v4791_v14, 16 }
  0xd6   : > { %v5721_v2 = vpop.f32.mrf.mxu1  ;;  %v5723_v43 = vpop.f32.mrf.mxu2  ;;  %v2013_v20 = vrot.slane %v2011_v21, 4 }
  0xd8   : > { %4818 = vmatmul.msk.bf16.gmra.mxu0 %vm696_vm4, %v2205_v52  ;;  %v1990_v52 = vor.u32 %v1989_v47, %v1985_v1  ;;  %v1177_v47 = vrot.slane %v5187_v42, 5 }
  0xd9   : > { %4608 = vmatmul.msk.bf16.gmra.mxu1 %vm696_vm4, %v5113_v54  ;;  %v5729_v5 = vpop.f32.mrf.mxu0  ;;  %v1993_v54 = vshll.u32 %v4789_v46, 16  ;;  %v5130_v46 = vld [vmem:[%s5324_s30 + $0x6c] sm:$0xff] }
  0xda   : > { %v5736_v12 = vpop.f32.mrf.mxu3  ;;  %v1991_v8 = vrot.slane %v1990_v52, 4 }
  0xdb   : > { %v1995_v25 = vrot.slane %v1993_v54, 5 }
  0xde   : > { %4641 = vmatmul.msk.bf16.gmra.mxu2 %vm696_vm4, %v1262_v4  ;;  %v5741_v29 = vpop.f32.mrf.mxu1  ;;  %v1981_v4 = vrot.slane %v1980_v51, 4 }
  0xe0   : > { %v1986_v19 = vsel %vm5336_vm3, %v1981_v4, %v1985_v1  ;;  %v4792_v4 = vld [vmem:[%s5324_s30 + $0x80] sm:$0x1] }
  0xe1   : > { %v5744_v40 = vpop.f32.mrf.mxu2 }
  0xe3   : > { %4754 = vmatmul.msk.bf16.gmra.mxu3 %vm696_vm4, %v5129_v30  ;;  %v1998_v30 = vshrl.u32 %v4790_v13, 16  ;;  %v5115_v13 = vld [vmem:[%s5324_s30 + $0x6c] sm:$0xff] }
  0xe5   : > { %v5752_v56 = vpop.f32.mrf.mxu0  ;;  %v2000_v54 = vrot.slane %v1998_v30, 4 }
  0xe6   : > { %v5755_v59 = vpop.f32.mrf.mxu3  ;;  %v978_v60 = vpop.f32.mrf.mxu1 }
  0xe7   : > { %v979_v62 = vadd.f32 %v978_v60, %v5629_v41  ;;  %v1996_v41 = vsel %vm5336_vm3, %v1991_v8, %v1995_v25  ;;  %v2009_v60 = vrot.slane %v2007_v33, 5  ;;  %v1175_v8 = vsel %vm5510_vm7, %v4626_v50, %v1174_v16 }
  0xe8   : > { %4819 = vmatmul.msk.bf16.gmra.mxu0 %vm696_vm4, %v2206_v27  ;;  %v2183_v27 = vunpack.c.l.b16 %v1986_v19  ;;  %v2184_v51 = vunpack.c.l.b16 %v1996_v41  ;;  %v2017_v19 = vshll.u32 %v4792_v4, 16 }
  0xe9   : > { %v5759_v10 = vpop.f32.mrf.mxu2  ;;  %4609 = vmatmul.msk.bf16.gmra.mxu1 %vm696_vm4, %v5114_v57  ;;  %v2003_v57 = vrot.slane %v2001_v31, 5  ;;  %v2014_v15 = vor.u32 %v2013_v20, %v2009_v60 }
  0xea   : > { %v2207_v25 = vpack.c.b16 %v2184_v51, %v2183_v27  ;;  %v2019_v42 = vrot.slane %v2017_v19, 5  ;;  %v4794_v27 = vld [vmem:[%s5324_s30 + $0x88] sm:$0xf]  ;;  %v5188_v51 = vld [vmem:[%s5324_s30 + $0x7c] sm:$0xf] }
  0xeb   : > { %v2004_v14 = vor.u32 %v2003_v57, %v2000_v54  ;;  %v1068_v54 = vld [vmem:[%s5324_s30 + $0x78] sm:$0xe] }
  0xed   : > { %v5770_v24 = vpop.f32.mrf.mxu0  ;;  %v2005_v21 = vrot.slane %v2004_v14, 4 }
  0xee   : > { %v5772_v32 = vpop.f32.mrf.mxu3  ;;  %4642 = vmatmul.msk.bf16.gmra.mxu2 %vm696_vm4, %v1263_v11  ;;  %v980_v35 = vpop.f32.mrf.mxu1 }
  0xef   : > { %v981_v1 = vadd.f32 %v980_v35, %v5652_v9  ;;  %v1178_v9 = vsel %vm5510_vm7, %v1176_v48, %v1177_v47  ;;  %v2015_v35 = vrot.slane %v2014_v15, 4  ;;  %v4793_v47 = vld [vmem:[%s5324_s30 + $0x84] sm:$0xf]  ;;  %v5131_v15 = vld [vmem:[%s5324_s30 + $0x78] sm:$0xff] }
  0xf0   : > { %v1242_v30 = vunpack.c.l.b16 %v1178_v9  ;;  %v2025_v57 = vshll.u32 %v4793_v47, 16  ;;  %v2035_v9 = vshrl.u32 %v4794_v27, 16 }
  0xf1   : > { %v1331_v52 = vpop.f32.mrf.mxu2  ;;  %v2020_v4 = vsel %vm5336_vm3, %v2015_v35, %v2019_v42 }
  0xf2   : > { %v1411_v61 = vadd.f32 %v1331_v52, %v979_v62  ;;  %v1241_v62 = vunpack.c.l.b16 %v1175_v8  ;;  %v1181_v52 = vrot.slane %v5188_v51, 5  ;;  %v2031_v8 = vshll.u32 %v4794_v27, 16 }
  0xf3   : > { %4755 = vmatmul.msk.bf16.gmra.mxu3 %vm696_vm4, %v5130_v46  ;;  %v2037_v35 = vrot.slane %v2035_v9, 4 }
  0xf4   : > { %v1264_v48 = vpack.c.b16 %v1242_v30, %v1241_v62 }
  0xf5   : > { %v2275_v11 = vpop.f32.mrf.mxu0 }
  0xf6   : > { %v1621_v41 = vpop.f32.mrf.mxu3  ;;  %v983_v23 = vpop.f32.mrf.mxu1 }
  0xf7   : > { %v1701_v31 = vadd.f32 %v1621_v41, %v1411_v61  ;;  %v984_v16 = vadd.f32 %v983_v23, %v5671_v38  ;;  %v2022_v38 = vshrl.u32 %v4793_v47, 16  ;;  %v2010_v61 = vsel %vm5336_vm3, %v2005_v21, %v2009_v60 }
  0xf8   : > { %4820 = vmatmul.msk.bf16.gmra.mxu0 %vm696_vm4, %v2207_v25  ;;  %v5189_v25 = vld [vmem:[%s5324_s30 + $0x80] sm:$0x1]  ;;  %v4627_v41 = vrot.slane %v1068_v54, 9  ;;  %v1183_v23 = vrot.slane %v1181_v52, 4  ;;  %v2185_v62 = vunpack.c.l.b16 %v2010_v61  ;;  %v2186_v60 = vunpack.c.l.b16 %v2020_v4 }
  0xf9   : > { %v1333_v33 = vpop.f32.mrf.mxu2  ;;  %4610 = vmatmul.msk.bf16.gmra.mxu1 %vm696_vm4, %v5115_v13  ;;  %v5789_v46 = vadd.f32 %v2275_v11, %v1701_v31  ;;  %v1184_v11 = vrot.slane %v5189_v25, 5  ;;  %v2024_v30 = vrot.slane %v2022_v38, 4  ;;  %v2027_v31 = vrot.slane %v2025_v57, 5  ;;  %v5116_v38 = vld [vmem:[%s5324_s30 + $0x78] sm:$0xff] }
  0xfa   : > { %v1412_v50 = vadd.f32 %v1333_v33, %v981_v1  ;;  %v2033_v21 = vrot.slane %v2031_v8, 5  ;;  %v2208_v27 = vpack.c.b16 %v2186_v60, %v2185_v62  ;;  %v4797_v62 = vld [vmem:[%s5324_s30 + $0x94] sm:$0xf]  ;;  %v5190_v60 = vld [vmem:[%s5324_s30 + $0x88] sm:$0xf] }
  0xfb   : > { %v2028_v51 = vor.u32 %v2027_v31, %v2024_v30  ;;  %v1188_v30 = vrot.slane %v5190_v60, 5  ;;  %v1069_v31 = vld [vmem:[%s5324_s30 + $0x84] sm:$0xe] }
  0xfc   : > { %v2038_v57 = vor.u32 %v2037_v35, %v2033_v21 }
  0xfd   : > { %v2277_v20 = vpop.f32.mrf.mxu0  ;;  %v2029_v25 = vrot.slane %v2028_v51, 4 }
  0xfe   : > { %v1623_v1 = vpop.f32.mrf.mxu3  ;;  %4643 = vmatmul.msk.bf16.gmra.mxu2 %vm696_vm4, %v1264_v48  ;;  %v985_v13 = vpop.f32.mrf.mxu1  ;;  %v4795_v48 = vld [vmem:[%s5324_s30 + $0x8c] sm:$0x1] }
  0xff   : > { %v1702_v14 = vadd.f32 %v1623_v1, %v1412_v50  ;;  %v986_v19 = vadd.f32 %v985_v13, %v5689_v3  ;;  %v1182_v50 = vsel %vm5510_vm7, %v4627_v41, %v1181_v52  ;;  %v1185_v3 = vsel %vm5510_vm7, %v1183_v23, %v1184_v11 }
 0x100   : > { %v2041_v61 = vshll.u32 %v4795_v48, 16  ;;  %v1244_v8 = vunpack.c.l.b16 %v1185_v3  ;;  %v2039_v1 = vrot.slane %v2038_v57, 4  ;;  %v2059_v3 = vshrl.u32 %v4797_v62, 16  ;;  %v5132_v57 = vld [vmem:[%s5324_s30 + $0x84] sm:$0xff] }
 0x101   : > { %v1336_v33 = vpop.f32.mrf.mxu2  ;;  %v5802_v42 = vadd.f32 %v2277_v20, %v1702_v14  ;;  %v4796_v14 = vld [vmem:[%s5324_s30 + $0x90] sm:$0xf] }
 0x102   : > { %v1413_v47 = vadd.f32 %v1336_v33, %v984_v16  ;;  %v1243_v16 = vunpack.c.l.b16 %v1182_v50  ;;  %v2043_v13 = vrot.slane %v2041_v61, 5  ;;  %v2046_v33 = vshrl.u32 %v4796_v14, 16 }
 0x103   : > { %4756 = vmatmul.msk.bf16.gmra.mxu3 %vm696_vm4, %v5131_v15  ;;  %v2049_v48 = vshll.u32 %v4796_v14, 16  ;;  %v2055_v50 = vshll.u32 %v4797_v62, 16  ;;  %v4628_v61 = vrot.slane %v1069_v31, 9 }
 0x104   : > { %v1265_v23 = vpack.c.b16 %v1244_v8, %v1243_v16  ;;  %v2048_v8 = vrot.slane %v2046_v33, 4 }
 0x105   : > { %v2280_v54 = vpop.f32.mrf.mxu0 }
 0x106   : > { %v1626_v4 = vpop.f32.mrf.mxu3  ;;  %v988_v20 = vpop.f32.mrf.mxu1 }
 0x107   : > { %v1703_v9 = vadd.f32 %v1626_v4, %v1413_v47  ;;  %v989_v52 = vadd.f32 %v988_v20, %v5711_v44  ;;  %v2034_v44 = vsel %vm5336_vm3, %v2029_v25, %v2033_v21  ;;  %v2044_v47 = vsel %vm5336_vm3, %v2039_v1, %v2043_v13 }
 0x108   : > { %4821 = vmatmul.msk.bf16.gmra.mxu0 %vm696_vm4, %v2208_v27  ;;  %v5191_v27 = vld [vmem:[%s5324_s30 + $0x8c] sm:$0x1]  ;;  %v1190_v4 = vrot.slane %v1188_v30, 4  ;;  %v2187_v20 = vunpack.c.l.b16 %v2034_v44  ;;  %v2188_v16 = vunpack.c.l.b16 %v2044_v47  ;;  %v2051_v25 = vrot.slane %v2049_v48, 5  ;;  %v5117_v44 = vld [vmem:[%s5324_s30 + $0x84] sm:$0xff] }
 0x109   : > { %v1338_v11 = vpop.f32.mrf.mxu2  ;;  %4611 = vmatmul.msk.bf16.gmra.mxu1 %vm696_vm4, %v5116_v38  ;;  %v5815_v15 = vadd.f32 %v2280_v54, %v1703_v9  ;;  %v1191_v51 = vrot.slane %v5191_v27, 5  ;;  %v2061_v1 = vrot.slane %v2059_v3, 4 }
 0x10a   : > { %v1414_v41 = vadd.f32 %v1338_v11, %v986_v19  ;;  %v2057_v11 = vrot.slane %v2055_v50, 5  ;;  %v2209_v62 = vpack.c.b16 %v2188_v16, %v2187_v20  ;;  %v2052_v31 = vor.u32 %v2051_v25, %v2048_v8  ;;  %v4800_v20 = vld [vmem:[%s5324_s30 + $0xa0] sm:$0xf]  ;;  %v5192_v16 = vld [vmem:[%s5324_s30 + $0x94] sm:$0xf] }
 0x10b   : > { %v1195_v8 = vrot.slane %v5192_v16, 5 }
 0x10c   : > { %v2062_v33 = vor.u32 %v2061_v1, %v2057_v11 }
 0x10d   : > { %v2282_v35 = vpop.f32.mrf.mxu0 }
 0x10e   : > { %v1628_v19 = vpop.f32.mrf.mxu3  ;;  %4644 = vmatmul.msk.bf16.gmra.mxu2 %vm696_vm4, %v1265_v23  ;;  %v990_v54 = vpop.f32.mrf.mxu1  ;;  %v4798_v23 = vld [vmem:[%s5324_s30 + $0x98] sm:$0x1] }
 0x10f   : > { %v1704_v38 = vadd.f32 %v1628_v19, %v1414_v41  ;;  %v991_v21 = vadd.f32 %v990_v54, %v5729_v5  ;;  %v1189_v41 = vsel %vm5510_vm7, %v4628_v61, %v1188_v30  ;;  %v1192_v5 = vsel %vm5510_vm7, %v1190_v4, %v1191_v51 }
 0x110   : > { %v2065_v47 = vshll.u32 %v4798_v23, 16  ;;  %v1246_v50 = vunpack.c.l.b16 %v1192_v5  ;;  %v2053_v51 = vrot.slane %v2052_v31, 4  ;;  %v2063_v19 = vrot.slane %v2062_v33, 4  ;;  %v5133_v33 = vld [vmem:[%s5324_s30 + $0x90] sm:$0xff] }
 0x111   : > { %v1341_v9 = vpop.f32.mrf.mxu2  ;;  %v5828_v13 = vadd.f32 %v2282_v35, %v1704_v38  ;;  %v4799_v38 = vld [vmem:[%s5324_s30 + $0x9c] sm:$0xf]  ;;  %v2083_v5 = vshrl.u32 %v4800_v20, 16 }
 0x112   : > { %v1415_v14 = vadd.f32 %v1341_v9, %v989_v52  ;;  %v1245_v52 = vunpack.c.l.b16 %v1189_v41  ;;  %v2067_v54 = vrot.slane %v2065_v47, 5  ;;  %v1070_v9 = vld [vmem:[%s5324_s30 + $0x90] sm:$0xe]  ;;  %v2073_v25 = vshll.u32 %v4799_v38, 16 }
 0x113   : > { %4757 = vmatmul.msk.bf16.gmra.mxu3 %vm696_vm4, %v5132_v57  ;;  %v2079_v41 = vshll.u32 %v4800_v20, 16 }
 0x114   : > { %v1266_v4 = vpack.c.b16 %v1246_v50, %v1245_v52  ;;  %v2068_v23 = vsel %vm5336_vm3, %v2063_v19, %v2067_v54  ;;  %v2085_v19 = vrot.slane %v2083_v5, 4 }
 0x115   : > { %v2285_v60 = vpop.f32.mrf.mxu0 }
 0x116   : > { %v1631_v48 = vpop.f32.mrf.mxu3  ;;  %v993_v35 = vpop.f32.mrf.mxu1 }
 0x117   : > { %v1705_v3 = vadd.f32 %v1631_v48, %v1415_v14  ;;  %v994_v30 = vadd.f32 %v993_v35, %v5752_v56  ;;  %v2070_v56 = vshrl.u32 %v4799_v38, 16  ;;  %v2058_v14 = vsel %vm5336_vm3, %v2053_v51, %v2057_v11 }
 0x118   : > { %4822 = vmatmul.msk.bf16.gmra.mxu0 %vm696_vm4, %v2209_v62  ;;  %v5193_v62 = vld [vmem:[%s5324_s30 + $0x98] sm:$0x1]  ;;  %v4629_v48 = vrot.slane %v1070_v9, 9  ;;  %v1197_v35 = vrot.slane %v1195_v8, 4  ;;  %v2189_v52 = vunpack.c.l.b16 %v2058_v14  ;;  %v2190_v11 = vunpack.c.l.b16 %v2068_v23 }
 0x119   : > { %v1343_v27 = vpop.f32.mrf.mxu2  ;;  %4612 = vmatmul.msk.bf16.gmra.mxu1 %vm696_vm4, %v5117_v44  ;;  %v5841_v57 = vadd.f32 %v2285_v60, %v1705_v3  ;;  %v1198_v60 = vrot.slane %v5193_v62, 5  ;;  %v2072_v50 = vrot.slane %v2070_v56, 4  ;;  %v2075_v3 = vrot.slane %v2073_v25, 5  ;;  %v5118_v56 = vld [vmem:[%s5324_s30 + $0x90] sm:$0xff] }
 0x11a   : > { %v1416_v61 = vadd.f32 %v1343_v27, %v991_v21  ;;  %v2081_v51 = vrot.slane %v2079_v41, 5  ;;  %v2210_v20 = vpack.c.b16 %v2190_v11, %v2189_v52  ;;  %v4803_v11 = vld [vmem:[%s5324_s30 + $0xac] sm:$0xf] }
 0x11b   : > { %v2076_v16 = vor.u32 %v2075_v3, %v2072_v50  ;;  %v1071_v50 = vld [vmem:[%s5324_s30 + $0x9c] sm:$0xe] }
 0x11c   : > { %v2086_v25 = vor.u32 %v2085_v19, %v2081_v51 }
 0x11d   : > { %v2287_v1 = vpop.f32.mrf.mxu0 }
 0x11e   : > { %v1633_v21 = vpop.f32.mrf.mxu3  ;;  %4645 = vmatmul.msk.bf16.gmra.mxu2 %vm696_vm4, %v1266_v4  ;;  %v995_v44 = vpop.f32.mrf.mxu1  ;;  %v4801_v4 = vld [vmem:[%s5324_s30 + $0xa4] sm:$0x1] }
 0x11f   : > { %v1706_v31 = vadd.f32 %v1633_v21, %v1416_v61  ;;  %v996_v47 = vadd.f32 %v995_v44, %v5770_v24  ;;  %v1196_v61 = vsel %vm5510_vm7, %v4629_v48, %v1195_v8  ;;  %v1199_v24 = vsel %vm5510_vm7, %v1197_v35, %v1198_v60  ;;  %v4802_v44 = vld [vmem:[%s5324_s30 + $0xa8] sm:$0xf]  ;;  %v5194_v35 = vld [vmem:[%s5324_s30 + $0xa0] sm:$0xf] }
 0x120   : > { %v2089_v14 = vshll.u32 %v4801_v4, 16  ;;  %v1248_v41 = vunpack.c.l.b16 %v1199_v24  ;;  %v2077_v8 = vrot.slane %v2076_v16, 4  ;;  %v2087_v60 = vrot.slane %v2086_v25, 4 }
 0x121   : > { %v1346_v27 = vpop.f32.mrf.mxu2  ;;  %v5854_v54 = vadd.f32 %v2287_v1, %v1706_v31  ;;  %v1202_v52 = vrot.slane %v5194_v35, 5  ;;  %v2097_v19 = vshll.u32 %v4802_v44, 16  ;;  %v2107_v24 = vshrl.u32 %v4803_v11, 16 }
 0x122   : > { %v1417_v38 = vadd.f32 %v1346_v27, %v994_v30  ;;  %v1247_v30 = vunpack.c.l.b16 %v1196_v61  ;;  %v2091_v21 = vrot.slane %v2089_v14, 5  ;;  %v2082_v3 = vsel %vm5336_vm3, %v2077_v8, %v2081_v51 }
 0x123   : > { %4758 = vmatmul.msk.bf16.gmra.mxu3 %vm696_vm4, %v5133_v33  ;;  %v2094_v27 = vshrl.u32 %v4802_v44, 16  ;;  %v2103_v61 = vshll.u32 %v4803_v11, 16  ;;  %v1204_v25 = vrot.slane %v1202_v52, 4  ;;  %v2191_v51 = vunpack.c.l.b16 %v2082_v3  ;;  %v4804_v11 = vld [vmem:[%s5324_s30 + $0xb0] sm:$0x1]  ;;  %v5119_v3 = vld [vmem:[%s5324_s30 + $0x9c] sm:$0xff] }
 0x124   : > { %v1267_v48 = vpack.c.b16 %v1248_v41, %v1247_v30  ;;  %v2092_v4 = vsel %vm5336_vm3, %v2087_v60, %v2091_v21  ;;  %v2099_v8 = vrot.slane %v2097_v19, 5  ;;  %v2109_v21 = vrot.slane %v2107_v24, 4 }
 0x125   : > { %v2290_v9 = vpop.f32.mrf.mxu0  ;;  %v2192_v41 = vunpack.c.l.b16 %v2092_v4  ;;  %v2105_v60 = vrot.slane %v2103_v61, 5  ;;  %v2113_v4 = vshll.u32 %v4804_v11, 16 }
 0x126   : > { %v1636_v1 = vpop.f32.mrf.mxu3  ;;  %v998_v23 = vpop.f32.mrf.mxu1 }
 0x127   : > { %v1707_v5 = vadd.f32 %v1636_v1, %v1417_v38  ;;  %v5134_v1 = vld [vmem:[%s5324_s30 + $0x9c] sm:$0xff]  ;;  %v999_v30 = vadd.f32 %v998_v23, %v5605_v7  ;;  %v2211_v7 = vpack.c.b16 %v2192_v41, %v2191_v51  ;;  %v2115_v51 = vrot.slane %v2113_v4, 5 }
 0x128   : > { %4823 = vmatmul.msk.bf16.gmra.mxu0 %vm696_vm4, %v2210_v20  ;;  %v5195_v20 = vld [vmem:[%s5324_s30 + $0xa4] sm:$0x1] }
 0x129   : > { %v1348_v62 = vpop.f32.mrf.mxu2  ;;  %4613 = vmatmul.msk.bf16.gmra.mxu1 %vm696_vm4, %v5118_v56  ;;  %v5866_v31 = vadd.f32 %v2290_v9, %v1707_v5  ;;  %v1205_v16 = vrot.slane %v5195_v20, 5  ;;  %v4630_v56 = vrot.slane %v1071_v50, 9  ;;  %v2096_v5 = vrot.slane %v2094_v27, 4 }
 0x12a   : > { %v1418_v33 = vadd.f32 %v1348_v62, %v996_v47 }
 0x12b   : > { %v2100_v23 = vor.u32 %v2099_v8, %v2096_v5 }
 0x12d   : > { %v2292_v38 = vpop.f32.mrf.mxu0 }
 0x12e   : > { %v1638_v47 = vpop.f32.mrf.mxu3  ;;  %4646 = vmatmul.msk.bf16.gmra.mxu2 %vm696_vm4, %v1267_v48  ;;  %v1000_v9 = vpop.f32.mrf.mxu1  ;;  %v1203_v48 = vsel %vm5510_vm7, %v4630_v56, %v1202_v52  ;;  %v4805_v52 = vld [vmem:[%s5324_s30 + $0xb4] sm:$0xf]  ;;  %v2101_v56 = vrot.slane %v2100_v23, 4 }
 0x12f   : > { %v1708_v14 = vadd.f32 %v1638_v47, %v1418_v33  ;;  %v1206_v33 = vsel %vm5510_vm7, %v1204_v25, %v1205_v16  ;;  %v1249_v27 = vunpack.c.l.b16 %v1203_v48  ;;  %v4806_v47 = vld [vmem:[%s5324_s30 + $0xb8] sm:$0xf]  ;;  %v1001_v16 = vadd.f32 %v1000_v9, %v5621_v34 }
 0x130   : > { %v1250_v19 = vunpack.c.l.b16 %v1206_v33  ;;  %v2118_v5 = vshrl.u32 %v4805_v52, 16  ;;  %v2121_v8 = vshll.u32 %v4805_v52, 16  ;;  %v2131_v48 = vshrl.u32 %v4806_v47, 16  ;;  %v1072_v33 = vld [vmem:[%s5324_s30 + $0xa8] sm:$0xe] }
 0x131   : > { %v1351_v62 = vpop.f32.mrf.mxu2  ;;  %v5879_v44 = vadd.f32 %v2292_v38, %v1708_v14  ;;  %v2110_v38 = vor.u32 %v2109_v21, %v2105_v60  ;;  %v5196_v21 = vld [vmem:[%s5324_s30 + $0xac] sm:$0xf]  ;;  %v2106_v9 = vsel %vm5336_vm3, %v2101_v56, %v2105_v60 }
 0x132   : > { %v1419_v35 = vadd.f32 %v1351_v62, %v999_v30  ;;  %v1268_v14 = vpack.c.b16 %v1250_v19, %v1249_v27  ;;  %v2127_v62 = vshll.u32 %v4806_v47, 16  ;;  %v2120_v27 = vrot.slane %v2118_v5, 4 }
 0x133   : > { %4759 = vmatmul.msk.bf16.gmra.mxu3 %vm696_vm4, %v5134_v1  ;;  %v2111_v1 = vrot.slane %v2110_v38, 4  ;;  %v2123_v19 = vrot.slane %v2121_v8, 5  ;;  %v2133_v47 = vrot.slane %v2131_v48, 4  ;;  %v5120_v48 = vld [vmem:[%s5324_s30 + $0xa8] sm:$0xff] }
 0x134   : > { %v2129_v38 = vrot.slane %v2127_v62, 5 }
 0x135   : > { %v2295_v50 = vpop.f32.mrf.mxu0  ;;  %v2116_v11 = vsel %vm5336_vm3, %v2111_v1, %v2115_v51 }
 0x136   : > { %v1641_v61 = vpop.f32.mrf.mxu3  ;;  %v1003_v24 = vpop.f32.mrf.mxu1  ;;  %v2194_v56 = vunpack.c.l.b16 %v2116_v11  ;;  %v2134_v8 = vor.u32 %v2133_v47, %v2129_v38 }
 0x137   : > { %v1709_v20 = vadd.f32 %v1641_v61, %v1419_v35  ;;  %v1209_v35 = vrot.slane %v5196_v21, 5  ;;  %v5135_v61 = vld [vmem:[%s5324_s30 + $0xa8] sm:$0xff]  ;;  %v1004_v60 = vadd.f32 %v1003_v24, %v5641_v58 }
 0x138   : > { %4824 = vmatmul.msk.bf16.gmra.mxu0 %vm696_vm4, %v2211_v7  ;;  %v5197_v7 = vld [vmem:[%s5324_s30 + $0xb0] sm:$0x1] }
 0x139   : > { %v1353_v25 = vpop.f32.mrf.mxu2  ;;  %4614 = vmatmul.msk.bf16.gmra.mxu1 %vm696_vm4, %v5119_v3  ;;  %v5893_v30 = vadd.f32 %v2295_v50, %v1709_v20  ;;  %v1212_v23 = vrot.slane %v5197_v7, 5  ;;  %v4631_v20 = vrot.slane %v1072_v33, 9  ;;  %v1211_v52 = vrot.slane %v1209_v35, 4 }
 0x13a   : > { %v1420_v41 = vadd.f32 %v1353_v25, %v1001_v16  ;;  %v2193_v16 = vunpack.c.l.b16 %v2106_v9  ;;  %v4807_v25 = vld [vmem:[%s5324_s30 + $0xbc] sm:$0x1] }
 0x13b   : > { %v1213_v5 = vsel %vm5510_vm7, %v1211_v52, %v1212_v23  ;;  %v2137_v58 = vshll.u32 %v4807_v25, 16  ;;  %v4809_v52 = vld [vmem:[%s5324_s30 + $0xc4] sm:$0xf] }
 0x13c   : > { %v2212_v24 = vpack.c.b16 %v2194_v56, %v2193_v16  ;;  %v1252_v11 = vunpack.c.l.b16 %v1213_v5  ;;  %v1073_v16 = vld [vmem:[%s5324_s30 + $0xb4] sm:$0xe]  ;;  %v5199_v56 = vld [vmem:[%s5324_s30 + $0xb8] sm:$0xf]  ;;  %v2155_v5 = vshrl.u32 %v4809_v52, 16 }
 0x13d   : > { %v2297_v34 = vpop.f32.mrf.mxu0  ;;  %v1216_v25 = vrot.slane %v5199_v56, 5 }
 0x13e   : > { %v1643_v50 = vpop.f32.mrf.mxu3  ;;  %4647 = vmatmul.msk.bf16.gmra.mxu2 %vm696_vm4, %v1268_v14  ;;  %v1005_v3 = vpop.f32.mrf.mxu1  ;;  %v2124_v14 = vor.u32 %v2123_v19, %v2120_v27  ;;  %v2139_v27 = vrot.slane %v2137_v58, 5  ;;  %v4808_v19 = vld [vmem:[%s5324_s30 + $0xc0] sm:$0xf]  ;;  %v5200_v58 = vld [vmem:[%s5324_s30 + $0x14] sm:$0x1] }
 0x13f   : > { %v1710_v4 = vadd.f32 %v1643_v50, %v1420_v41  ;;  %v1210_v41 = vsel %vm5510_vm7, %v4631_v20, %v1209_v35  ;;  %v2135_v35 = vrot.slane %v2134_v8, 4  ;;  %v1006_v23 = vadd.f32 %v1005_v3, %v5658_v28 }
 0x140   : > { %v1251_v9 = vunpack.c.l.b16 %v1210_v41  ;;  %v2125_v50 = vrot.slane %v2124_v14, 4  ;;  %v2142_v3 = vshrl.u32 %v4808_v19, 16  ;;  %v2145_v14 = vshll.u32 %v4808_v19, 16  ;;  %v5136_v19 = vld [vmem:[%s5324_s30 + $0xb4] sm:$0xff] }
 0x141   : > { %v1356_v1 = vpop.f32.mrf.mxu2  ;;  %v5906_v51 = vadd.f32 %v2297_v34, %v1710_v4  ;;  %v5198_v4 = vld [vmem:[%s5324_s30 + $0x10] sm:$0xf]  ;;  %v2140_v28 = vsel %vm5336_vm3, %v2135_v35, %v2139_v27  ;;  %v2151_v41 = vshll.u32 %v4809_v52, 16  ;;  %v1218_v35 = vrot.slane %v1216_v25, 4  ;;  %v4828_v27 = vld [vmem:[%s5324_s30 + $0xc] sm:$0xe] }
 0x142   : > { %v1421_v21 = vadd.f32 %v1356_v1, %v1004_v60  ;;  %v1269_v60 = vpack.c.b16 %v1252_v11, %v1251_v9  ;;  %v5201_v9 = vld [vmem:[%s5324_s30 + $0xbc] sm:$0x1]  ;;  %v4844_v52 = vrot.slane %v4828_v27, 9 }
 0x143   : > { %4760 = vmatmul.msk.bf16.gmra.mxu3 %vm696_vm4, %v5135_v61  ;;  %v2453_v61 = vrot.slane %v5198_v4, 5  ;;  %v2144_v4 = vrot.slane %v2142_v3, 4 }
 0x145   : > { %v2300_v62 = vpop.f32.mrf.mxu0  ;;  %v2455_v8 = vrot.slane %v2453_v61, 4 }
 0x146   : > { %v1646_v33 = vpop.f32.mrf.mxu3  ;;  %v1008_v34 = vpop.f32.mrf.mxu1 }
 0x147   : > { %v1711_v7 = vadd.f32 %v1646_v33, %v1421_v21  ;;  %v2130_v21 = vsel %vm5336_vm3, %v2125_v50, %v2129_v38  ;;  %v4632_v33 = vrot.slane %v1073_v16, 9  ;;  %v1009_v56 = vadd.f32 %v1008_v34, %v5678_v53 }
 0x148   : > { %4825 = vmatmul.msk.bf16.gmra.mxu0 %vm696_vm4, %v2212_v24  ;;  %v2456_v24 = vrot.slane %v5200_v58, 5  ;;  %v2195_v38 = vunpack.c.l.b16 %v2130_v21  ;;  %v2153_v16 = vrot.slane %v2151_v41, 5  ;;  %v2157_v58 = vrot.slane %v2155_v5, 4  ;;  %v4810_v21 = vld [vmem:[%s5324_s30 + $0xc8] sm:$0x1] }
 0x149   : > { %v1358_v20 = vpop.f32.mrf.mxu2  ;;  %4615 = vmatmul.msk.bf16.gmra.mxu1 %vm696_vm4, %v5120_v48  ;;  %v5922_v1 = vadd.f32 %v2300_v62, %v1711_v7  ;;  %v1219_v62 = vrot.slane %v5201_v9, 5  ;;  %v2196_v7 = vunpack.c.l.b16 %v2140_v28  ;;  %v2454_v28 = vsel %vm5510_vm7, %v4844_v52, %v2453_v61  ;;  %v4990_v41 = vld [vmem:[%s5324_s30 + $0x18] sm:$0xf] }
 0x14a   : > { %v1422_v47 = vadd.f32 %v1358_v20, %v1006_v23  ;;  %v2147_v20 = vrot.slane %v2145_v14, 5  ;;  %v2565_v53 = vunpack.c.l.b16 %v2454_v28  ;;  %v2161_v27 = vshll.u32 %v4810_v21, 16 }
 0x14b   : > { %v1220_v14 = vsel %vm5510_vm7, %v1218_v35, %v1219_v62  ;;  %v2213_v5 = vpack.c.b16 %v2196_v7, %v2195_v38  ;;  %v3124_v62 = vshrl.u32 %v4990_v41, 16  ;;  %v3127_v35 = vshll.u32 %v4990_v41, 16 }
 0x14d   : > { %v2302_v48 = vpop.f32.mrf.mxu0  ;;  %v3126_v21 = vrot.slane %v3124_v62, 4 }
 0x14e   : > { %v1648_v11 = vpop.f32.mrf.mxu3  ;;  %4648 = vmatmul.msk.bf16.gmra.mxu2 %vm696_vm4, %v1269_v60  ;;  %v1010_v50 = vpop.f32.mrf.mxu1  ;;  %v1217_v60 = vsel %vm5510_vm7, %v4632_v33, %v1216_v25  ;;  %v5946_v25 = vld [vmem:[%s5324_s30 + $0x1c] sm:$0xf]  ;;  %v2158_v33 = vor.u32 %v2157_v58, %v2153_v16 }
 0x14f   : > { %v1712_v23 = vadd.f32 %v1648_v11, %v1422_v47  ;;  %v2457_v47 = vsel %vm5510_vm7, %v2455_v8, %v2456_v24  ;;  %v2148_v11 = vor.u32 %v2147_v20, %v2144_v4  ;;  %v5121_v24 = vld [vmem:[%s5324_s30 + $0xb4] sm:$0xff]  ;;  %v3137_v38 = vshrl.u32 %v5946_v25, 16 }
 0x150   : > { %v2566_v34 = vunpack.c.l.b16 %v2457_v47  ;;  %v1011_v4 = vadd.f32 %v1010_v50, %v5698_v17 }
 0x151   : > { %v1361_v9 = vpop.f32.mrf.mxu2  ;;  %v5950_v52 = vadd.f32 %v2302_v48, %v1712_v23  ;;  %v2149_v48 = vrot.slane %v2148_v11, 4  ;;  %v2159_v23 = vrot.slane %v2158_v33, 4  ;;  %v3139_v41 = vrot.slane %v3137_v38, 4 }
 0x152   : > { %v1423_v3 = vadd.f32 %v1361_v9, %v1009_v56  ;;  %v5948_v61 = vpack.c.b16 %v2566_v34, %v2565_v53  ;;  %v1253_v56 = vunpack.c.l.b16 %v1217_v60  ;;  %v1254_v9 = vunpack.c.l.b16 %v1220_v14 }
 0x153   : > { %4761 = vmatmul.msk.bf16.gmra.mxu3 %vm696_vm4, %v5136_v19  ;;  %7005 = vst [vmem:[#allocation2_spill] sm:$0xff] %v5950_v52  ;;  %v3133_v19 = vshll.u32 %v5946_v25, 16  ;;  %v2163_v60 = vrot.slane %v2161_v27, 5  ;;  %v3129_v14 = vrot.slane %v3127_v35, 5  ;;  %v2154_v17 = vsel %vm5336_vm3, %v2149_v48, %v2153_v16  ;;  %v5055_v48 = vld [vmem:[%s5324_s30 + $0x18] sm:$0xe] }
 0x154   : > { %v1270_v58 = vpack.c.b16 %v1254_v9, %v1253_v56  ;;  %v5137_v9 = vld [vmem:[%s5324_s30 + $0xc0] sm:$0xff]  ;;  %v2197_v16 = vunpack.c.l.b16 %v2154_v17 }
 0x155   : > { %v2305_v8 = vpop.f32.mrf.mxu0  ;;  %v3135_v34 = vrot.slane %v3133_v19, 5  ;;  %v2164_v50 = vsel %vm5336_vm3, %v2159_v23, %v2163_v60  ;;  %v3130_v27 = vor.u32 %v3129_v14, %v3126_v21  ;;  %v4993_v23 = vld [vmem:[%s5324_s30 + $0x24] sm:$0xf]  ;;  %v5976_v60 = vld [vmem:[%s5324_s30 + $0x28] sm:$0xf] }
 0x156   : > { %v1651_v28 = vpop.f32.mrf.mxu3  ;;  %v1013_v47 = vpop.f32.mrf.mxu1  ;;  %v2198_v35 = vunpack.c.l.b16 %v2164_v50 }
 0x157   : > { %v1713_v7 = vadd.f32 %v1651_v28, %v1423_v3  ;;  %v5961_v3 = vld [vmem:[%s5324_s30 + $0x20] sm:$0x1]  ;;  %v1014_v62 = vadd.f32 %v1013_v47, %v5721_v2  ;;  %v3131_v38 = vrot.slane %v3130_v27, 4  ;;  %v5202_v47 = vld [vmem:[%s5324_s30 + $0x1c] sm:$0xf] }
 0x158   : > { %4826 = vmatmul.msk.bf16.gmra.mxu0 %vm696_vm4, %v2213_v5  ;;  %v2460_v14 = vrot.slane %v5202_v47, 5  ;;  %v4829_v27 = vld [vmem:[%s5324_s30 + $0x18] sm:$0xe] }
 0x159   : > { %v1363_v20 = vpop.f32.mrf.mxu2  ;;  %4616 = vmatmul.msk.bf16.gmra.mxu1 %vm696_vm4, %v5121_v24  ;;  %v5958_v52 = vadd.f32 %v2305_v8, %v1713_v7  ;;  %v3140_v24 = vor.u32 %v3139_v41, %v3135_v34  ;;  %v3143_v8 = vshll.u32 %v5961_v3, 16  ;;  %v3136_v17 = vsel %vm5336_vm3, %v3131_v38, %v3135_v34 }
 0x15a   : > { %v1424_v53 = vadd.f32 %v1363_v20, %v1011_v4  ;;  %v2214_v20 = vpack.c.b16 %v2198_v35, %v2197_v16  ;;  %v3798_v34 = vrot.slane %v5961_v3, 5  ;;  %v5203_v16 = vld [vmem:[%s5324_s30 + $0x20] sm:$0x1]  ;;  %v4845_v38 = vrot.slane %v4829_v27, 9 }
 0x15b   : > { %v3141_v7 = vrot.slane %v3140_v24, 4  ;;  %v3145_v4 = vrot.slane %v3143_v8, 5  ;;  %v3148_v24 = vshrl.u32 %v4993_v23, 16  ;;  %v3151_v8 = vshll.u32 %v4993_v23, 16 }
 0x15c   : > { %v2463_v35 = vrot.slane %v5203_v16, 5  ;;  %v2461_v27 = vsel %vm5510_vm7, %v4845_v38, %v2460_v14  ;;  %v4996_v38 = vld [vmem:[%s5324_s30 + $0x30] sm:$0xf] }
 0x15d   : > { %v2307_v5 = vpop.f32.mrf.mxu0  ;;  %v3146_v50 = vsel %vm5336_vm3, %v3141_v7, %v3145_v4  ;;  %v2462_v7 = vrot.slane %v2460_v14, 4  ;;  %v3153_v3 = vrot.slane %v3151_v8, 5 }
 0x15e   : > { %v1653_v11 = vpop.f32.mrf.mxu3  ;;  %4649 = vmatmul.msk.bf16.gmra.mxu2 %vm696_vm4, %v1270_v58  ;;  %v1015_v33 = vpop.f32.mrf.mxu1  ;;  %v3795_v58 = vrot.slane %v5946_v25, 5  ;;  %v3510_v23 = vunpack.c.l.b16 %v3146_v50 }
 0x15f   : > { %v1714_v56 = vadd.f32 %v1653_v11, %v1424_v53  ;;  %v5071_v11 = vrot.slane %v5055_v48, 9  ;;  %v5138_v48 = vld [vmem:[%s5324_s30 + $0x18] sm:$0xff]  ;;  %v2464_v50 = vsel %vm5510_vm7, %v2462_v7, %v2463_v35  ;;  %v6016_v7 = vld [vmem:[%s5324_s30 + $0x34] sm:$0xf] }
 0x161   : > { %v1366_v28 = vpop.f32.mrf.mxu2  ;;  %v5978_v21 = vadd.f32 %v2307_v5, %v1714_v56  ;;  %v3157_v5 = vshll.u32 %v5976_v60, 16  ;;  %v3161_v56 = vshrl.u32 %v5976_v60, 16 }
 0x162   : > { %v1425_v19 = vadd.f32 %v1366_v28, %v1014_v62  ;;  %v3797_v62 = vrot.slane %v3795_v58, 4 }
 0x163   : > { %4762 = vmatmul.msk.bf16.gmra.mxu3 %vm696_vm4, %v5137_v9  ;;  %v1016_v9 = vadd.f32 %v1015_v33, %v5741_v29  ;;  %v3150_v33 = vrot.slane %v3148_v24, 4  ;;  %v5999_v47 = vrot.slane %v3157_v5, 5 }
 0x165   : > { %v2310_v2 = vpop.f32.mrf.mxu0  ;;  %v3154_v5 = vor.u32 %v3153_v3, %v3150_v33  ;;  %v5056_v33 = vld [vmem:[%s5324_s30 + $0x24] sm:$0xe] }
 0x166   : > { %v1656_v53 = vpop.f32.mrf.mxu3  ;;  %v1018_v41 = vpop.f32.mrf.mxu1 }
 0x167   : > { %v1715_v25 = vadd.f32 %v1656_v53, %v1425_v19  ;;  %v3509_v19 = vunpack.c.l.b16 %v3136_v17  ;;  %v3163_v53 = vrot.slane %v3161_v56, 4  ;;  %v1019_v14 = vadd.f32 %v1018_v41, %v5623_v37 }
 0x168   : > { %4827 = vmatmul.msk.bf16.gmra.mxu0 %vm696_vm4, %v2214_v20  ;;  %v3796_v20 = vsel %vm5510_vm7, %v5071_v11, %v3795_v58  ;;  %v3802_v37 = vrot.slane %v5976_v60, 5 }
 0x169   : > { %v1368_v28 = vpop.f32.mrf.mxu2  ;;  %4861 = vmatmul.msk.bf16.vlgmr.msra.gmra.mxu1 %vm696_vm4, %v5948_v61  ;;  %v5997_v29 = vadd.f32 %v2310_v2, %v1715_v25  ;;  %v3799_v61 = vsel %vm5510_vm7, %v3797_v62, %v3798_v34  ;;  %v3541_v2 = vpack.c.b16 %v3510_v23, %v3509_v19  ;;  %v3907_v11 = vunpack.c.l.b16 %v3796_v20 }
 0x16a   : > { %v1426_v4 = vadd.f32 %v1368_v28, %v1016_v9  ;;  %v6008_v9 = vld [vmem:[%s5324_s30 + $0x2c] sm:$0x1]  ;;  %v3908_v8 = vunpack.c.l.b16 %v3799_v61  ;;  %v3164_v56 = vor.u32 %v3163_v53, %v5999_v47  ;;  %v2567_v62 = vunpack.c.l.b16 %v2461_v27 }
 0x16b   : > { %v2568_v34 = vunpack.c.l.b16 %v2464_v50  ;;  %v3167_v16 = vshll.u32 %v6008_v9, 16  ;;  %v3172_v53 = vshrl.u32 %v4996_v38, 16  ;;  %v3175_v61 = vshll.u32 %v4996_v38, 16 }
 0x16c   : > { %v3939_v19 = vpack.c.b16 %v3908_v8, %v3907_v11  ;;  %v3181_v27 = vshll.u32 %v6016_v7, 16  ;;  %v3185_v50 = vshrl.u32 %v6016_v7, 16  ;;  %v5204_v11 = vld [vmem:[%s5324_s30 + $0x28] sm:$0xf]  ;;  %v3805_v60 = vrot.slane %v6008_v9, 5 }
 0x16d   : > { %v2312_v17 = vpop.f32.mrf.mxu0  ;;  %v2598_v23 = vpack.c.b16 %v2568_v34, %v2567_v62  ;;  %v3169_v20 = vrot.slane %v3167_v16, 5  ;;  %v2467_v8 = vrot.slane %v5204_v11, 5  ;;  %v5072_v62 = vrot.slane %v5056_v33, 9  ;;  %v5139_v11 = vld [vmem:[%s5324_s30 + $0x24] sm:$0xff] }
 0x16e   : > { %v1658_v58 = vpop.f32.mrf.mxu3  ;;  %4974 = vmatmul.msk.bf16.vlgmr.msra.gmra.mxu2 %vm696_vm4, %v5138_v48  ;;  %v1020_v24 = vpop.f32.mrf.mxu1  ;;  %v3165_v48 = vrot.slane %v3164_v56, 4  ;;  %v3177_v33 = vrot.slane %v3175_v61, 5  ;;  %v6037_v9 = vrot.slane %v3181_v27, 5 }
 0x16f   : > { %v1716_v25 = vadd.f32 %v1658_v58, %v1426_v4  ;;  %v3155_v4 = vrot.slane %v3154_v5, 4  ;;  %v5205_v5 = vld [vmem:[%s5324_s30 + $0x2c] sm:$0x1] }
 0x170   : > { %v2470_v56 = vrot.slane %v5205_v5, 5  ;;  %v3170_v16 = vsel %vm5336_vm3, %v3165_v48, %v3169_v20  ;;  %v3803_v20 = vsel %vm5510_vm7, %v5072_v62, %v3802_v37 }
 0x171   : > { %v1371_v35 = vpop.f32.mrf.mxu2  ;;  %v6021_v41 = vadd.f32 %v2312_v17, %v1716_v25  ;;  %v4830_v17 = vld [vmem:[%s5324_s30 + $0x24] sm:$0xe]  ;;  %v1021_v25 = vadd.f32 %v1020_v24, %v5644_v63  ;;  %v3160_v34 = vsel %vm5336_vm3, %v3155_v4, %v5999_v47  ;;  %v2469_v24 = vrot.slane %v2467_v8, 4 }
 0x172   : > { %v1427_v28 = vadd.f32 %v1371_v35, %v1019_v14  ;;  %v3804_v35 = vrot.slane %v3802_v37, 4  ;;  %v4846_v63 = vrot.slane %v4830_v17, 9  ;;  %v3511_v47 = vunpack.c.l.b16 %v3160_v34 }
 0x173   : > { %5039 = vmatmul.msk.bf16.vlgmr.msra.gmra.mxu3 %vm696_vm4, %v3541_v2  ;;  %7006 = vst [vmem:[#allocation3_spill] sm:$0xff] %v6021_v41  ;;  %v3512_v4 = vunpack.c.l.b16 %v3170_v16  ;;  %v6043_v41 = vld [vmem:[%s5324_s30 + $0x38] sm:$0x1] }
 0x174   : > { %v3191_v37 = vshll.u32 %v6043_v41, 16 }
 0x175   : > { %v2315_v3 = vpop.f32.mrf.mxu0  ;;  %v3542_v17 = vpack.c.b16 %v3512_v4, %v3511_v47  ;;  %v5206_v4 = vld [vmem:[%s5324_s30 + $0x34] sm:$0xf] }
 0x176   : > { %v1661_v58 = vpop.f32.mrf.mxu3  ;;  %v1023_v2 = vpop.f32.mrf.mxu1 }
 0x177   : > { %v1717_v14 = vadd.f32 %v1661_v58, %v1427_v28  ;;  %v3174_v28 = vrot.slane %v3172_v53, 4  ;;  %v3187_v58 = vrot.slane %v3185_v50, 4  ;;  %v2471_v50 = vsel %vm5510_vm7, %v2469_v24, %v2470_v56  ;;  %v6062_v24 = vld [vmem:[%s5324_s30 + $0x40] sm:$0xf] }
 0x178   : > { %5088 = vmatmul.msk.bf16.vlgmr.msra.gmra.mxu0 %vm696_vm4, %v3939_v19 }
 0x179   : > { %v1373_v38 = vpop.f32.mrf.mxu2  ;;  %4862 = vmatmul.msk.bf16.gmra.mxu1 %vm696_vm4, %v2598_v23  ;;  %v6040_v5 = vadd.f32 %v2315_v3, %v1717_v14  ;;  %v3806_v23 = vsel %vm5510_vm7, %v3804_v35, %v3805_v60  ;;  %v3178_v53 = vor.u32 %v3177_v33, %v3174_v28  ;;  %v2468_v3 = vsel %vm5510_vm7, %v4846_v63, %v2467_v8 }
 0x17a   : > { %v1428_v19 = vadd.f32 %v1373_v38, %v1021_v25  ;;  %v3188_v14 = vor.u32 %v3187_v58, %v6037_v9  ;;  %v1024_v60 = vadd.f32 %v1023_v2, %v5661_v22  ;;  %v3909_v25 = vunpack.c.l.b16 %v3803_v20  ;;  %v5057_v58 = vld [vmem:[%s5324_s30 + $0x30] sm:$0xe] }
 0x17b   : > { %v3910_v34 = vunpack.c.l.b16 %v3806_v23  ;;  %v2569_v35 = vunpack.c.l.b16 %v2468_v3  ;;  %v2570_v8 = vunpack.c.l.b16 %v2471_v50  ;;  %v3179_v28 = vrot.slane %v3178_v53, 4 }
 0x17c   : > { %v3189_v56 = vrot.slane %v3188_v14, 4  ;;  %v3193_v33 = vrot.slane %v3191_v37, 5  ;;  %v3809_v63 = vrot.slane %v6016_v7, 5  ;;  %v2474_v20 = vrot.slane %v5206_v4, 5  ;;  %v4831_v7 = vld [vmem:[%s5324_s30 + $0x30] sm:$0xe] }
 0x17d   : > { %v2317_v48 = vpop.f32.mrf.mxu0  ;;  %v2599_v47 = vpack.c.b16 %v2570_v8, %v2569_v35  ;;  %v5073_v50 = vrot.slane %v5057_v58, 9 }
 0x17e   : > { %v1663_v61 = vpop.f32.mrf.mxu3  ;;  %4975 = vmatmul.msk.bf16.gmra.mxu2 %vm696_vm4, %v5139_v11  ;;  %v1025_v27 = vpop.f32.mrf.mxu1  ;;  %v4999_v11 = vld [vmem:[%s5324_s30 + $0x3c] sm:$0xf]  ;;  %v3194_v3 = vsel %vm5336_vm3, %v3189_v56, %v3193_v33  ;;  %v5140_v33 = vld [vmem:[%s5324_s30 + $0x30] sm:$0xff] }
 0x17f   : > { %v1718_v62 = vadd.f32 %v1663_v61, %v1428_v19  ;;  %v3940_v19 = vpack.c.b16 %v3910_v34, %v3909_v25  ;;  %v3184_v61 = vsel %vm5336_vm3, %v3179_v28, %v6037_v9  ;;  %v3196_v14 = vshrl.u32 %v4999_v11, 16  ;;  %v5207_v34 = vld [vmem:[%s5324_s30 + $0x38] sm:$0x1] }
 0x180   : > { %v3811_v25 = vrot.slane %v3809_v63, 4  ;;  %v3812_v9 = vrot.slane %v6043_v41, 5  ;;  %v3513_v8 = vunpack.c.l.b16 %v3184_v61  ;;  %v2476_v28 = vrot.slane %v2474_v20, 4 }
 0x181   : > { %v1376_v16 = vpop.f32.mrf.mxu2  ;;  %v6064_v22 = vadd.f32 %v2317_v48, %v1718_v62  ;;  %v3199_v48 = vshll.u32 %v4999_v11, 16  ;;  %v3205_v62 = vshll.u32 %v6062_v24, 16  ;;  %v3514_v58 = vunpack.c.l.b16 %v3194_v3 }
 0x182   : > { %v1429_v38 = vadd.f32 %v1376_v16, %v1024_v60  ;;  %v1026_v60 = vadd.f32 %v1025_v27, %v5682_v55  ;;  %v2477_v16 = vrot.slane %v5207_v34, 5  ;;  %v3810_v11 = vsel %vm5510_vm7, %v5073_v50, %v3809_v63 }
 0x183   : > { %5040 = vmatmul.msk.bf16.gmra.mxu3 %vm696_vm4, %v3542_v17  ;;  %v3209_v17 = vshrl.u32 %v6062_v24, 16  ;;  %v3198_v55 = vrot.slane %v3196_v14, 4  ;;  %v3201_v27 = vrot.slane %v3199_v48, 5  ;;  %v6085_v41 = vrot.slane %v3205_v62, 5 }
 0x184   : > { %v2478_v3 = vsel %vm5510_vm7, %v2476_v28, %v2477_v16  ;;  %v3911_v50 = vunpack.c.l.b16 %v3810_v11  ;;  %v5058_v11 = vld [vmem:[%s5324_s30 + $0x3c] sm:$0xe] }
 0x185   : > { %v2320_v2 = vpop.f32.mrf.mxu0  ;;  %v3211_v4 = vrot.slane %v3209_v17, 4  ;;  %v3202_v62 = vor.u32 %v3201_v27, %v3198_v55 }
 0x186   : > { %v1666_v23 = vpop.f32.mrf.mxu3  ;;  %v1028_v53 = vpop.f32.mrf.mxu1 }
 0x187   : > { %v1719_v37 = vadd.f32 %v1666_v23, %v1429_v38  ;;  %v4847_v38 = vrot.slane %v4831_v7, 9  ;;  %v6094_v7 = vld [vmem:[%s5324_s30 + $0x44] sm:$0x1]  ;;  %v3212_v17 = vor.u32 %v3211_v4, %v6085_v41  ;;  %v3203_v28 = vrot.slane %v3202_v62, 4 }
 0x188   : > { %5089 = vmatmul.msk.bf16.gmra.mxu0 %vm696_vm4, %v3940_v19 }
 0x189   : > { %v1378_v35 = vpop.f32.mrf.mxu2  ;;  %4863 = vmatmul.msk.bf16.gmra.mxu1 %vm696_vm4, %v2599_v47  ;;  %v6083_v19 = vadd.f32 %v2320_v2, %v1719_v37  ;;  %v3813_v47 = vsel %vm5510_vm7, %v3811_v25, %v3812_v9  ;;  %v2475_v61 = vsel %vm5510_vm7, %v4847_v38, %v2474_v20  ;;  %v3543_v2 = vpack.c.b16 %v3514_v58, %v3513_v8  ;;  %v6102_v38 = vld [vmem:[%s5324_s30 + $0x4c] sm:$0xf] }
 0x18a   : > { %v1430_v56 = vadd.f32 %v1378_v35, %v1026_v60  ;;  %v3912_v48 = vunpack.c.l.b16 %v3813_v47  ;;  %v1029_v20 = vadd.f32 %v1028_v53, %v5705_v26  ;;  %v2571_v60 = vunpack.c.l.b16 %v2475_v61  ;;  %v5002_v35 = vld [vmem:[%s5324_s30 + $0x48] sm:$0xf] }
 0x18b   : > { %v2572_v25 = vunpack.c.l.b16 %v2478_v3  ;;  %v3215_v9 = vshll.u32 %v6094_v7, 16  ;;  %v3816_v26 = vrot.slane %v6062_v24, 5  ;;  %v3220_v27 = vshrl.u32 %v5002_v35, 16 }
 0x18c   : > { %v3941_v8 = vpack.c.b16 %v3912_v48, %v3911_v50  ;;  %v3223_v4 = vshll.u32 %v5002_v35, 16  ;;  %v3229_v47 = vshll.u32 %v6102_v38, 16  ;;  %v3233_v61 = vshrl.u32 %v6102_v38, 16  ;;  %v5209_v48 = vld [vmem:[%s5324_s30 + $0x44] sm:$0x1] }
 0x18d   : > { %v2322_v23 = vpop.f32.mrf.mxu0  ;;  %v3217_v58 = vrot.slane %v3215_v9, 5  ;;  %v2484_v62 = vrot.slane %v5209_v48, 5  ;;  %v3819_v24 = vrot.slane %v6094_v7, 5  ;;  %v3818_v9 = vrot.slane %v3816_v26, 4  ;;  %v6129_v48 = vld [vmem:[%s5324_s30 + $0x50] sm:$0x1] }
 0x18e   : > { %v1668_v63 = vpop.f32.mrf.mxu3  ;;  %4976 = vmatmul.msk.bf16.gmra.mxu2 %vm696_vm4, %v5140_v33  ;;  %v1030_v14 = vpop.f32.mrf.mxu1  ;;  %v2600_v33 = vpack.c.b16 %v2572_v25, %v2571_v60  ;;  %v3208_v60 = vsel %vm5336_vm3, %v3203_v28, %v6085_v41  ;;  %v3225_v35 = vrot.slane %v3223_v4, 5  ;;  %v6123_v7 = vrot.slane %v3229_v47, 5 }
 0x18f   : > { %v1720_v37 = vadd.f32 %v1668_v63, %v1430_v56  ;;  %v3213_v56 = vrot.slane %v3212_v17, 4  ;;  %v3515_v41 = vunpack.c.l.b16 %v3208_v60 }
 0x191   : > { %v1381_v34 = vpop.f32.mrf.mxu2  ;;  %v6107_v53 = vadd.f32 %v2322_v23, %v1720_v37  ;;  %v4832_v23 = vld [vmem:[%s5324_s30 + $0x3c] sm:$0xe]  ;;  %v1031_v37 = vadd.f32 %v1030_v14, %v5723_v43  ;;  %v3218_v25 = vsel %vm5336_vm3, %v3213_v56, %v3217_v58 }
 0x192   : > { %v1431_v16 = vadd.f32 %v1381_v34, %v1029_v20  ;;  %v5074_v20 = vrot.slane %v5058_v11, 9  ;;  %v3235_v11 = vrot.slane %v3233_v61, 4  ;;  %v4848_v43 = vrot.slane %v4832_v23, 9 }
 0x193   : > { %5041 = vmatmul.msk.bf16.gmra.mxu3 %vm696_vm4, %v3543_v2  ;;  %v5208_v2 = vld [vmem:[%s5324_s30 + $0x40] sm:$0xf]  ;;  %v3516_v28 = vunpack.c.l.b16 %v3218_v25 }
 0x194   : > { %v2481_v50 = vrot.slane %v5208_v2, 5  ;;  %v3817_v58 = vsel %vm5510_vm7, %v5074_v20, %v3816_v26  ;;  %v3239_v26 = vshll.u32 %v6129_v48, 16 }
 0x195   : > { %v2325_v55 = vpop.f32.mrf.mxu0  ;;  %v3544_v23 = vpack.c.b16 %v3516_v28, %v3515_v41  ;;  %v5210_v28 = vld [vmem:[%s5324_s30 + $0x4c] sm:$0xf] }
 0x196   : > { %v1671_v3 = vpop.f32.mrf.mxu3  ;;  %v1033_v63 = vpop.f32.mrf.mxu1  ;;  %v2483_v14 = vrot.slane %v2481_v50, 4 }
 0x197   : > { %v1721_v17 = vadd.f32 %v1671_v3, %v1431_v16  ;;  %v3222_v16 = vrot.slane %v3220_v27, 4  ;;  %v5141_v3 = vld [vmem:[%s5324_s30 + $0x3c] sm:$0xff] }
 0x198   : > { %5090 = vmatmul.msk.bf16.gmra.mxu0 %vm696_vm4, %v3941_v8  ;;  %v2485_v61 = vsel %vm5510_vm7, %v2483_v14, %v2484_v62  ;;  %v6148_v14 = vld [vmem:[%s5324_s30 + $0x58] sm:$0xf] }
 0x199   : > { %v1383_v34 = vpop.f32.mrf.mxu2  ;;  %4864 = vmatmul.msk.bf16.gmra.mxu1 %vm696_vm4, %v2600_v33  ;;  %v6126_v2 = vadd.f32 %v2325_v55, %v1721_v17  ;;  %v3820_v33 = vsel %vm5510_vm7, %v3818_v9, %v3819_v24  ;;  %v3226_v27 = vor.u32 %v3225_v35, %v3222_v16  ;;  %v2482_v55 = vsel %vm5510_vm7, %v4848_v43, %v2481_v50 }
 0x19a   : > { %v1432_v8 = vadd.f32 %v1383_v34, %v1031_v37  ;;  %v3236_v17 = vor.u32 %v3235_v11, %v6123_v7  ;;  %v1034_v24 = vadd.f32 %v1033_v63, %v5744_v40  ;;  %v3913_v37 = vunpack.c.l.b16 %v3817_v58  ;;  %v5059_v11 = vld [vmem:[%s5324_s30 + $0x48] sm:$0xe] }
 0x19b   : > { %v3914_v60 = vunpack.c.l.b16 %v3820_v33  ;;  %v2573_v9 = vunpack.c.l.b16 %v2482_v55  ;;  %v2574_v50 = vunpack.c.l.b16 %v2485_v61  ;;  %v3227_v16 = vrot.slane %v3226_v27, 4 }
 0x19c   : > { %v3237_v62 = vrot.slane %v3236_v17, 4  ;;  %v3241_v35 = vrot.slane %v3239_v26, 5  ;;  %v3823_v43 = vrot.slane %v6102_v38, 5  ;;  %v2488_v58 = vrot.slane %v5210_v28, 5  ;;  %v4833_v38 = vld [vmem:[%s5324_s30 + $0x48] sm:$0xe] }
 0x19d   : > { %v2327_v56 = vpop.f32.mrf.mxu0  ;;  %v2601_v41 = vpack.c.b16 %v2574_v50, %v2573_v9  ;;  %v5075_v61 = vrot.slane %v5059_v11, 9 }
 0x19e   : > { %v1673_v4 = vpop.f32.mrf.mxu3  ;;  %4977 = vmatmul.msk.bf16.gmra.mxu2 %vm696_vm4, %v5141_v3  ;;  %v1035_v47 = vpop.f32.mrf.mxu1  ;;  %v5005_v3 = vld [vmem:[%s5324_s30 + $0x54] sm:$0xf]  ;;  %v3242_v55 = vsel %vm5336_vm3, %v3237_v62, %v3241_v35  ;;  %v5142_v35 = vld [vmem:[%s5324_s30 + $0x48] sm:$0xff] }
 0x19f   : > { %v1722_v20 = vadd.f32 %v1673_v4, %v1432_v8  ;;  %v3942_v8 = vpack.c.b16 %v3914_v60, %v3913_v37  ;;  %v3232_v4 = vsel %vm5336_vm3, %v3227_v16, %v6123_v7  ;;  %v3244_v17 = vshrl.u32 %v5005_v3, 16  ;;  %v5211_v60 = vld [vmem:[%s5324_s30 + $0x50] sm:$0x1] }
 0x1a0   : > { %v3825_v37 = vrot.slane %v3823_v43, 4  ;;  %v3826_v7 = vrot.slane %v6129_v48, 5  ;;  %v3517_v50 = vunpack.c.l.b16 %v3232_v4  ;;  %v2490_v16 = vrot.slane %v2488_v58, 4 }
 0x1a1   : > { %v1386_v25 = vpop.f32.mrf.mxu2  ;;  %v6150_v40 = vadd.f32 %v2327_v56, %v1722_v20  ;;  %v3247_v56 = vshll.u32 %v5005_v3, 16  ;;  %v3253_v20 = vshll.u32 %v6148_v14, 16  ;;  %v3518_v11 = vunpack.c.l.b16 %v3242_v55 }
 0x1a2   : > { %v1433_v34 = vadd.f32 %v1386_v25, %v1034_v24  ;;  %v1036_v24 = vadd.f32 %v1035_v47, %v5759_v10  ;;  %v2491_v25 = vrot.slane %v5211_v60, 5  ;;  %v3824_v3 = vsel %vm5510_vm7, %v5075_v61, %v3823_v43 }
 0x1a3   : > { %5042 = vmatmul.msk.bf16.gmra.mxu3 %vm696_vm4, %v3544_v23  ;;  %v3257_v23 = vshrl.u32 %v6148_v14, 16  ;;  %v3246_v10 = vrot.slane %v3244_v17, 4  ;;  %v3249_v47 = vrot.slane %v3247_v56, 5  ;;  %v6171_v48 = vrot.slane %v3253_v20, 5 }
 0x1a4   : > { %v2492_v55 = vsel %vm5510_vm7, %v2490_v16, %v2491_v25  ;;  %v3915_v61 = vunpack.c.l.b16 %v3824_v3  ;;  %v5060_v3 = vld [vmem:[%s5324_s30 + $0x54] sm:$0xe] }
 0x1a5   : > { %v2330_v63 = vpop.f32.mrf.mxu0  ;;  %v3259_v28 = vrot.slane %v3257_v23, 4  ;;  %v3250_v20 = vor.u32 %v3249_v47, %v3246_v10 }
 0x1a6   : > { %v1676_v33 = vpop.f32.mrf.mxu3  ;;  %v1038_v27 = vpop.f32.mrf.mxu1 }
 0x1a7   : > { %v1723_v26 = vadd.f32 %v1676_v33, %v1433_v34  ;;  %v4849_v34 = vrot.slane %v4833_v38, 9  ;;  %v6180_v38 = vld [vmem:[%s5324_s30 + $0x5c] sm:$0x1]  ;;  %v3260_v23 = vor.u32 %v3259_v28, %v6171_v48  ;;  %v3251_v16 = vrot.slane %v3250_v20, 4 }
 0x1a8   : > { %5091 = vmatmul.msk.bf16.gmra.mxu0 %vm696_vm4, %v3942_v8 }
 0x1a9   : > { %v1388_v9 = vpop.f32.mrf.mxu2  ;;  %4865 = vmatmul.msk.bf16.gmra.mxu1 %vm696_vm4, %v2601_v41  ;;  %v6169_v8 = vadd.f32 %v2330_v63, %v1723_v26  ;;  %v3827_v41 = vsel %vm5510_vm7, %v3825_v37, %v3826_v7  ;;  %v2489_v4 = vsel %vm5510_vm7, %v4849_v34, %v2488_v58  ;;  %v3545_v63 = vpack.c.b16 %v3518_v11, %v3517_v50  ;;  %v6188_v34 = vld [vmem:[%s5324_s30 + $0x64] sm:$0xf] }
 0x1aa   : > { %v1434_v62 = vadd.f32 %v1388_v9, %v1036_v24  ;;  %v3916_v56 = vunpack.c.l.b16 %v3827_v41  ;;  %v1039_v58 = vadd.f32 %v1038_v27, %v5635_v49  ;;  %v2575_v24 = vunpack.c.l.b16 %v2489_v4  ;;  %v5008_v9 = vld [vmem:[%s5324_s30 + $0x60] sm:$0xf] }
 0x1ab   : > { %v2576_v37 = vunpack.c.l.b16 %v2492_v55  ;;  %v3263_v7 = vshll.u32 %v6180_v38, 16  ;;  %v3830_v49 = vrot.slane %v6148_v14, 5  ;;  %v3268_v47 = vshrl.u32 %v5008_v9, 16 }
 0x1ac   : > { %v3943_v50 = vpack.c.b16 %v3916_v56, %v3915_v61  ;;  %v3271_v28 = vshll.u32 %v5008_v9, 16  ;;  %v3277_v41 = vshll.u32 %v6188_v34, 16  ;;  %v3281_v4 = vshrl.u32 %v6188_v34, 16  ;;  %v5213_v56 = vld [vmem:[%s5324_s30 + $0x5c] sm:$0x1] }
 0x1ad   : > { %v2332_v33 = vpop.f32.mrf.mxu0  ;;  %v3265_v11 = vrot.slane %v3263_v7, 5  ;;  %v2498_v20 = vrot.slane %v5213_v56, 5  ;;  %v3833_v14 = vrot.slane %v6180_v38, 5  ;;  %v3832_v7 = vrot.slane %v3830_v49, 4 }
 0x1ae   : > { %v1678_v43 = vpop.f32.mrf.mxu3  ;;  %4978 = vmatmul.msk.bf16.gmra.mxu2 %vm696_vm4, %v5142_v35  ;;  %v1040_v17 = vpop.f32.mrf.mxu1  ;;  %v2602_v35 = vpack.c.b16 %v2576_v37, %v2575_v24  ;;  %v3256_v24 = vsel %vm5336_vm3, %v3251_v16, %v6171_v48  ;;  %v3273_v9 = vrot.slane %v3271_v28, 5  ;;  %v3279_v38 = vrot.slane %v3277_v41, 5  ;;  %v6213_v16 = vld [vmem:[%s5324_s30 + $0x68] sm:$0x1] }
 0x1af   : > { %v1724_v26 = vadd.f32 %v1678_v43, %v1434_v62  ;;  %v3261_v62 = vrot.slane %v3260_v23, 4  ;;  %v3519_v56 = vunpack.c.l.b16 %v3256_v24 }
 0x1b1   : > { %v1391_v60 = vpop.f32.mrf.mxu2  ;;  %v6193_v27 = vadd.f32 %v2332_v33, %v1724_v26  ;;  %v4834_v33 = vld [vmem:[%s5324_s30 + $0x54] sm:$0xe]  ;;  %v1041_v26 = vadd.f32 %v1040_v17, %v5654_v0  ;;  %v3266_v37 = vsel %vm5336_vm3, %v3261_v62, %v3265_v11 }
 0x1b2   : > { %v1435_v25 = vadd.f32 %v1391_v60, %v1039_v58  ;;  %v5076_v58 = vrot.slane %v5060_v3, 9  ;;  %v3283_v3 = vrot.slane %v3281_v4, 4  ;;  %v3520_v48 = vunpack.c.l.b16 %v3266_v37 }
 0x1b3   : > { %5043 = vmatmul.msk.bf16.gmra.mxu3 %vm696_vm4, %v3545_v63  ;;  %7007 = vst [vmem:[#allocation4_spill] sm:$0xff] %v6193_v27  ;;  %v5212_v63 = vld [vmem:[%s5324_s30 + $0x58] sm:$0xf] }
 0x1b4   : > { %v2495_v61 = vrot.slane %v5212_v63, 5  ;;  %v4850_v63 = vrot.slane %v4834_v33, 9  ;;  %v3831_v62 = vsel %vm5510_vm7, %v5076_v58, %v3830_v49  ;;  %v3284_v4 = vor.u32 %v3283_v3, %v3279_v38 }
 0x1b5   : > { %v2335_v10 = vpop.f32.mrf.mxu0  ;;  %v3546_v58 = vpack.c.b16 %v3520_v48, %v3519_v56  ;;  %v3917_v33 = vunpack.c.l.b16 %v3831_v62 }
 0x1b6   : > { %v1681_v55 = vpop.f32.mrf.mxu3  ;;  %v1043_v43 = vpop.f32.mrf.mxu1  ;;  %v2497_v0 = vrot.slane %v2495_v61, 4 }
 0x1b7   : > { %v1725_v23 = vadd.f32 %v1681_v55, %v1435_v25  ;;  %v3270_v25 = vrot.slane %v3268_v47, 4 }
 0x1b8   : > { %5092 = vmatmul.msk.bf16.gmra.mxu0 %vm696_vm4, %v3943_v50  ;;  %v5143_v50 = vld [vmem:[%s5324_s30 + $0x54] sm:$0xff]  ;;  %v2499_v41 = vsel %vm5510_vm7, %v2497_v0, %v2498_v20  ;;  %v3837_v0 = vrot.slane %v6188_v34, 5  ;;  %v5215_v34 = vld [vmem:[%s5324_s30 + $0x68] sm:$0x1] }
 0x1b9   : > { %v1393_v60 = vpop.f32.mrf.mxu2  ;;  %4866 = vmatmul.msk.bf16.gmra.mxu1 %vm696_vm4, %v2602_v35  ;;  %v6210_v17 = vadd.f32 %v2335_v10, %v1725_v23  ;;  %v3834_v35 = vsel %vm5510_vm7, %v3832_v7, %v3833_v14  ;;  %v3274_v11 = vor.u32 %v3273_v9, %v3270_v25  ;;  %v2496_v10 = vsel %vm5510_vm7, %v4850_v63, %v2495_v61  ;;  %v5011_v9 = vld [vmem:[%s5324_s30 + $0x6c] sm:$0xf]  ;;  %v5061_v63 = vld [vmem:[%s5324_s30 + $0x60] sm:$0xe] }
 0x1ba   : > { %v1436_v55 = vadd.f32 %v1393_v60, %v1041_v26  ;;  %v3287_v23 = vshll.u32 %v6213_v16, 16  ;;  %v1044_v14 = vadd.f32 %v1043_v43, %v5675_v39  ;;  %v3918_v26 = vunpack.c.l.b16 %v3834_v35 }
 0x1bb   : > { %v2577_v37 = vunpack.c.l.b16 %v2496_v10  ;;  %v2578_v7 = vunpack.c.l.b16 %v2499_v41  ;;  %v3275_v61 = vrot.slane %v3274_v11, 4  ;;  %v3285_v25 = vrot.slane %v3284_v4, 4  ;;  %v5214_v11 = vld [vmem:[%s5324_s30 + $0x64] sm:$0xf] }
 0x1bc   : > { %v3289_v20 = vrot.slane %v3287_v23, 5  ;;  %v3944_v3 = vpack.c.b16 %v3918_v26, %v3917_v33  ;;  %v3292_v10 = vshrl.u32 %v5011_v9, 16  ;;  %v3295_v4 = vshll.u32 %v5011_v9, 16 }
 0x1bd   : > { %v2337_v27 = vpop.f32.mrf.mxu0  ;;  %v2603_v43 = vpack.c.b16 %v2578_v7, %v2577_v37  ;;  %v3280_v62 = vsel %vm5336_vm3, %v3275_v61, %v3279_v38  ;;  %v3839_v37 = vrot.slane %v3837_v0, 4  ;;  %v3840_v7 = vrot.slane %v6213_v16, 5  ;;  %v5144_v61 = vld [vmem:[%s5324_s30 + $0x60] sm:$0xff] }
 0x1be   : > { %v1683_v47 = vpop.f32.mrf.mxu3  ;;  %4979 = vmatmul.msk.bf16.gmra.mxu2 %vm696_vm4, %v5143_v50  ;;  %v1045_v28 = vpop.f32.mrf.mxu1  ;;  %v3290_v35 = vsel %vm5336_vm3, %v3285_v25, %v3289_v20  ;;  %v3521_v26 = vunpack.c.l.b16 %v3280_v62 }
 0x1bf   : > { %v1726_v49 = vadd.f32 %v1683_v47, %v1436_v55  ;;  %v6229_v55 = vld [vmem:[%s5324_s30 + $0x70] sm:$0xf]  ;;  %v2502_v47 = vrot.slane %v5214_v11, 5  ;;  %v1046_v38 = vadd.f32 %v1045_v28, %v5694_v6  ;;  %v6254_v28 = vld [vmem:[%s5324_s30 + $0x74] sm:$0x1]  ;;  %v3841_v16 = vsel %vm5510_vm7, %v3839_v37, %v3840_v7 }
 0x1c0   : > { %v3301_v23 = vshll.u32 %v6229_v55, 16 }
 0x1c1   : > { %v1396_v24 = vpop.f32.mrf.mxu2  ;;  %v6231_v50 = vadd.f32 %v2337_v27, %v1726_v49  ;;  %v4835_v27 = vld [vmem:[%s5324_s30 + $0x60] sm:$0xe]  ;;  %v3305_v49 = vshrl.u32 %v6229_v55, 16  ;;  %v2504_v20 = vrot.slane %v2502_v47, 4 }
 0x1c2   : > { %v1437_v60 = vadd.f32 %v1396_v24, %v1044_v14  ;;  %v5077_v14 = vrot.slane %v5061_v63, 9  ;;  %v3522_v24 = vunpack.c.l.b16 %v3290_v35  ;;  %v4851_v25 = vrot.slane %v4835_v27, 9 }
 0x1c3   : > { %5044 = vmatmul.msk.bf16.gmra.mxu3 %vm696_vm4, %v3546_v58  ;;  %v2505_v58 = vrot.slane %v5215_v34, 5  ;;  %v6251_v11 = vrot.slane %v3301_v23, 5  ;;  %v3307_v6 = vrot.slane %v3305_v49, 4  ;;  %v3311_v23 = vshll.u32 %v6254_v28, 16 }
 0x1c5   : > { %v2340_v39 = vpop.f32.mrf.mxu0  ;;  %v3313_v7 = vrot.slane %v3311_v23, 5 }
 0x1c6   : > { %v1686_v56 = vpop.f32.mrf.mxu3  ;;  %v1048_v48 = vpop.f32.mrf.mxu1 }
 0x1c7   : > { %v1727_v41 = vadd.f32 %v1686_v56, %v1437_v60  ;;  %v3294_v56 = vrot.slane %v3292_v10, 4  ;;  %v2503_v10 = vsel %vm5510_vm7, %v4851_v25, %v2502_v47  ;;  %v1049_v49 = vadd.f32 %v1048_v48, %v5713_v45  ;;  %v5014_v47 = vld [vmem:[%s5324_s30 + $0x78] sm:$0xf] }
 0x1c8   : > { %5093 = vmatmul.msk.bf16.gmra.mxu0 %vm696_vm4, %v3944_v3  ;;  %v3297_v3 = vrot.slane %v3295_v4, 5  ;;  %v3844_v25 = vrot.slane %v6229_v55, 5 }
 0x1c9   : > { %v1398_v33 = vpop.f32.mrf.mxu2  ;;  %4867 = vmatmul.msk.bf16.gmra.mxu1 %vm696_vm4, %v2603_v43  ;;  %v6249_v9 = vadd.f32 %v2340_v39, %v1727_v41  ;;  %v3838_v43 = vsel %vm5510_vm7, %v5077_v14, %v3837_v0  ;;  %v3547_v39 = vpack.c.b16 %v3522_v24, %v3521_v26  ;;  %v2506_v41 = vsel %vm5510_vm7, %v2504_v20, %v2505_v58 }
 0x1ca   : > { %v1438_v60 = vadd.f32 %v1398_v33, %v1046_v38  ;;  %v3298_v4 = vor.u32 %v3297_v3, %v3294_v56  ;;  %v3308_v0 = vor.u32 %v3307_v6, %v6251_v11  ;;  %v3919_v34 = vunpack.c.l.b16 %v3838_v43  ;;  %v6275_v56 = vld [vmem:[%s5324_s30 + $0x7c] sm:$0xf] }
 0x1cb   : > { %v3920_v38 = vunpack.c.l.b16 %v3841_v16  ;;  %v2579_v33 = vunpack.c.l.b16 %v2503_v10  ;;  %v2580_v26 = vunpack.c.l.b16 %v2506_v41  ;;  %v3316_v3 = vshrl.u32 %v5014_v47, 16  ;;  %v5216_v10 = vld [vmem:[%s5324_s30 + $0x70] sm:$0xf] }
 0x1cc   : > { %v3299_v58 = vrot.slane %v3298_v4, 4  ;;  %v3309_v37 = vrot.slane %v3308_v0, 4  ;;  %v3319_v6 = vshll.u32 %v5014_v47, 16  ;;  %v2509_v41 = vrot.slane %v5216_v10, 5 }
 0x1cd   : > { %v2342_v63 = vpop.f32.mrf.mxu0  ;;  %v2604_v20 = vpack.c.b16 %v2580_v26, %v2579_v33  ;;  %v3846_v23 = vrot.slane %v3844_v25, 4 }
 0x1ce   : > { %v1688_v62 = vpop.f32.mrf.mxu3  ;;  %4980 = vmatmul.msk.bf16.gmra.mxu2 %vm696_vm4, %v5144_v61  ;;  %v1050_v35 = vpop.f32.mrf.mxu1  ;;  %v3945_v61 = vpack.c.b16 %v3920_v38, %v3919_v34  ;;  %v3304_v55 = vsel %vm5336_vm3, %v3299_v58, %v6251_v11  ;;  %v3329_v34 = vshrl.u32 %v6275_v56, 16  ;;  %v3318_v11 = vrot.slane %v3316_v3, 4  ;;  %v6299_v3 = vld [vmem:[%s5324_s30 + $0x80] sm:$0x1] }
 0x1cf   : > { %v1728_v27 = vadd.f32 %v1688_v62, %v1438_v60  ;;  %v5062_v60 = vld [vmem:[%s5324_s30 + $0x6c] sm:$0xe]  ;;  %v1051_v0 = vadd.f32 %v1050_v35, %v5736_v12  ;;  %v3321_v33 = vrot.slane %v3319_v6, 5  ;;  %v2511_v47 = vrot.slane %v2509_v41, 4 }
 0x1d0   : > { %v5078_v62 = vrot.slane %v5062_v60, 9  ;;  %v3523_v12 = vunpack.c.l.b16 %v3304_v55 }
 0x1d1   : > { %v1401_v14 = vpop.f32.mrf.mxu2  ;;  %v6272_v45 = vadd.f32 %v2342_v63, %v1728_v27  ;;  %v3314_v63 = vsel %vm5336_vm3, %v3309_v37, %v3313_v7  ;;  %v3847_v27 = vrot.slane %v6254_v28, 5  ;;  %v5217_v28 = vld [vmem:[%s5324_s30 + $0x74] sm:$0x1]  ;;  %v3322_v6 = vor.u32 %v3321_v33, %v3318_v11  ;;  %v5063_v33 = vld [vmem:[%s5324_s30 + $0x78] sm:$0xe] }
 0x1d2   : > { %v1439_v24 = vadd.f32 %v1401_v14, %v1049_v49  ;;  %v3325_v49 = vshll.u32 %v6275_v56, 16  ;;  %v2512_v58 = vrot.slane %v5217_v28, 5  ;;  %v3524_v35 = vunpack.c.l.b16 %v3314_v63  ;;  %v6313_v28 = vld [vmem:[%s5324_s30 + $0x88] sm:$0xf] }
 0x1d3   : > { %5045 = vmatmul.msk.bf16.gmra.mxu3 %vm696_vm4, %v3547_v39  ;;  %v4836_v39 = vld [vmem:[%s5324_s30 + $0x6c] sm:$0xe]  ;;  %v3845_v7 = vsel %vm5510_vm7, %v5078_v62, %v3844_v25  ;;  %v3848_v60 = vsel %vm5510_vm7, %v3846_v23, %v3847_v27  ;;  %v3335_v23 = vshll.u32 %v6299_v3, 16  ;;  %v3323_v11 = vrot.slane %v3322_v6, 4 }
 0x1d4   : > { %v4852_v14 = vrot.slane %v4836_v39, 9  ;;  %v2513_v25 = vsel %vm5510_vm7, %v2511_v47, %v2512_v58  ;;  %v3921_v55 = vunpack.c.l.b16 %v3845_v7  ;;  %v3922_v63 = vunpack.c.l.b16 %v3848_v60 }
 0x1d5   : > { %v2345_v48 = vpop.f32.mrf.mxu0 }
 0x1d6   : > { %v1691_v43 = vpop.f32.mrf.mxu3  ;;  %v1053_v16 = vpop.f32.mrf.mxu1  ;;  %v2510_v10 = vsel %vm5510_vm7, %v4852_v14, %v2509_v41  ;;  %v5017_v41 = vld [vmem:[%s5324_s30 + $0x84] sm:$0xf]  ;;  %v3946_v14 = vpack.c.b16 %v3922_v63, %v3921_v55 }
 0x1d7   : > { %v1729_v4 = vadd.f32 %v1691_v43, %v1439_v24  ;;  %v5145_v24 = vld [vmem:[%s5324_s30 + $0x6c] sm:$0xff]  ;;  %v1054_v27 = vadd.f32 %v1053_v16, %v5755_v59  ;;  %v3337_v59 = vrot.slane %v3335_v23, 5  ;;  %v5079_v16 = vrot.slane %v5063_v33, 9  ;;  %v5146_v33 = vld [vmem:[%s5324_s30 + $0x78] sm:$0xff] }
 0x1d8   : > { %5094 = vmatmul.msk.bf16.gmra.mxu0 %vm696_vm4, %v3945_v61  ;;  %v3327_v61 = vrot.slane %v3325_v49, 5  ;;  %v3340_v60 = vshrl.u32 %v5017_v41, 16 }
 0x1d9   : > { %v1403_v38 = vpop.f32.mrf.mxu2  ;;  %4868 = vmatmul.msk.bf16.gmra.mxu1 %vm696_vm4, %v2604_v20  ;;  %v6292_v37 = vadd.f32 %v2345_v48, %v1729_v4  ;;  %v3331_v20 = vrot.slane %v3329_v34, 4  ;;  %v3548_v4 = vpack.c.b16 %v3524_v35, %v3523_v12  ;;  %v2581_v34 = vunpack.c.l.b16 %v2510_v10 }
 0x1da   : > { %v1440_v26 = vadd.f32 %v1403_v38, %v1051_v0  ;;  %v2582_v38 = vunpack.c.l.b16 %v2513_v25  ;;  %v3328_v7 = vsel %vm5336_vm3, %v3323_v11, %v3327_v61  ;;  %v3854_v10 = vrot.slane %v6299_v3, 5  ;;  %v4837_v25 = vld [vmem:[%s5324_s30 + $0x78] sm:$0xe] }
 0x1db   : > { %v3332_v0 = vor.u32 %v3331_v20, %v3327_v61  ;;  %v3343_v20 = vshll.u32 %v5017_v41, 16  ;;  %v5219_v41 = vld [vmem:[%s5324_s30 + $0x80] sm:$0x1] }
 0x1dc   : > { %v2605_v35 = vpack.c.b16 %v2582_v38, %v2581_v34  ;;  %v3342_v34 = vrot.slane %v3340_v60, 4 }
 0x1dd   : > { %v2347_v43 = vpop.f32.mrf.mxu0  ;;  %v3333_v47 = vrot.slane %v3332_v0, 4  ;;  %v3525_v0 = vunpack.c.l.b16 %v3328_v7  ;;  %v3345_v38 = vrot.slane %v3343_v20, 5 }
 0x1de   : > { %v1693_v39 = vpop.f32.mrf.mxu3  ;;  %4981 = vmatmul.msk.bf16.gmra.mxu2 %vm696_vm4, %v5145_v24  ;;  %v1055_v48 = vpop.f32.mrf.mxu1 }
 0x1df   : > { %v1730_v62 = vadd.f32 %v1693_v39, %v1440_v26  ;;  %v3851_v26 = vrot.slane %v6275_v56, 5  ;;  %v5218_v56 = vld [vmem:[%s5324_s30 + $0x7c] sm:$0xf]  ;;  %v1056_v61 = vadd.f32 %v1055_v48, %v5772_v32  ;;  %v2519_v32 = vrot.slane %v5219_v41, 5 }
 0x1e1   : > { %v1406_v49 = vpop.f32.mrf.mxu2  ;;  %v6315_v58 = vadd.f32 %v2347_v43, %v1730_v62  ;;  %v3853_v63 = vrot.slane %v3851_v26, 4  ;;  %v3349_v43 = vshll.u32 %v6313_v28, 16  ;;  %v3353_v62 = vshrl.u32 %v6313_v28, 16 }
 0x1e2   : > { %v1441_v24 = vadd.f32 %v1406_v49, %v1054_v27  ;;  %v3338_v27 = vsel %vm5336_vm3, %v3333_v47, %v3337_v59  ;;  %v3852_v23 = vsel %vm5510_vm7, %v5079_v16, %v3851_v26  ;;  %v4853_v49 = vrot.slane %v4837_v25, 9  ;;  %v5019_v26 = vld [vmem:[%s5324_s30 + $0x8c] sm:$0x1] }
 0x1e3   : > { %5046 = vmatmul.msk.bf16.gmra.mxu3 %vm696_vm4, %v3548_v4  ;;  %v2516_v4 = vrot.slane %v5218_v56, 5  ;;  %v3855_v47 = vsel %vm5510_vm7, %v3853_v63, %v3854_v10  ;;  %v6337_v59 = vrot.slane %v3349_v43, 5  ;;  %v3923_v7 = vunpack.c.l.b16 %v3852_v23 }
 0x1e4   : > { %v3924_v20 = vunpack.c.l.b16 %v3855_v47  ;;  %v3346_v25 = vor.u32 %v3345_v38, %v3342_v34  ;;  %v3359_v43 = vshll.u32 %v5019_v26, 16 }
 0x1e5   : > { %v2350_v12 = vpop.f32.mrf.mxu0 }
 0x1e6   : > { %v1696_v6 = vpop.f32.mrf.mxu3  ;;  %v2673_v39 = vpop.f32.mrf.mxu1  ;;  %v3947_v34 = vpack.c.b16 %v3924_v20, %v3923_v7  ;;  %v3347_v38 = vrot.slane %v3346_v25, 4 }
 0x1e7   : > { %v1731_v55 = vadd.f32 %v1696_v6, %v1441_v24  ;;  %v2518_v24 = vrot.slane %v2516_v4, 4 }
 0x1e8   : > { %5095 = vmatmul.msk.bf16.gmra.mxu0 %vm696_vm4, %v3946_v14  ;;  %v3526_v14 = vunpack.c.l.b16 %v3338_v27 }
 0x1e9   : > { %v1408_v3 = vpop.f32.mrf.mxu2  ;;  %4869 = vmatmul.msk.bf16.gmra.mxu1 %vm696_vm4, %v2605_v35  ;;  %v6333_v48 = vadd.f32 %v2350_v12, %v1731_v55  ;;  %v3355_v35 = vrot.slane %v3353_v62, 4  ;;  %v2517_v12 = vsel %vm5510_vm7, %v4853_v49, %v2516_v4  ;;  %v2520_v10 = vsel %vm5510_vm7, %v2518_v24, %v2519_v32  ;;  %v5064_v62 = vld [vmem:[%s5324_s30 + $0x84] sm:$0xe]  ;;  %v5020_v49 = vld [vmem:[%s5324_s30 + $0x90] sm:$0xf] }
 0x1ea   : > { %v1442_v11 = vadd.f32 %v1408_v3, %v1056_v61  ;;  %v3549_v55 = vpack.c.b16 %v3526_v14, %v3525_v0  ;;  %v3858_v61 = vrot.slane %v6313_v28, 5  ;;  %v2753_v4 = vadd.f32 %v2673_v39, %v5789_v46  ;;  %v6356_v0 = vld [vmem:[%s5324_s30 + $0x94] sm:$0xf] }
 0x1eb   : > { %v3356_v63 = vor.u32 %v3355_v35, %v6337_v59  ;;  %v2583_v3 = vunpack.c.l.b16 %v2517_v12  ;;  %v2584_v23 = vunpack.c.l.b16 %v2520_v10  ;;  %v3361_v28 = vrot.slane %v3359_v43, 5  ;;  %v5220_v12 = vld [vmem:[%s5324_s30 + $0x88] sm:$0xf] }
 0x1ec   : > { %v5080_v24 = vrot.slane %v5064_v62, 9  ;;  %v3860_v46 = vrot.slane %v3858_v61, 4  ;;  %v3861_v39 = vrot.slane %v5019_v26, 5  ;;  %v3364_v41 = vshrl.u32 %v5020_v49, 16 }
 0x1ed   : > { %v2352_v16 = vpop.f32.mrf.mxu0  ;;  %v2606_v47 = vpack.c.b16 %v2584_v23, %v2583_v3  ;;  %v3367_v35 = vshll.u32 %v5020_v49, 16  ;;  %v3373_v7 = vshll.u32 %v6356_v0, 16  ;;  %v2523_v10 = vrot.slane %v5220_v12, 5 }
 0x1ee   : > { %v1698_v60 = vpop.f32.mrf.mxu3  ;;  %4982 = vmatmul.msk.bf16.gmra.mxu2 %vm696_vm4, %v5146_v33  ;;  %v2675_v6 = vpop.f32.mrf.mxu1  ;;  %v3357_v33 = vrot.slane %v3356_v63, 4  ;;  %v3377_v25 = vshrl.u32 %v6356_v0, 16  ;;  %v3352_v26 = vsel %vm5336_vm3, %v3347_v38, %v6337_v59  ;;  %v3859_v63 = vsel %vm5510_vm7, %v5080_v24, %v3858_v61  ;;  %v5147_v61 = vld [vmem:[%s5324_s30 + $0x84] sm:$0xff]  ;;  %v5221_v38 = vld [vmem:[%s5324_s30 + $0x8c] sm:$0x1] }
 0x1ef   : > { %v1732_v56 = vadd.f32 %v1698_v60, %v1442_v11  ;;  %v3862_v43 = vsel %vm5510_vm7, %v3860_v46, %v3861_v39  ;;  %v3366_v62 = vrot.slane %v3364_v41, 4  ;;  %v3369_v3 = vrot.slane %v3367_v35, 5  ;;  %v6396_v46 = vld [vmem:[%s5324_s30 + $0x98] sm:$0x1] }
 0x1f0   : > { %v6384_v23 = vrot.slane %v3373_v7, 5  ;;  %v3925_v41 = vunpack.c.l.b16 %v3859_v63 }
 0x1f1   : > { %v2963_v27 = vpop.f32.mrf.mxu2  ;;  %v6363_v32 = vadd.f32 %v2352_v16, %v1732_v56  ;;  %v4838_v16 = vld [vmem:[%s5324_s30 + $0x84] sm:$0xe]  ;;  %v3362_v56 = vsel %vm5336_vm3, %v3357_v33, %v3361_v28  ;;  %v3379_v33 = vrot.slane %v3377_v25, 4  ;;  %v3527_v28 = vunpack.c.l.b16 %v3352_v26 }
 0x1f2   : > { %v3043_v11 = vadd.f32 %v2963_v27, %v2753_v4  ;;  %v2754_v27 = vadd.f32 %v2675_v6, %v5802_v42  ;;  %v4854_v49 = vrot.slane %v4838_v16, 9  ;;  %v3528_v24 = vunpack.c.l.b16 %v3362_v56 }
 0x1f3   : > { %5047 = vmatmul.msk.bf16.gmra.mxu3 %vm696_vm4, %v3549_v55  ;;  %v3370_v12 = vor.u32 %v3369_v3, %v3366_v62  ;;  %v3380_v25 = vor.u32 %v3379_v33, %v6384_v23  ;;  %v3383_v16 = vshll.u32 %v6396_v46, 16  ;;  %v5065_v33 = vld [vmem:[%s5324_s30 + $0x90] sm:$0xe] }
 0x1f4   : > { %v2524_v7 = vsel %vm5510_vm7, %v4854_v49, %v2523_v10  ;;  %v3550_v26 = vpack.c.b16 %v3528_v24, %v3527_v28 }
 0x1f5   : > { %v4015_v14 = vpop.f32.mrf.mxu0  ;;  %v3371_v62 = vrot.slane %v3370_v12, 4  ;;  %v3381_v3 = vrot.slane %v3380_v25, 4 }
 0x1f6   : > { %v3617_v60 = vpop.f32.mrf.mxu3  ;;  %v2678_v20 = vpop.f32.mrf.mxu1 }
 0x1f7   : > { %v3697_v55 = vadd.f32 %v3617_v60, %v3043_v11  ;;  %v2526_v11 = vrot.slane %v5221_v38, 5  ;;  %v2755_v63 = vadd.f32 %v2678_v20, %v5815_v15  ;;  %v3865_v15 = vrot.slane %v6356_v0, 5 }
 0x1f8   : > { %5096 = vmatmul.msk.bf16.gmra.mxu0 %vm696_vm4, %v3947_v34  ;;  %v2525_v34 = vrot.slane %v2523_v10, 4  ;;  %v5023_v10 = vld [vmem:[%s5324_s30 + $0x9c] sm:$0xf]  ;;  %v3376_v25 = vsel %vm5336_vm3, %v3371_v62, %v6384_v23  ;;  %v6439_v23 = vld [vmem:[%s5324_s30 + $0xa4] sm:$0x1]  ;;  %v5148_v62 = vld [vmem:[%s5324_s30 + $0x90] sm:$0xff] }
 0x1f9   : > { %v6380_v4 = vadd.f32 %v4015_v14, %v3697_v55  ;;  %v2965_v59 = vpop.f32.mrf.mxu2  ;;  %4870 = vmatmul.msk.bf16.gmra.mxu1 %vm696_vm4, %v2606_v47  ;;  %v3926_v14 = vunpack.c.l.b16 %v3862_v43  ;;  %v3388_v20 = vshrl.u32 %v5023_v10, 16 }
 0x1fa   : > { %v3044_v6 = vadd.f32 %v2965_v59, %v2754_v27  ;;  %v2527_v60 = vsel %vm5510_vm7, %v2525_v34, %v2526_v11  ;;  %v2585_v27 = vunpack.c.l.b16 %v2524_v7  ;;  %v3385_v11 = vrot.slane %v3383_v16, 5  ;;  %v4839_v16 = vld [vmem:[%s5324_s30 + $0x90] sm:$0xe] }
 0x1fb   : > { %v4127_v42 = vpack.c.bf16 %v6380_v4, %v6380_v4  ;;  %v2586_v59 = vunpack.c.l.b16 %v2527_v60  ;;  %v3948_v49 = vpack.c.b16 %v3926_v14, %v3925_v41  ;;  %v3868_v7 = vrot.slane %v6396_v46, 5  ;;  %v5222_v60 = vld [vmem:[%s5324_s30 + $0x94] sm:$0xf] }
 0x1fc   : > { %v2530_v12 = vrot.slane %v5222_v60, 5 }
 0x1fd   : > { %4160 = vst.msk [vmem:[%s6389_s21] sm:$0xf] %vm4159_vm8, %v4127_v42  ;;  %v4017_v39 = vpop.f32.mrf.mxu0  ;;  %v3391_v42 = vshll.u32 %v5023_v10, 16 }
 0x1fe   : > { %v3619_v47 = vpop.f32.mrf.mxu3  ;;  %4983 = vmatmul.msk.bf16.gmra.mxu2 %vm696_vm4, %v5147_v61  ;;  %v2680_v35 = vpop.f32.mrf.mxu1  ;;  %v6412_v61 = vld [vmem:[%s5324_s30 + $0xa0] sm:$0xf] }
 0x1ff   : > { %v3698_v55 = vadd.f32 %v3619_v47, %v3044_v6  ;;  %v3397_v6 = vshll.u32 %v6412_v61, 16  ;;  %v3401_v28 = vshrl.u32 %v6412_v61, 16  ;;  %v5081_v47 = vrot.slane %v5065_v33, 9 }
 0x200   : > { %v2756_v10 = vadd.f32 %v2680_v35, %v5828_v13 }
 0x201   : > { %v6407_v56 = vadd.f32 %v4017_v39, %v3698_v55  ;;  %v2968_v43 = vpop.f32.mrf.mxu2  ;;  %v2607_v39 = vpack.c.b16 %v2586_v59, %v2585_v27  ;;  %v3386_v55 = vsel %vm5336_vm3, %v3381_v3, %v3385_v11  ;;  %v6432_v46 = vrot.slane %v3397_v6, 5 }
 0x202   : > { %v3045_v38 = vadd.f32 %v2968_v43, %v2755_v63  ;;  %v3390_v63 = vrot.slane %v3388_v20, 4  ;;  %v3393_v43 = vrot.slane %v3391_v42, 5  ;;  %v3403_v27 = vrot.slane %v3401_v28, 4 }
 0x203   : > { %v4128_v34 = vpack.c.bf16 %v6407_v56, %v6407_v56  ;;  %5048 = vmatmul.msk.bf16.gmra.mxu3 %vm696_vm4, %v3550_v26  ;;  %v3867_v26 = vrot.slane %v3865_v15, 4  ;;  %v3529_v3 = vunpack.c.l.b16 %v3376_v25  ;;  %v2532_v11 = vrot.slane %v2530_v12, 4 }
 0x204   : > { %v3530_v6 = vunpack.c.l.b16 %v3386_v55  ;;  %v3866_v13 = vsel %vm5510_vm7, %v5081_v47, %v3865_v15  ;;  %v3394_v28 = vor.u32 %v3393_v43, %v3390_v63 }
 0x205   : > { %4161 = vst.msk [vmem:[%s6389_s21 + $0x4] sm:$0xf] %vm4159_vm8, %v4128_v34  ;;  %v4020_v24 = vpop.f32.mrf.mxu0  ;;  %v3869_v35 = vsel %vm5510_vm7, %v3867_v26, %v3868_v7  ;;  %v3927_v55 = vunpack.c.l.b16 %v3866_v13 }
 0x206   : > { %v3622_v41 = vpop.f32.mrf.mxu3  ;;  %v2683_v14 = vpop.f32.mrf.mxu1  ;;  %v3551_v7 = vpack.c.b16 %v3530_v6, %v3529_v3  ;;  %v3928_v26 = vunpack.c.l.b16 %v3869_v35 }
 0x207   : > { %v3699_v0 = vadd.f32 %v3622_v41, %v3045_v38  ;;  %v4855_v38 = vrot.slane %v4839_v16, 9  ;;  %v3395_v16 = vrot.slane %v3394_v28, 4  ;;  %v3875_v28 = vrot.slane %v6439_v23, 5 }
 0x208   : > { %5097 = vmatmul.msk.bf16.gmra.mxu0 %vm696_vm4, %v3948_v49  ;;  %v5223_v49 = vld [vmem:[%s5324_s30 + $0x98] sm:$0x1] }
 0x209   : > { %v6434_v59 = vadd.f32 %v4020_v24, %v3699_v0  ;;  %v2970_v34 = vpop.f32.mrf.mxu2  ;;  %4871 = vmatmul.msk.bf16.gmra.mxu1 %vm696_vm4, %v2607_v39  ;;  %v2533_v33 = vrot.slane %v5223_v49, 5  ;;  %v3404_v24 = vor.u32 %v3403_v27, %v6432_v46  ;;  %v3407_v39 = vshll.u32 %v6439_v23, 16  ;;  %v5066_v49 = vld [vmem:[%s5324_s30 + $0x9c] sm:$0xe] }
 0x20a   : > { %v3046_v42 = vadd.f32 %v2970_v34, %v2756_v10  ;;  %v2531_v25 = vsel %vm5510_vm7, %v4855_v38, %v2530_v12  ;;  %v3872_v27 = vrot.slane %v6412_v61, 5  ;;  %v2757_v34 = vadd.f32 %v2683_v14, %v5841_v57 }
 0x20b   : > { %v4129_v20 = vpack.c.bf16 %v6434_v59, %v6434_v59  ;;  %v2534_v15 = vsel %vm5510_vm7, %v2532_v11, %v2533_v33  ;;  %v3405_v63 = vrot.slane %v3404_v24, 4  ;;  %v3409_v43 = vrot.slane %v3407_v39, 5  ;;  %v5026_v11 = vld [vmem:[%s5324_s30 + $0xa8] sm:$0xf] }
 0x20c   : > { %v2588_v38 = vunpack.c.l.b16 %v2534_v15  ;;  %v3400_v61 = vsel %vm5336_vm3, %v3395_v16, %v6432_v46  ;;  %v5082_v14 = vrot.slane %v5066_v49, 9  ;;  %v3874_v35 = vrot.slane %v3872_v27, 4 }
 0x20d   : > { %4162 = vst.msk [vmem:[%s6389_s21 + $0x8] sm:$0xf] %vm4159_vm8, %v4129_v20  ;;  %v4022_v41 = vpop.f32.mrf.mxu0  ;;  %v3949_v20 = vpack.c.b16 %v3928_v26, %v3927_v55  ;;  %v3410_v57 = vsel %vm5336_vm3, %v3405_v63, %v3409_v43  ;;  %v3412_v24 = vshrl.u32 %v5026_v11, 16  ;;  %v3415_v46 = vshll.u32 %v5026_v11, 16 }
 0x20e   : > { %v3624_v60 = vpop.f32.mrf.mxu3  ;;  %4984 = vmatmul.msk.bf16.gmra.mxu2 %vm696_vm4, %v5148_v62  ;;  %v2685_v0 = vpop.f32.mrf.mxu1  ;;  %v2587_v62 = vunpack.c.l.b16 %v2531_v25  ;;  %v3531_v26 = vunpack.c.l.b16 %v3400_v61  ;;  %v3532_v16 = vunpack.c.l.b16 %v3410_v57  ;;  %v3873_v23 = vsel %vm5510_vm7, %v5082_v14, %v3872_v27 }
 0x20f   : > { %v3700_v47 = vadd.f32 %v3624_v60, %v3046_v42  ;;  %v6473_v42 = vld [vmem:[%s5324_s30 + $0xac] sm:$0xf]  ;;  %v5224_v60 = vld [vmem:[%s5324_s30 + $0xa0] sm:$0xf]  ;;  %v2758_v43 = vadd.f32 %v2685_v0, %v5854_v54  ;;  %v6498_v0 = vld [vmem:[%s5324_s30 + $0xb0] sm:$0x1] }
 0x210   : > { %v2608_v13 = vpack.c.b16 %v2588_v38, %v2587_v62  ;;  %v2537_v25 = vrot.slane %v5224_v60, 5  ;;  %v3425_v55 = vshrl.u32 %v6473_v42, 16  ;;  %v3414_v62 = vrot.slane %v3412_v24, 4  ;;  %v5149_v38 = vld [vmem:[%s5324_s30 + $0x9c] sm:$0xff] }
 0x211   : > { %v6459_v10 = vadd.f32 %v4022_v41, %v3700_v47  ;;  %v2973_v12 = vpop.f32.mrf.mxu2  ;;  %v4840_v47 = vld [vmem:[%s5324_s30 + $0x9c] sm:$0xe] }
 0x212   : > { %v3047_v33 = vadd.f32 %v2973_v12, %v2757_v34  ;;  %v3876_v12 = vsel %vm5510_vm7, %v3874_v35, %v3875_v28  ;;  %v4856_v49 = vrot.slane %v4840_v47, 9  ;;  %v2539_v11 = vrot.slane %v2537_v25, 4 }
 0x213   : > { %v4130_v3 = vpack.c.bf16 %v6459_v10, %v6459_v10  ;;  %5049 = vmatmul.msk.bf16.gmra.mxu3 %vm696_vm4, %v3551_v7  ;;  %v3421_v7 = vshll.u32 %v6473_v42, 16  ;;  %v3427_v54 = vrot.slane %v3425_v55, 4  ;;  %v3930_v35 = vunpack.c.l.b16 %v3876_v12 }
 0x214   : > { %v2538_v24 = vsel %vm5510_vm7, %v4856_v49, %v2537_v25  ;;  %v5029_v25 = vld [vmem:[%s5324_s30 + $0xb4] sm:$0xf] }
 0x215   : > { %4163 = vst.msk [vmem:[%s6389_s21 + $0xc] sm:$0xf] %vm4159_vm8, %v4130_v3  ;;  %v4025_v6 = vpop.f32.mrf.mxu0  ;;  %v5225_v3 = vld [vmem:[%s5324_s30 + $0xa4] sm:$0x1]  ;;  %v6495_v57 = vrot.slane %v3421_v7, 5  ;;  %v3431_v7 = vshll.u32 %v6498_v0, 16 }
 0x216   : > { %v3627_v39 = vpop.f32.mrf.mxu3  ;;  %v2688_v41 = vpop.f32.mrf.mxu1 }
 0x217   : > { %v3701_v15 = vadd.f32 %v3627_v39, %v3047_v33  ;;  %v2540_v33 = vrot.slane %v5225_v3, 5  ;;  %v3428_v47 = vor.u32 %v3427_v54, %v6495_v57  ;;  %v3433_v3 = vrot.slane %v3431_v7, 5 }
 0x218   : > { %5098 = vmatmul.msk.bf16.gmra.mxu0 %vm696_vm4, %v3949_v20  ;;  %v3417_v20 = vrot.slane %v3415_v46, 5 }
 0x219   : > { %v6485_v63 = vadd.f32 %v4025_v6, %v3701_v15  ;;  %v2975_v34 = vpop.f32.mrf.mxu2  ;;  %4872 = vmatmul.msk.bf16.gmra.mxu1 %vm696_vm4, %v2608_v13  ;;  %v3929_v6 = vunpack.c.l.b16 %v3873_v23  ;;  %v2541_v39 = vsel %vm5510_vm7, %v2539_v11, %v2540_v33  ;;  %v3552_v15 = vpack.c.b16 %v3532_v16, %v3531_v26  ;;  %v5067_v33 = vld [vmem:[%s5324_s30 + $0xa8] sm:$0xe] }
 0x21a   : > { %v3048_v61 = vadd.f32 %v2975_v34, %v2758_v43  ;;  %v3418_v60 = vor.u32 %v3417_v20, %v3414_v62  ;;  %v2759_v23 = vadd.f32 %v2688_v41, %v5866_v31  ;;  %v2589_v34 = vunpack.c.l.b16 %v2538_v24 }
 0x21b   : > { %v4131_v27 = vpack.c.bf16 %v6485_v63, %v6485_v63  ;;  %v2590_v12 = vunpack.c.l.b16 %v2541_v39  ;;  %v3950_v49 = vpack.c.b16 %v3930_v35, %v3929_v6  ;;  %v3429_v11 = vrot.slane %v3428_v47, 4  ;;  %v5226_v35 = vld [vmem:[%s5324_s30 + $0xac] sm:$0xf]  ;;  %v4841_v47 = vld [vmem:[%s5324_s30 + $0xa8] sm:$0xe] }
 0x21c   : > { %v3419_v62 = vrot.slane %v3418_v60, 4  ;;  %v3436_v31 = vshrl.u32 %v5029_v25, 16  ;;  %v3439_v41 = vshll.u32 %v5029_v25, 16  ;;  %v2544_v24 = vrot.slane %v5226_v35, 5 }
 0x21d   : > { %4164 = vst.msk [vmem:[%s6389_s21 + $0x10] sm:$0xf] %vm4159_vm8, %v4131_v27  ;;  %v4027_v14 = vpop.f32.mrf.mxu0  ;;  %v2609_v54 = vpack.c.b16 %v2590_v12, %v2589_v34 }
 0x21e   : > { %v3629_v13 = vpop.f32.mrf.mxu3  ;;  %4985 = vmatmul.msk.bf16.gmra.mxu2 %vm696_vm4, %v5149_v38  ;;  %v2690_v28 = vpop.f32.mrf.mxu1  ;;  %v6514_v38 = vld [vmem:[%s5324_s30 + $0xb8] sm:$0xf]  ;;  %v3424_v60 = vsel %vm5336_vm3, %v3419_v62, %v6495_v57  ;;  %v3441_v7 = vrot.slane %v3439_v41, 5  ;;  %v3882_v62 = vrot.slane %v6498_v0, 5 }
 0x21f   : > { %v3702_v46 = vadd.f32 %v3629_v13, %v3048_v61  ;;  %v3445_v20 = vshll.u32 %v6514_v38, 16  ;;  %v3449_v27 = vshrl.u32 %v6514_v38, 16  ;;  %v2760_v12 = vadd.f32 %v2690_v28, %v5879_v44 }
 0x221   : > { %v6509_v55 = vadd.f32 %v4027_v14, %v3702_v46  ;;  %v2978_v43 = vpop.f32.mrf.mxu2  ;;  %v3879_v14 = vrot.slane %v6473_v42, 5  ;;  %v3434_v46 = vsel %vm5336_vm3, %v3429_v11, %v3433_v3  ;;  %v3438_v42 = vrot.slane %v3436_v31, 4  ;;  %v5227_v3 = vld [vmem:[%s5324_s30 + $0xb0] sm:$0x1] }
 0x222   : > { %v3049_v16 = vadd.f32 %v2978_v43, %v2759_v23  ;;  %v6533_v23 = vrot.slane %v3445_v20, 5  ;;  %v3451_v43 = vrot.slane %v3449_v27, 4  ;;  %v2546_v11 = vrot.slane %v2544_v24, 4 }
 0x223   : > { %v4132_v26 = vpack.c.bf16 %v6509_v55, %v6509_v55  ;;  %5050 = vmatmul.msk.bf16.gmra.mxu3 %vm696_vm4, %v3552_v15  ;;  %v5083_v15 = vrot.slane %v5067_v33, 9  ;;  %v3881_v57 = vrot.slane %v3879_v14, 4  ;;  %v2547_v33 = vrot.slane %v5227_v3, 5 }
 0x224   : > { %v3533_v20 = vunpack.c.l.b16 %v3424_v60  ;;  %v3534_v44 = vunpack.c.l.b16 %v3434_v46  ;;  %v3442_v27 = vor.u32 %v3441_v7, %v3438_v42 }
 0x225   : > { %4165 = vst.msk [vmem:[%s6389_s21 + $0x14] sm:$0xf] %vm4159_vm8, %v4132_v26  ;;  %v4030_v61 = vpop.f32.mrf.mxu0  ;;  %v6541_v26 = vld [vmem:[%s5324_s30 + $0xbc] sm:$0x1]  ;;  %v3880_v28 = vsel %vm5510_vm7, %v5083_v15, %v3879_v14  ;;  %v2548_v14 = vsel %vm5510_vm7, %v2546_v11, %v2547_v33 }
 0x226   : > { %v3632_v6 = vpop.f32.mrf.mxu3  ;;  %v2693_v13 = vpop.f32.mrf.mxu1  ;;  %v3455_v0 = vshll.u32 %v6541_v26, 16  ;;  %v3553_v15 = vpack.c.b16 %v3534_v44, %v3533_v20  ;;  %v3443_v7 = vrot.slane %v3442_v27, 4 }
 0x227   : > { %v3703_v39 = vadd.f32 %v3632_v6, %v3049_v16  ;;  %v5150_v16 = vld [vmem:[%s5324_s30 + $0xa8] sm:$0xff]  ;;  %v3883_v6 = vsel %vm5510_vm7, %v3881_v57, %v3882_v62  ;;  %v2761_v57 = vadd.f32 %v2693_v13, %v5893_v30 }
 0x228   : > { %5099 = vmatmul.msk.bf16.gmra.mxu0 %vm696_vm4, %v3950_v49  ;;  %v4857_v49 = vrot.slane %v4841_v47, 9  ;;  %v3931_v47 = vunpack.c.l.b16 %v3880_v28  ;;  %v3932_v42 = vunpack.c.l.b16 %v3883_v6  ;;  %v3448_v20 = vsel %vm5336_vm3, %v3443_v7, %v6533_v23  ;;  %v5068_v28 = vld [vmem:[%s5324_s30 + $0xb4] sm:$0xe] }
 0x229   : > { %v6535_v34 = vadd.f32 %v4030_v61, %v3703_v39  ;;  %v2980_v25 = vpop.f32.mrf.mxu2  ;;  %4873 = vmatmul.msk.bf16.gmra.mxu1 %vm696_vm4, %v2609_v54  ;;  %v3452_v61 = vor.u32 %v3451_v43, %v6533_v23  ;;  %v3535_v23 = vunpack.c.l.b16 %v3448_v20 }
 0x22a   : > { %v3050_v41 = vadd.f32 %v2980_v25, %v2760_v12  ;;  %v2545_v60 = vsel %vm5510_vm7, %v4857_v49, %v2544_v24  ;;  %v3457_v12 = vrot.slane %v3455_v0, 5  ;;  %v2592_v24 = vunpack.c.l.b16 %v2548_v14  ;;  %v5032_v49 = vld [vmem:[%s5324_s30 + $0xc0] sm:$0xf] }
 0x22b   : > { %v4133_v31 = vpack.c.bf16 %v6535_v34, %v6535_v34  ;;  %v3453_v43 = vrot.slane %v3452_v61, 4  ;;  %v3951_v33 = vpack.c.b16 %v3932_v42, %v3931_v47  ;;  %v3460_v27 = vshrl.u32 %v5032_v49, 16 }
 0x22c   : > { %v5084_v47 = vrot.slane %v5068_v28, 9 }
 0x22d   : > { %4166 = vst.msk [vmem:[%s6389_s21 + $0x18] sm:$0xf] %vm4159_vm8, %v4133_v31  ;;  %v4032_v54 = vpop.f32.mrf.mxu0  ;;  %v3886_v31 = vrot.slane %v6514_v38, 5  ;;  %v3458_v44 = vsel %vm5336_vm3, %v3453_v43, %v3457_v12  ;;  %v3463_v38 = vshll.u32 %v5032_v49, 16 }
 0x22e   : > { %v3634_v35 = vpop.f32.mrf.mxu3  ;;  %4986 = vmatmul.msk.bf16.gmra.mxu2 %vm696_vm4, %v5150_v16  ;;  %v2695_v39 = vpop.f32.mrf.mxu1  ;;  %v2591_v16 = vunpack.c.l.b16 %v2545_v60  ;;  %v4842_v60 = vld [vmem:[%s5324_s30 + $0xb4] sm:$0xe] }
 0x22f   : > { %v3704_v46 = vadd.f32 %v3634_v35, %v3050_v41  ;;  %v6569_v41 = vld [vmem:[%s5324_s30 + $0xc4] sm:$0xf]  ;;  %v3888_v42 = vrot.slane %v3886_v31, 4  ;;  %v2762_v43 = vadd.f32 %v2695_v39, %v5906_v51  ;;  %v6594_v51 = vld [vmem:[%s5324_s30 + $0xc8] sm:$0x1] }
 0x230   : > { %v2610_v13 = vpack.c.b16 %v2592_v24, %v2591_v16  ;;  %v3469_v14 = vshll.u32 %v6569_v41, 16  ;;  %v5151_v16 = vld [vmem:[%s5324_s30 + $0xb4] sm:$0xff]  ;;  %v4858_v24 = vrot.slane %v4842_v60, 9 }
 0x231   : > { %v6560_v25 = vadd.f32 %v4032_v54, %v3704_v46  ;;  %v2983_v62 = vpop.f32.mrf.mxu2  ;;  %v5228_v54 = vld [vmem:[%s5324_s30 + $0xb8] sm:$0xf]  ;;  %v3473_v46 = vshrl.u32 %v6569_v41, 16 }
 0x232   : > { %v3051_v3 = vadd.f32 %v2983_v62, %v2761_v57  ;;  %v2551_v6 = vrot.slane %v5228_v54, 5  ;;  %v3889_v57 = vrot.slane %v6541_v26, 5  ;;  %v3462_v62 = vrot.slane %v3460_v27, 4 }
 0x233   : > { %v4134_v11 = vpack.c.bf16 %v6560_v25, %v6560_v25  ;;  %5051 = vmatmul.msk.bf16.gmra.mxu3 %vm696_vm4, %v3553_v15  ;;  %v3536_v15 = vunpack.c.l.b16 %v3458_v44  ;;  %v3471_v44 = vrot.slane %v3469_v14, 5  ;;  %v3475_v28 = vrot.slane %v3473_v46, 4 }
 0x234   : > { %v2553_v49 = vrot.slane %v2551_v6, 4  ;;  %v3887_v26 = vsel %vm5510_vm7, %v5084_v47, %v3886_v31  ;;  %v2552_v54 = vsel %vm5510_vm7, %v4858_v24, %v2551_v6  ;;  %v3479_v31 = vshll.u32 %v6594_v51, 16 }
 0x235   : > { %4167 = vst.msk [vmem:[%s6389_s21 + $0x1c] sm:$0xf] %vm4159_vm8, %v4134_v11  ;;  %v4035_v30 = vpop.f32.mrf.mxu0  ;;  %v5229_v11 = vld [vmem:[%s5324_s30 + $0xbc] sm:$0x1]  ;;  %v3554_v14 = vpack.c.b16 %v3536_v15, %v3535_v23  ;;  %v3476_v46 = vor.u32 %v3475_v28, %v3471_v44  ;;  %v3933_v47 = vunpack.c.l.b16 %v3887_v26  ;;  %v2593_v6 = vunpack.c.l.b16 %v2552_v54  ;;  %v5230_v26 = vld [vmem:[%s5324_s30 + $0xc4] sm:$0xf] }
 0x236   : > { %v3637_v61 = vpop.f32.mrf.mxu3  ;;  %v2698_v0 = vpop.f32.mrf.mxu1 }
 0x237   : > { %v3705_v35 = vadd.f32 %v3637_v61, %v3051_v3  ;;  %v2554_v3 = vrot.slane %v5229_v11, 5 }
 0x238   : > { %5100 = vmatmul.msk.bf16.gmra.mxu0 %vm696_vm4, %v3951_v33  ;;  %v3465_v33 = vrot.slane %v3463_v38, 5 }
 0x239   : > { %v6584_v7 = vadd.f32 %v4035_v30, %v3705_v35  ;;  %v2985_v12 = vpop.f32.mrf.mxu2  ;;  %4874 = vmatmul.msk.bf16.gmra.mxu1 %vm696_vm4, %v2610_v13  ;;  %v3890_v13 = vsel %vm5510_vm7, %v3888_v42, %v3889_v57  ;;  %v2555_v38 = vsel %vm5510_vm7, %v2553_v49, %v2554_v3  ;;  %v3481_v49 = vrot.slane %v3479_v31, 5  ;;  %v5069_v3 = vld [vmem:[%s5324_s30 + $0xc0] sm:$0xe] }
 0x23a   : > { %v3052_v20 = vadd.f32 %v2985_v12, %v2762_v43  ;;  %v3466_v35 = vor.u32 %v3465_v33, %v3462_v62  ;;  %v3934_v42 = vunpack.c.l.b16 %v3890_v13  ;;  %v2763_v12 = vadd.f32 %v2698_v0, %v5922_v1 }
 0x23b   : > { %v4135_v30 = vpack.c.bf16 %v6584_v7, %v6584_v7  ;;  %v3477_v62 = vrot.slane %v3476_v46, 4  ;;  %v3893_v1 = vrot.slane %v6569_v41, 5  ;;  %v2558_v13 = vrot.slane %v5230_v26, 5 }
 0x23c   : > { %v3467_v24 = vrot.slane %v3466_v35, 4  ;;  %v3952_v11 = vpack.c.b16 %v3934_v42, %v3933_v47  ;;  %v5085_v41 = vrot.slane %v5069_v3, 9  ;;  %v4843_v35 = vld [vmem:[%s5324_s30 + $0xc0] sm:$0xe] }
 0x23d   : > { %4168 = vst.msk [vmem:[%s6389_s21 + $0x20] sm:$0xf] %vm4159_vm8, %v4135_v30  ;;  %v4037_v39 = vpop.f32.mrf.mxu0  ;;  %v5035_v30 = vld [vmem:[%s5324_s30 + $0xcc] sm:$0xf]  ;;  %v7009_v42 = vld [vmem:[#allocation2_spill] sm:$0xff] }
 0x23e   : > { %v3639_v27 = vpop.f32.mrf.mxu3  ;;  %4987 = vmatmul.msk.bf16.gmra.mxu2 %vm696_vm4, %v5151_v16  ;;  %v2700_v61 = vpop.f32.mrf.mxu1  ;;  %v2594_v16 = vunpack.c.l.b16 %v2555_v38  ;;  %v3472_v54 = vsel %vm5336_vm3, %v3467_v24, %v3471_v44  ;;  %v3482_v38 = vsel %vm5336_vm3, %v3477_v62, %v3481_v49  ;;  %v3895_v44 = vrot.slane %v3893_v1, 4  ;;  %v5231_v62 = vld [vmem:[%s5324_s30 + $0xc8] sm:$0x1] }
 0x23f   : > { %v3706_v60 = vadd.f32 %v3639_v27, %v3052_v20  ;;  %v6620_v20 = vld [vmem:[%s5324_s30 + $0xd0] sm:$0xf]  ;;  %v3537_v24 = vunpack.c.l.b16 %v3472_v54  ;;  %v2561_v49 = vrot.slane %v5231_v62, 5  ;;  %v5037_v54 = vld [vmem:[%s5324_s30 + $0xd4] sm:$0x1] }
 0x240   : > { %v2611_v33 = vpack.c.b16 %v2594_v16, %v2593_v6  ;;  %v3493_v46 = vshll.u32 %v6620_v20, 16  ;;  %v3497_v31 = vshrl.u32 %v6620_v20, 16  ;;  %v3896_v6 = vrot.slane %v6594_v51, 5  ;;  %v5152_v16 = vld [vmem:[%s5324_s30 + $0xc0] sm:$0xff] }
 0x241   : > { %v6608_v43 = vadd.f32 %v4037_v39, %v3706_v60  ;;  %v2988_v57 = vpop.f32.mrf.mxu2  ;;  %v3484_v60 = vshrl.u32 %v5035_v30, 16 }
 0x242   : > { %v3053_v15 = vadd.f32 %v2988_v57, %v2763_v12  ;;  %v2764_v12 = vadd.f32 %v2700_v61, %v7009_v42  ;;  %v3894_v61 = vsel %vm5510_vm7, %v5085_v41, %v3893_v1  ;;  %v3499_v26 = vrot.slane %v3497_v31, 4 }
 0x243   : > { %v4136_v23 = vpack.c.bf16 %v6608_v43, %v6608_v43  ;;  %5052 = vmatmul.msk.bf16.gmra.mxu3 %vm696_vm4, %v3554_v14  ;;  %v3487_v14 = vshll.u32 %v5035_v30, 16 }
 0x245   : > { %4169 = vst.msk [vmem:[%s6389_s21 + $0x24] sm:$0xf] %vm4159_vm8, %v4136_v23  ;;  %v4040_v0 = vpop.f32.mrf.mxu0  ;;  %v4859_v23 = vrot.slane %v4843_v35, 9  ;;  %v3489_v30 = vrot.slane %v3487_v14, 5  ;;  %v3935_v14 = vunpack.c.l.b16 %v3894_v61 }
 0x246   : > { %v3642_v28 = vpop.f32.mrf.mxu3  ;;  %v2703_v39 = vpop.f32.mrf.mxu1 }
 0x247   : > { %v3707_v27 = vadd.f32 %v3642_v28, %v3053_v15  ;;  %v2560_v15 = vrot.slane %v2558_v13, 4  ;;  %v3495_v28 = vrot.slane %v3493_v46, 5 }
 0x248   : > { %5101 = vmatmul.msk.bf16.gmra.mxu0 %vm696_vm4, %v3952_v11 }
 0x249   : > { %v6631_v47 = vadd.f32 %v4040_v0, %v3707_v27  ;;  %v2990_v57 = vpop.f32.mrf.mxu2  ;;  %4875 = vmatmul.msk.bf16.gmra.mxu1 %vm696_vm4, %v2611_v33  ;;  %v3538_v0 = vunpack.c.l.b16 %v3482_v38  ;;  %v3486_v33 = vrot.slane %v3484_v60, 4  ;;  %v3897_v27 = vsel %vm5510_vm7, %v3895_v44, %v3896_v6 }
 0x24a   : > { %v3054_v3 = vadd.f32 %v2990_v57, %v2764_v12  ;;  %v2559_v38 = vsel %vm5510_vm7, %v4859_v23, %v2558_v13  ;;  %v2562_v1 = vsel %vm5510_vm7, %v2560_v15, %v2561_v49  ;;  %v3936_v46 = vunpack.c.l.b16 %v3897_v27 }
 0x24b   : > { %v4137_v11 = vpack.c.bf16 %v6631_v47, %v6631_v47  ;;  %v3555_v60 = vpack.c.b16 %v3538_v0, %v3537_v24  ;;  %v3490_v31 = vor.u32 %v3489_v30, %v3486_v33  ;;  %v3500_v12 = vor.u32 %v3499_v26, %v3495_v28  ;;  %v5070_v33 = vld [vmem:[%s5324_s30 + $0xcc] sm:$0xe] }
 0x24c   : > { %v3503_v57 = vshll.u32 %v5037_v54, 16  ;;  %v2765_v6 = vadd.f32 %v2703_v39, %v5958_v52  ;;  %v2595_v62 = vunpack.c.l.b16 %v2559_v38  ;;  %v3953_v23 = vpack.c.b16 %v3936_v46, %v3935_v14  ;;  %v5153_v14 = vld [vmem:[%s5324_s30 + $0xcc] sm:$0xff] }
 0x24d   : > { %4170 = vst.msk [vmem:[%s6389_s21 + $0x28] sm:$0xf] %vm4159_vm8, %v4137_v11  ;;  %v4042_v51 = vpop.f32.mrf.mxu0  ;;  %v2596_v11 = vunpack.c.l.b16 %v2562_v1  ;;  %v3491_v15 = vrot.slane %v3490_v31, 4  ;;  %v3501_v49 = vrot.slane %v3500_v12, 4  ;;  %v3900_v52 = vrot.slane %v6620_v20, 5 }
 0x24e   : > { %v3644_v35 = vpop.f32.mrf.mxu3  ;;  %4988 = vmatmul.msk.bf16.gmra.mxu2 %vm696_vm4, %v5152_v16  ;;  %v2705_v42 = vpop.f32.mrf.mxu1 }
 0x24f   : > { %v3708_v41 = vadd.f32 %v3644_v35, %v3054_v3  ;;  %v3505_v3 = vrot.slane %v3503_v57, 5  ;;  %v2612_v61 = vpack.c.b16 %v2596_v11, %v2595_v62  ;;  %v5086_v35 = vrot.slane %v5070_v33, 9 }
 0x250   : > { %v2766_v1 = vadd.f32 %v2705_v42, %v5978_v21  ;;  %v3902_v20 = vrot.slane %v3900_v52, 4 }
 0x251   : > { %v6652_v44 = vadd.f32 %v4042_v51, %v3708_v41  ;;  %v2993_v16 = vpop.f32.mrf.mxu2  ;;  %v3496_v51 = vsel %vm5336_vm3, %v3491_v15, %v3495_v28  ;;  %v3506_v27 = vsel %vm5336_vm3, %v3501_v49, %v3505_v3  ;;  %v3901_v57 = vsel %vm5510_vm7, %v5086_v35, %v3900_v52 }
 0x252   : > { %v3055_v24 = vadd.f32 %v2993_v16, %v2765_v6  ;;  %v3539_v12 = vunpack.c.l.b16 %v3496_v51  ;;  %v3540_v28 = vunpack.c.l.b16 %v3506_v27  ;;  %v3937_v62 = vunpack.c.l.b16 %v3901_v57 }
 0x253   : > { %v4138_v13 = vpack.c.bf16 %v6652_v44, %v6652_v44  ;;  %5053 = vmatmul.msk.bf16.gmra.mxu3 %vm696_vm4, %v3555_v60  ;;  %v3903_v60 = vrot.slane %v5037_v54, 5 }
 0x254   : > { %v3556_v16 = vpack.c.b16 %v3540_v28, %v3539_v12 }
 0x255   : > { %4171 = vst.msk [vmem:[%s6389_s21 + $0x2c] sm:$0xf] %vm4159_vm8, %v4138_v13  ;;  %v4045_v0 = vpop.f32.mrf.mxu0  ;;  %v3904_v21 = vsel %vm5510_vm7, %v3902_v20, %v3903_v60 }
 0x256   : > { %v3647_v39 = vpop.f32.mrf.mxu3  ;;  %v2708_v30 = vpop.f32.mrf.mxu1  ;;  %v3938_v11 = vunpack.c.l.b16 %v3904_v21 }
 0x257   : > { %v3709_v26 = vadd.f32 %v3647_v39, %v3055_v24  ;;  %v2767_v24 = vadd.f32 %v2708_v30, %v5997_v29  ;;  %v7010_v29 = vld [vmem:[#allocation3_spill] sm:$0xff] }
 0x258   : > { %5102 = vmatmul.msk.bf16.gmra.mxu0 %vm696_vm4, %v3953_v23  ;;  %v3954_v49 = vpack.c.b16 %v3938_v11, %v3937_v62 }
 0x259   : > { %v6667_v38 = vadd.f32 %v4045_v0, %v3709_v26  ;;  %v2995_v41 = vpop.f32.mrf.mxu2  ;;  %4876 = vmatmul.msk.bf16.gmra.mxu1 %vm696_vm4, %v2612_v61 }
 0x25a   : > { %v3056_v31 = vadd.f32 %v2995_v41, %v2766_v1 }
 0x25b   : > { %v4139_v46 = vpack.c.bf16 %v6667_v38, %v6667_v38 }
 0x25d   : > { %4172 = vst.msk [vmem:[%s6389_s21 + $0x30] sm:$0xf] %vm4159_vm8, %v4139_v46  ;;  %v4047_v36 = vpop.f32.mrf.mxu0 }
 0x25e   : > { %v3649_v42 = vpop.f32.mrf.mxu3  ;;  %4989 = vmatmul.msk.bf16.gmra.mxu2 %vm696_vm4, %v5153_v14  ;;  %v2710_v54 = vpop.f32.mrf.mxu1 }
 0x25f   : > { %v3710_v6 = vadd.f32 %v3649_v42, %v3056_v31  ;;  %v2768_v39 = vadd.f32 %v2710_v54, %v7010_v29 }
 0x261   : > { %v6681_v13 = vadd.f32 %v4047_v36, %v3710_v6  ;;  %v2998_v23 = vpop.f32.mrf.mxu2 }
 0x262   : > { %v3057_v18 = vadd.f32 %v2998_v23, %v2767_v24 }
 0x263   : > { %v4140_v15 = vpack.c.bf16 %v6681_v13, %v6681_v13  ;;  %5054 = vmatmul.msk.bf16.gmra.mxu3 %vm696_vm4, %v3556_v16 }
 0x265   : > { %4173 = vst.msk [vmem:[%s6389_s21 + $0x34] sm:$0xf] %vm4159_vm8, %v4140_v15  ;;  %v4050_v3 = vpop.f32.mrf.mxu0 }
 0x266   : > { %v3652_v0 = vpop.f32.mrf.mxu3  ;;  %v2713_v61 = vpop.f32.mrf.mxu1 }
 0x267   : > { %v3711_v33 = vadd.f32 %v3652_v0, %v3057_v18  ;;  %v2769_v60 = vadd.f32 %v2713_v61, %v6040_v5 }
 0x268   : > { %5103 = vmatmul.msk.bf16.gmra.mxu0 %vm696_vm4, %v3954_v49 }
 0x269   : > { %v6690_v52 = vadd.f32 %v4050_v3, %v3711_v33  ;;  %v3000_v30 = vpop.f32.mrf.mxu2 }
 0x26a   : > { %v3058_v51 = vadd.f32 %v3000_v30, %v2768_v39 }
 0x26b   : > { %v4141_v26 = vpack.c.bf16 %v6690_v52, %v6690_v52 }
 0x26d   : > { %4174 = vst.msk [vmem:[%s6389_s21 + $0x38] sm:$0xf] %vm4159_vm8, %v4141_v26  ;;  %v4052_v27 = vpop.f32.mrf.mxu0 }
 0x26e   : > { %v3654_v35 = vpop.f32.mrf.mxu3  ;;  %v2715_v1 = vpop.f32.mrf.mxu1 }
 0x26f   : > { %v3712_v41 = vadd.f32 %v3654_v35, %v3058_v51  ;;  %v2770_v42 = vadd.f32 %v2715_v1, %v6064_v22 }
 0x271   : > { %v6697_v20 = vadd.f32 %v4052_v27, %v3712_v41  ;;  %v3003_v14 = vpop.f32.mrf.mxu2 }
 0x272   : > { %v3059_v31 = vadd.f32 %v3003_v14, %v2769_v60 }
 0x273   : > { %v4142_v46 = vpack.c.bf16 %v6697_v20, %v6697_v20 }
 0x275   : > { %4175 = vst.msk [vmem:[%s6389_s21 + $0x3c] sm:$0xf] %vm4159_vm8, %v4142_v46  ;;  %v4055_v12 = vpop.f32.mrf.mxu0 }
 0x276   : > { %v3657_v28 = vpop.f32.mrf.mxu3  ;;  %v2718_v36 = vpop.f32.mrf.mxu1 }
 0x277   : > { %v3713_v57 = vadd.f32 %v3657_v28, %v3059_v31  ;;  %v2771_v15 = vadd.f32 %v2718_v36, %v6083_v19 }
 0x279   : > { %v6704_v21 = vadd.f32 %v4055_v12, %v3713_v57  ;;  %v3005_v54 = vpop.f32.mrf.mxu2 }
 0x27a   : > { %v3060_v6 = vadd.f32 %v3005_v54, %v2770_v42 }
 0x27b   : > { %v4143_v5 = vpack.c.bf16 %v6704_v21, %v6704_v21 }
 0x27d   : > { %4176 = vst.msk [vmem:[%s6389_s21 + $0x40] sm:$0xf] %vm4159_vm8, %v4143_v5  ;;  %v4057_v16 = vpop.f32.mrf.mxu0 }
 0x27e   : > { %v3659_v62 = vpop.f32.mrf.mxu3  ;;  %v2720_v11 = vpop.f32.mrf.mxu1 }
 0x27f   : > { %v3714_v24 = vadd.f32 %v3659_v62, %v3060_v6  ;;  %v2772_v39 = vadd.f32 %v2720_v11, %v6107_v53  ;;  %v4194_v6 = vsel %vm4192_vm9, %v6407_v56, 0.0 }
 0x281   : > { %v6711_v23 = vadd.f32 %v4057_v16, %v3714_v24  ;;  %v3008_v18 = vpop.f32.mrf.mxu2  ;;  %v4193_v24 = vsel %vm4192_vm9, %v6380_v4, 0.0 }
 0x282   : > { %v3061_v49 = vadd.f32 %v3008_v18, %v2771_v15  ;;  %v4195_v18 = vadd.f32 %v4194_v6, %v4193_v24  ;;  %v4210_v6 = vsel %vm4192_vm9, %v6608_v43, 0.0 }
 0x283   : > { %v4144_v22 = vpack.c.bf16 %v6711_v23, %v6711_v23 }
 0x285   : > { %4177 = vst.msk [vmem:[%s6389_s21 + $0x44] sm:$0xf] %vm4159_vm8, %v4144_v22  ;;  %v4060_v3 = vpop.f32.mrf.mxu0  ;;  %v4198_v22 = vsel %vm4192_vm9, %v6459_v10, 0.0 }
 0x286   : > { %v3662_v0 = vpop.f32.mrf.mxu3  ;;  %v2723_v61 = vpop.f32.mrf.mxu1 }
 0x287   : > { %v3715_v33 = vadd.f32 %v3662_v0, %v3061_v49  ;;  %v2773_v60 = vadd.f32 %v2723_v61, %v6126_v2 }
 0x289   : > { %v6718_v29 = vadd.f32 %v4060_v3, %v3715_v33  ;;  %v3010_v30 = vpop.f32.mrf.mxu2  ;;  %v4200_v33 = vsel %vm4192_vm9, %v6485_v63, 0.0 }
 0x28a   : > { %v3062_v26 = vadd.f32 %v3010_v30, %v2772_v39 }
 0x28b   : > { %v4145_v19 = vpack.c.bf16 %v6718_v29, %v6718_v29 }
 0x28d   : > { %4178 = vst.msk [vmem:[%s6389_s21 + $0x48] sm:$0xf] %vm4159_vm8, %v4145_v19  ;;  %v4062_v51 = vpop.f32.mrf.mxu0 }
 0x28e   : > { %v3664_v27 = vpop.f32.mrf.mxu3  ;;  %v2725_v35 = vpop.f32.mrf.mxu1 }
 0x28f   : > { %v3716_v1 = vadd.f32 %v3664_v27, %v3062_v26  ;;  %v2774_v42 = vadd.f32 %v2725_v35, %v6150_v40  ;;  %v4196_v40 = vsel %vm4192_vm9, %v6434_v59, 0.0  ;;  %v4202_v26 = vsel %vm4192_vm9, %v6509_v55, 0.0 }
 0x290   : > { %v4197_v61 = vadd.f32 %v4196_v40, %v4195_v18  ;;  %v4212_v40 = vsel %vm4192_vm9, %v6631_v47, 0.0 }
 0x291   : > { %v6725_v41 = vadd.f32 %v4062_v51, %v3716_v1  ;;  %v3013_v14 = vpop.f32.mrf.mxu2  ;;  %v4204_v1 = vsel %vm4192_vm9, %v6535_v34, 0.0 }
 0x292   : > { %v3063_v46 = vadd.f32 %v3013_v14, %v2773_v60  ;;  %v4199_v19 = vadd.f32 %v4198_v22, %v4197_v61  ;;  %v4214_v22 = vsel %vm4192_vm9, %v6652_v44, 0.0 }
 0x293   : > { %v4146_v53 = vpack.c.bf16 %v6725_v41, %v6725_v41 }
 0x294   : > { %v4201_v27 = vadd.f32 %v4200_v33, %v4199_v19 }
 0x295   : > { %4179 = vst.msk [vmem:[%s6389_s21 + $0x4c] sm:$0xf] %vm4159_vm8, %v4146_v53  ;;  %v4065_v31 = vpop.f32.mrf.mxu0  ;;  %v4206_v53 = vsel %vm4192_vm9, %v6560_v25, 0.0 }
 0x296   : > { %v3667_v12 = vpop.f32.mrf.mxu3  ;;  %v2728_v28 = vpop.f32.mrf.mxu1  ;;  %v4203_v14 = vadd.f32 %v4202_v26, %v4201_v27 }
 0x297   : > { %v3717_v36 = vadd.f32 %v3667_v12, %v3063_v46  ;;  %v2775_v3 = vadd.f32 %v2728_v28, %v6169_v8 }
 0x299   : > { %v6732_v57 = vadd.f32 %v4065_v31, %v3717_v36  ;;  %v3015_v54 = vpop.f32.mrf.mxu2  ;;  %v7011_v31 = vld [vmem:[#allocation4_spill] sm:$0xff]  ;;  %v4205_v36 = vadd.f32 %v4204_v1, %v4203_v14 }
 0x29a   : > { %v3064_v5 = vadd.f32 %v3015_v54, %v2774_v42  ;;  %v4208_v42 = vsel %vm4192_vm9, %v6584_v7, 0.0 }
 0x29b   : > { %v4147_v2 = vpack.c.bf16 %v6732_v57, %v6732_v57 }
 0x29d   : > { %4180 = vst.msk [vmem:[%s6389_s21 + $0x50] sm:$0xf] %vm4159_vm8, %v4147_v2  ;;  %v4067_v16 = vpop.f32.mrf.mxu0 }
 0x29e   : > { %v3669_v62 = vpop.f32.mrf.mxu3  ;;  %v2730_v11 = vpop.f32.mrf.mxu1 }
 0x29f   : > { %v3718_v15 = vadd.f32 %v3669_v62, %v3064_v5  ;;  %v2776_v12 = vadd.f32 %v2730_v11, %v7011_v31  ;;  %v4207_v5 = vadd.f32 %v4206_v53, %v4205_v36  ;;  %v4222_v53 = vsel %vm4192_vm9, %v6697_v20, 0.0 }
 0x2a1   : > { %v6747_v49 = vadd.f32 %v4067_v16, %v3718_v15  ;;  %v3018_v0 = vpop.f32.mrf.mxu2  ;;  %v4209_v62 = vadd.f32 %v4208_v42, %v4207_v5  ;;  %v4224_v42 = vsel %vm4192_vm9, %v6704_v21, 0.0 }
 0x2a2   : > { %v3065_v30 = vadd.f32 %v3018_v0, %v2775_v3 }
 0x2a3   : > { %v4148_v39 = vpack.c.bf16 %v6747_v49, %v6747_v49  ;;  %v4211_v18 = vadd.f32 %v4210_v6, %v4209_v62  ;;  %v4226_v6 = vsel %vm4192_vm9, %v6711_v23, 0.0 }
 0x2a5   : > { %4181 = vst.msk [vmem:[%s6389_s21 + $0x54] sm:$0xf] %vm4159_vm8, %v4148_v39  ;;  %v4070_v51 = vpop.f32.mrf.mxu0  ;;  %v4213_v33 = vadd.f32 %v4212_v40, %v4211_v18  ;;  %v4216_v39 = vsel %vm4192_vm9, %v6667_v38, 0.0  ;;  %v4230_v18 = vsel %vm4192_vm9, %v6725_v41, 0.0 }
 0x2a6   : > { %v3672_v35 = vpop.f32.mrf.mxu3  ;;  %v2733_v8 = vpop.f32.mrf.mxu1 }
 0x2a7   : > { %v3719_v60 = vadd.f32 %v3672_v35, %v3065_v30  ;;  %v2777_v0 = vadd.f32 %v2733_v8, %v6210_v17  ;;  %v4215_v26 = vadd.f32 %v4214_v22, %v4213_v33  ;;  %v4220_v8 = vsel %vm4192_vm9, %v6690_v52, 0.0 }
 0x2a9   : > { %v6762_v46 = vadd.f32 %v4070_v51, %v3719_v60  ;;  %v3020_v28 = vpop.f32.mrf.mxu2  ;;  %v4218_v51 = vsel %vm4192_vm9, %v6681_v13, 0.0  ;;  %v4217_v35 = vadd.f32 %v4216_v39, %v4215_v26  ;;  %v4232_v39 = vsel %vm4192_vm9, %v6732_v57, 0.0 }
 0x2aa   : > { %v3066_v2 = vadd.f32 %v3020_v28, %v2776_v12 }
 0x2ab   : > { %v4149_v54 = vpack.c.bf16 %v6762_v46, %v6762_v46  ;;  %v4219_v14 = vadd.f32 %v4218_v51, %v4217_v35  ;;  %v4234_v51 = vsel %vm4192_vm9, %v6747_v49, 0.0 }
 0x2ad   : > { %4182 = vst.msk [vmem:[%s6389_s21 + $0x58] sm:$0xf] %vm4159_vm8, %v4149_v54  ;;  %v4072_v16 = vpop.f32.mrf.mxu0  ;;  %v4221_v36 = vadd.f32 %v4220_v8, %v4219_v14 }
 0x2ae   : > { %v3674_v24 = vpop.f32.mrf.mxu3  ;;  %v2735_v11 = vpop.f32.mrf.mxu1 }
 0x2af   : > { %v3720_v15 = vadd.f32 %v3674_v24, %v3066_v2  ;;  %v2778_v12 = vadd.f32 %v2735_v11, %v6231_v50  ;;  %v4223_v5 = vadd.f32 %v4222_v53, %v4221_v36  ;;  %v4228_v11 = vsel %vm4192_vm9, %v6718_v29, 0.0 }
 0x2b1   : > { %v6777_v3 = vadd.f32 %v4072_v16, %v3720_v15  ;;  %v3023_v61 = vpop.f32.mrf.mxu2  ;;  %v4225_v62 = vadd.f32 %v4224_v42, %v4223_v5 }
 0x2b2   : > { %v3067_v19 = vadd.f32 %v3023_v61, %v2777_v0 }
 0x2b3   : > { %v4150_v30 = vpack.c.bf16 %v6777_v3, %v6777_v3  ;;  %v4227_v15 = vadd.f32 %v4226_v6, %v4225_v62  ;;  %v4238_v14 = vsel %vm4192_vm9, %v6777_v3, 0.0 }
 0x2b5   : > { %4183 = vst.msk [vmem:[%s6389_s21 + $0x5c] sm:$0xf] %vm4159_vm8, %v4150_v30  ;;  %v4075_v27 = vpop.f32.mrf.mxu0  ;;  %v4229_v33 = vadd.f32 %v4228_v11, %v4227_v15 }
 0x2b6   : > { %v3677_v1 = vpop.f32.mrf.mxu3  ;;  %v2738_v17 = vpop.f32.mrf.mxu1 }
 0x2b7   : > { %v3721_v60 = vadd.f32 %v3677_v1, %v3067_v19  ;;  %v2779_v0 = vadd.f32 %v2738_v17, %v6249_v9  ;;  %v4231_v26 = vadd.f32 %v4230_v18, %v4229_v33  ;;  %v4236_v9 = vsel %vm4192_vm9, %v6762_v46, 0.0 }
 0x2b9   : > { %v6792_v31 = vadd.f32 %v4075_v27, %v3721_v60  ;;  %v3025_v28 = vpop.f32.mrf.mxu2  ;;  %v4233_v35 = vadd.f32 %v4232_v39, %v4231_v26 }
 0x2ba   : > { %v3068_v2 = vadd.f32 %v3025_v28, %v2778_v12 }
 0x2bb   : > { %v4151_v54 = vpack.c.bf16 %v6792_v31, %v6792_v31  ;;  %v4235_v60 = vadd.f32 %v4234_v51, %v4233_v35  ;;  %v4240_v42 = vsel %vm4192_vm9, %v6792_v31, 0.0 }
 0x2bd   : > { %4184 = vst.msk [vmem:[%s6389_s21 + $0x60] sm:$0xf] %vm4159_vm8, %v4151_v54  ;;  %v4077_v16 = vpop.f32.mrf.mxu0  ;;  %v4237_v36 = vadd.f32 %v4236_v9, %v4235_v60 }
 0x2be   : > { %v3679_v24 = vpop.f32.mrf.mxu3  ;;  %v2740_v50 = vpop.f32.mrf.mxu1 }
 0x2bf   : > { %v3722_v40 = vadd.f32 %v3679_v24, %v3068_v2  ;;  %v2780_v12 = vadd.f32 %v2740_v50, %v6272_v45  ;;  %v4239_v5 = vadd.f32 %v4238_v14, %v4237_v36 }
 0x2c1   : > { %v6807_v22 = vadd.f32 %v4077_v16, %v3722_v40  ;;  %v3028_v61 = vpop.f32.mrf.mxu2  ;;  %v4241_v62 = vadd.f32 %v4240_v42, %v4239_v5 }
 0x2c2   : > { %v3069_v19 = vadd.f32 %v3028_v61, %v2779_v0 }
 0x2c3   : > { %v4152_v30 = vpack.c.bf16 %v6807_v22, %v6807_v22  ;;  %v4242_v6 = vsel %vm4192_vm9, %v6807_v22, 0.0 }
 0x2c4   : > { %v4243_v11 = vadd.f32 %v4242_v6, %v4241_v62 }
 0x2c5   : > { %4185 = vst.msk [vmem:[%s6389_s21 + $0x64] sm:$0xf] %vm4159_vm8, %v4152_v30  ;;  %v4080_v27 = vpop.f32.mrf.mxu0 }
 0x2c6   : > { %v3682_v1 = vpop.f32.mrf.mxu3  ;;  %v2743_v8 = vpop.f32.mrf.mxu1 }
 0x2c7   : > { %v3723_v17 = vadd.f32 %v3682_v1, %v3069_v19  ;;  %v2781_v15 = vadd.f32 %v2743_v8, %v6292_v37 }
 0x2c9   : > { %v6822_v53 = vadd.f32 %v4080_v27, %v3723_v17  ;;  %v3030_v28 = vpop.f32.mrf.mxu2 }
 0x2ca   : > { %v3070_v2 = vadd.f32 %v3030_v28, %v2780_v12 }
 0x2cb   : > { %v4153_v54 = vpack.c.bf16 %v6822_v53, %v6822_v53  ;;  %v4244_v45 = vsel %vm4192_vm9, %v6822_v53, 0.0 }
 0x2cc   : > { %v4245_v61 = vadd.f32 %v4244_v45, %v4243_v11 }
 0x2cd   : > { %4186 = vst.msk [vmem:[%s6389_s21 + $0x68] sm:$0xf] %vm4159_vm8, %v4153_v54  ;;  %v4082_v16 = vpop.f32.mrf.mxu0 }
 0x2ce   : > { %v3684_v24 = vpop.f32.mrf.mxu3  ;;  %v2745_v0 = vpop.f32.mrf.mxu1 }
 0x2cf   : > { %v3724_v50 = vadd.f32 %v3684_v24, %v3070_v2  ;;  %v2782_v37 = vadd.f32 %v2745_v0, %v6315_v58 }
 0x2d1   : > { %v6835_v40 = vadd.f32 %v4082_v16, %v3724_v50  ;;  %v3033_v18 = vpop.f32.mrf.mxu2 }
 0x2d2   : > { %v3071_v30 = vadd.f32 %v3033_v18, %v2781_v15 }
 0x2d3   : > { %v4154_v33 = vpack.c.bf16 %v6835_v40, %v6835_v40  ;;  %v4246_v39 = vsel %vm4192_vm9, %v6835_v40, 0.0 }
 0x2d4   : > { %v4247_v19 = vadd.f32 %v4246_v39, %v4245_v61 }
 0x2d5   : > { %4187 = vst.msk [vmem:[%s6389_s21 + $0x6c] sm:$0xf] %vm4159_vm8, %v4154_v33  ;;  %v4085_v26 = vpop.f32.mrf.mxu0 }
 0x2d6   : > { %v3687_v51 = vpop.f32.mrf.mxu3  ;;  %v2748_v60 = vpop.f32.mrf.mxu1 }
 0x2d7   : > { %v3725_v27 = vadd.f32 %v3687_v51, %v3071_v30  ;;  %v2783_v54 = vadd.f32 %v2748_v60, %v6333_v48 }
 0x2d9   : > { %v4123_v35 = vadd.f32 %v4085_v26, %v3725_v27  ;;  %v3035_v1 = vpop.f32.mrf.mxu2 }
 0x2da   : > { %v3072_v8 = vadd.f32 %v3035_v1, %v2782_v37 }
 0x2db   : > { %v4155_v9 = vpack.c.bf16 %v4123_v35, %v4123_v35  ;;  %v4248_v17 = vsel %vm4192_vm9, %v4123_v35, 0.0 }
 0x2dc   : > { %v4249_v14 = vadd.f32 %v4248_v17, %v4247_v19 }
 0x2dd   : > { %4188 = vst.msk [vmem:[%s6389_s21 + $0x70] sm:$0xf] %vm4159_vm8, %v4155_v9  ;;  %v4087_v12 = vpop.f32.mrf.mxu0 }
 0x2de   : > { %v3689_v28 = vpop.f32.mrf.mxu3  ;;  %v2750_v62 = vpop.f32.mrf.mxu1 }
 0x2df   : > { %v3726_v36 = vadd.f32 %v3689_v28, %v3072_v8  ;;  %v2784_v15 = vadd.f32 %v2750_v62, %v6363_v32 }
 0x2e1   : > { %v4124_v42 = vadd.f32 %v4087_v12, %v3726_v36  ;;  %v3038_v2 = vpop.f32.mrf.mxu2 }
 0x2e2   : > { %v3073_v6 = vadd.f32 %v3038_v2, %v2783_v54 }
 0x2e3   : > { %v4156_v5 = vpack.c.bf16 %v4124_v42, %v4124_v42  ;;  %v4250_v58 = vsel %vm4192_vm9, %v4124_v42, 0.0 }
 0x2e4   : > { %v4251_v16 = vadd.f32 %v4250_v58, %v4249_v14 }
 0x2e5   : > { %4189 = vst.msk [vmem:[%s6389_s21 + $0x74] sm:$0xf] %vm4159_vm8, %v4156_v5  ;;  %v4090_v24 = vpop.f32.mrf.mxu0 }
 0x2e6   : > { %v3692_v45 = vpop.f32.mrf.mxu3 }
 0x2e7   : > { %v3727_v50 = vadd.f32 %v3692_v45, %v3073_v6 }
 0x2e9   : > { %v4125_v11 = vadd.f32 %v4090_v24, %v3727_v50  ;;  %v3040_v18 = vpop.f32.mrf.mxu2 }
 0x2ea   : > { %v3074_v61 = vadd.f32 %v3040_v18, %v2784_v15 }
 0x2eb   : > { %v4157_v0 = vpack.c.bf16 %v4125_v11, %v4125_v11  ;;  %v4252_v48 = vsel %vm4192_vm9, %v4125_v11, 0.0 }
 0x2ec   : > { %v4253_v33 = vadd.f32 %v4252_v48, %v4251_v16 }
 0x2ed   : > { %4190 = vst.msk [vmem:[%s6389_s21 + $0x78] sm:$0xf] %vm4159_vm8, %v4157_v0  ;;  %v4092_v19 = vpop.f32.mrf.mxu0 }
 0x2ee   : > { %v3694_v39 = vpop.f32.mrf.mxu3 }
 0x2ef   : > { %v3728_v30 = vadd.f32 %v3694_v39, %v3074_v61 }
 0x2f1   : > { %v4126_v26 = vadd.f32 %v4092_v19, %v3728_v30 }
 0x2f3   : > { %v4158_v51 = vpack.c.bf16 %v4126_v26, %v4126_v26  ;;  %v4254_v27 = vsel %vm4192_vm9, %v4126_v26, 0.0 }
 0x2f4   : > { %v4255_v37 = vadd.f32 %v4254_v27, %v4253_v33 }
 0x2f5   : > { %4191 = vst.msk [vmem:[%s6389_s21 + $0x7c] sm:$0xf] %vm4159_vm8, %v4158_v51 }
 0x2f6   : > { %v4256_v32 = vrot.slane %v4255_v37, 4 }
 0x2f8   : > { %v4257_v1 = vadd.f32 %v4256_v32, %v4255_v37 }
 0x2fa   : > { %v4258_v9 = vrot.slane %v4257_v1, 2 }
 0x2fc   : > { %v4259_v17 = vadd.f32 %v4258_v9, %v4257_v1 }
 0x2fe   : > { %v4260_v8 = vrot.slane %v4259_v17, 1 }
 0x300   : > { %v4261_v60 = vadd.f32 %v4260_v8, %v4259_v17 }
 0x302   : > { %v6865_v14 = vmul.f32 0.00390625, %v4261_v60 }
 0x304   : > { %4397 = vst.msk [vmem:[%s6863_s25] sm:$0x1] %vm4396_vm10, %v6865_v14  ;;  %v6872_v12 = vsub.f32 %v6822_v53, %v6865_v14  ;;  %v6876_v28 = vsub.f32 %v6835_v40, %v6865_v14  ;;  %v6879_v36 = vsub.f32 %v4123_v35, %v6865_v14  ;;  %v6882_v54 = vsub.f32 %v4124_v42, %v6865_v14 }
 0x305   : > { %v6885_v2 = vsub.f32 %v4125_v11, %v6865_v14  ;;  %v6888_v5 = vsub.f32 %v4126_v26, %v6865_v14  ;;  %v4263_v53 = vsub.f32 %v6380_v4, %v6865_v14  ;;  %v4264_v58 = vsub.f32 %v6407_v56, %v6865_v14 }
 0x306   : > { %v4265_v40 = vsub.f32 %v6434_v59, %v6865_v14  ;;  %v4266_v35 = vsub.f32 %v6459_v10, %v6865_v14  ;;  %v4267_v16 = vsub.f32 %v6485_v63, %v6865_v14  ;;  %v4268_v24 = vsub.f32 %v6509_v55, %v6865_v14 }
 0x307   : > { %v4295_v42 = vmul.f32 %v4263_v53, %v4263_v53  ;;  %v4296_v6 = vmul.f32 %v4264_v58, %v4264_v58  ;;  %v4269_v59 = vsub.f32 %v6535_v34, %v6865_v14  ;;  %v4270_v63 = vsub.f32 %v6560_v25, %v6865_v14 }
 0x308   : > { %v4297_v62 = vmul.f32 %v4265_v40, %v4265_v40  ;;  %v4298_v45 = vmul.f32 %v4266_v35, %v4266_v35  ;;  %v4299_v11 = vmul.f32 %v4267_v16, %v4267_v16  ;;  %v4300_v18 = vmul.f32 %v4268_v24, %v4268_v24 }
 0x309   : > { %v4327_v4 = vsel %vm4192_vm9, %v4295_v42, 0.0  ;;  %v4328_v56 = vsel %vm4192_vm9, %v4296_v6, 0.0  ;;  %v4271_v48 = vsub.f32 %v6584_v7, %v6865_v14  ;;  %v4301_v61 = vmul.f32 %v4269_v59, %v4269_v59 }
 0x30a   : > { %v4329_v50 = vadd.f32 %v4328_v56, %v4327_v4  ;;  %v4330_v10 = vsel %vm4192_vm9, %v4297_v62, 0.0  ;;  %v4332_v0 = vsel %vm4192_vm9, %v4298_v45, 0.0  ;;  %v4334_v33 = vsel %vm4192_vm9, %v4299_v11, 0.0 }
 0x30b   : > { %v4272_v34 = vsub.f32 %v6608_v43, %v6865_v14  ;;  %v4302_v30 = vmul.f32 %v4270_v63, %v4270_v63  ;;  %v4336_v19 = vsel %vm4192_vm9, %v4300_v18, 0.0  ;;  %v4273_v25 = vsub.f32 %v6631_v47, %v6865_v14 }
 0x30c   : > { %v4331_v15 = vadd.f32 %v4330_v10, %v4329_v50  ;;  %v4303_v51 = vmul.f32 %v4271_v48, %v4271_v48  ;;  %v4338_v27 = vsel %vm4192_vm9, %v4301_v61, 0.0  ;;  %v4274_v7 = vsub.f32 %v6652_v44, %v6865_v14 }
 0x30d   : > { %v4304_v32 = vmul.f32 %v4272_v34, %v4272_v34  ;;  %v4340_v1 = vsel %vm4192_vm9, %v4302_v30, 0.0  ;;  %v4275_v43 = vsub.f32 %v6667_v38, %v6865_v14  ;;  %v4305_v17 = vmul.f32 %v4273_v25, %v4273_v25 }
 0x30e   : > { %v4333_v55 = vadd.f32 %v4332_v0, %v4331_v15  ;;  %v4342_v8 = vsel %vm4192_vm9, %v4303_v51, 0.0  ;;  %v4276_v47 = vsub.f32 %v6681_v13, %v6865_v14  ;;  %v4306_v53 = vmul.f32 %v4274_v7, %v4274_v7 }
 0x30f   : > { %v4344_v58 = vsel %vm4192_vm9, %v4304_v32, 0.0  ;;  %v4277_v44 = vsub.f32 %v6690_v52, %v6865_v14  ;;  %v4307_v35 = vmul.f32 %v4275_v43, %v4275_v43  ;;  %v4346_v42 = vsel %vm4192_vm9, %v4305_v17, 0.0 }
 0x310   : > { %v4335_v39 = vadd.f32 %v4334_v33, %v4333_v55  ;;  %v4278_v38 = vsub.f32 %v6697_v20, %v6865_v14  ;;  %v4308_v16 = vmul.f32 %v4276_v47, %v4276_v47  ;;  %v4348_v62 = vsel %vm4192_vm9, %v4306_v53, 0.0 }
 0x311   : > { %v4279_v13 = vsub.f32 %v6704_v21, %v6865_v14  ;;  %v4309_v45 = vmul.f32 %v4277_v44, %v4277_v44  ;;  %v4350_v4 = vsel %vm4192_vm9, %v4307_v35, 0.0  ;;  %v4280_v52 = vsub.f32 %v6711_v23, %v6865_v14 }
 0x312   : > { %v4337_v26 = vadd.f32 %v4336_v19, %v4335_v39  ;;  %v4310_v50 = vmul.f32 %v4278_v38, %v4278_v38  ;;  %v4352_v59 = vsel %vm4192_vm9, %v4308_v16, 0.0  ;;  %v4281_v20 = vsub.f32 %v6718_v29, %v6865_v14 }
 0x313   : > { %v4311_v10 = vmul.f32 %v4279_v13, %v4279_v13  ;;  %v4354_v15 = vsel %vm4192_vm9, %v4309_v45, 0.0  ;;  %v4282_v21 = vsub.f32 %v6725_v41, %v6865_v14  ;;  %v4312_v18 = vmul.f32 %v4280_v52, %v4280_v52 }
 0x314   : > { %v4339_v37 = vadd.f32 %v4338_v27, %v4337_v26  ;;  %v4356_v0 = vsel %vm4192_vm9, %v4310_v50, 0.0  ;;  %v4283_v23 = vsub.f32 %v6732_v57, %v6865_v14  ;;  %v4313_v48 = vmul.f32 %v4281_v20, %v4281_v20 }
 0x315   : > { %v4358_v61 = vsel %vm4192_vm9, %v4311_v10, 0.0  ;;  %v4284_v29 = vsub.f32 %v6747_v49, %v6865_v14  ;;  %v4314_v39 = vmul.f32 %v4282_v21, %v4282_v21  ;;  %v4360_v34 = vsel %vm4192_vm9, %v4312_v18, 0.0 }
 0x316   : > { %v4341_v9 = vadd.f32 %v4340_v1, %v4339_v37  ;;  %v4285_v41 = vsub.f32 %v6762_v46, %v6865_v14  ;;  %v4315_v19 = vmul.f32 %v4283_v23, %v4283_v23  ;;  %v4362_v26 = vsel %vm4192_vm9, %v4313_v48, 0.0 }
 0x317   : > { %v4286_v57 = vsub.f32 %v6777_v3, %v6865_v14  ;;  %v4316_v51 = vmul.f32 %v4284_v29, %v4284_v29  ;;  %v4364_v27 = vsel %vm4192_vm9, %v4314_v39, 0.0  ;;  %v4287_v49 = vsub.f32 %v6792_v31, %v6865_v14 }
 0x318   : > { %v4343_v60 = vadd.f32 %v4342_v8, %v4341_v9  ;;  %v4317_v7 = vmul.f32 %v4285_v41, %v4285_v41  ;;  %v4366_v32 = vsel %vm4192_vm9, %v4315_v19, 0.0  ;;  %v4288_v46 = vsub.f32 %v6807_v22, %v6865_v14 }
 0x319   : > { %v4318_v9 = vmul.f32 %v4286_v57, %v4286_v57  ;;  %v4368_v43 = vsel %vm4192_vm9, %v4316_v51, 0.0  ;;  %v4319_v8 = vmul.f32 %v4287_v49, %v4287_v49  ;;  %v4321_v31 = vmul.f32 %v6872_v12, %v6872_v12 }
 0x31a   : > { %v4345_v40 = vadd.f32 %v4344_v58, %v4343_v60  ;;  %v4370_v3 = vsel %vm4192_vm9, %v4317_v7, 0.0  ;;  %v4320_v47 = vmul.f32 %v4288_v46, %v4288_v46  ;;  %v4322_v22 = vmul.f32 %v6876_v28, %v6876_v28 }
 0x31b   : > { %v4372_v53 = vsel %vm4192_vm9, %v4318_v9, 0.0  ;;  %v4324_v16 = vmul.f32 %v6882_v54, %v6882_v54  ;;  %v4326_v45 = vmul.f32 %v6888_v5, %v6888_v5 }
 0x31c   : > { %v4347_v6 = vadd.f32 %v4346_v42, %v4345_v40  ;;  %v4374_v40 = vsel %vm4192_vm9, %v4319_v8, 0.0  ;;  %v4376_v14 = vsel %vm4192_vm9, %v4320_v47, 0.0  ;;  %v4323_v42 = vmul.f32 %v6879_v36, %v6879_v36 }
 0x31d   : > { %v4380_v12 = vsel %vm4192_vm9, %v4322_v22, 0.0  ;;  %v4384_v36 = vsel %vm4192_vm9, %v4324_v16, 0.0  ;;  %v4388_v54 = vsel %vm4192_vm9, %v4326_v45, 0.0 }
 0x31e   : > { %v4349_v24 = vadd.f32 %v4348_v62, %v4347_v6  ;;  %v4378_v6 = vsel %vm4192_vm9, %v4321_v31, 0.0  ;;  %v4382_v28 = vsel %vm4192_vm9, %v4323_v42, 0.0 }
 0x320   : > { %v4351_v56 = vadd.f32 %v4350_v4, %v4349_v24  ;;  %v4325_v24 = vmul.f32 %v6885_v2, %v6885_v2 }
 0x322   : > { %v4353_v11 = vadd.f32 %v4352_v59, %v4351_v56  ;;  %v4386_v56 = vsel %vm4192_vm9, %v4325_v24, 0.0 }
 0x324   : > { %v4355_v63 = vadd.f32 %v4354_v15, %v4353_v11 }
 0x326   : > { %v4357_v55 = vadd.f32 %v4356_v0, %v4355_v63 }
 0x328   : > { %v4359_v33 = vadd.f32 %v4358_v61, %v4357_v55 }
 0x32a   : > { %v4361_v30 = vadd.f32 %v4360_v34, %v4359_v33 }
 0x32c   : > { %v4363_v25 = vadd.f32 %v4362_v26, %v4361_v30 }
 0x32e   : > { %v4365_v37 = vadd.f32 %v4364_v27, %v4363_v25 }
 0x330   : > { %v4367_v1 = vadd.f32 %v4366_v32, %v4365_v37 }
 0x332   : > { %v4369_v17 = vadd.f32 %v4368_v43, %v4367_v1 }
 0x334   : > { %v4371_v60 = vadd.f32 %v4370_v3, %v4369_v17 }
 0x336   : > { %v4373_v58 = vadd.f32 %v4372_v53, %v4371_v60 }
 0x338   : > { %v4375_v44 = vadd.f32 %v4374_v40, %v4373_v58 }
 0x33a   : > { %v4377_v35 = vadd.f32 %v4376_v14, %v4375_v44 }
 0x33c   : > { %v4379_v38 = vadd.f32 %v4378_v6, %v4377_v35 }
 0x33e   : > { %v4381_v62 = vadd.f32 %v4380_v12, %v4379_v38 }
 0x340   : > { %v4383_v13 = vadd.f32 %v4382_v28, %v4381_v62 }
 0x342   : > { %v4385_v4 = vadd.f32 %v4384_v36, %v4383_v13 }
 0x344   : > { %v4387_v52 = vadd.f32 %v4386_v56, %v4385_v4 }
 0x346   : > { %v4389_v50 = vadd.f32 %v4388_v54, %v4387_v52 }
 0x348   : > { %v4390_v59 = vrot.slane %v4389_v50, 4 }
 0x34a   : > { %v4391_v11 = vadd.f32 %v4390_v59, %v4389_v50 }
 0x34c   : > { %v4392_v20 = vrot.slane %v4391_v11, 2 }
 0x34e   : > { %v4393_v2 = vadd.f32 %v4392_v20, %v4391_v11 }
 0x350   : > { %v4394_v10 = vrot.slane %v4393_v2, 1 }
 0x352   : > { %v4395_v15 = vadd.f32 %v4394_v10, %v4393_v2 }
 0x354   : > { %4398 = vst.msk [vmem:[%s6863_s25 + $0x1] sm:$0x1] %vm4396_vm10, %v4395_v15 }
 0x355 PF: > { %s14_s14 = sadd.s32 1, %s5254_s14   ;;  %s7012_s12 = smov %s5250_s13 }
 0x356   : > { %p11_p6 = scmp.ge.s32.totalorder %s14_s14, 4   ;;  %s7013_s13 = smov %s7015_s15 }
 0x358   :  { %13 = sbr.rel (!%p11_p6) target bundleno = 2 (0x2), region = 81 }

</bundles_post_ra>
